<compile_context>
chip_gen: v6e
topology: v6e:2x2x1
jax: 0.10.0
libtpu: 0.0.40
codegen_flags: <defaults>
</compile_context>

<pallas_src>
import functools

import jax
import jax.numpy as jnp
from jax import lax
from jax.scipy.linalg import block_diag
from jax.experimental import pallas as pl
from jax.experimental.pallas import tpu as pltpu


# ---------------------------------------------------------------------------
# Fused OSBlock kernel (one grid step == B_TILE images)
# ---------------------------------------------------------------------------
def _osblock_kernel(x_ref, w01_ref, b01_ref, pwf_ref, pwr_ref, dw_ref, bnb_ref,
                    gw1_ref, gb1_ref, gw2_ref, gb2_ref, c3w_ref, o_ref,
                    *, H, W, mid, cout, n_branches, ew_dtype):
    nb = n_branches
    C = nb * mid                      # stacked branch channels (4*32 = 128 lanes)
    Bt = x_ref.shape[0]
    M = H * W
    rows = Bt * M
    f32 = jnp.float32

    def mm(a, w):                     # MXU matmul, f32 accumulation
        return jnp.dot(a.astype(w.dtype), w, preferred_element_type=f32)

    x = x_ref[...].reshape(rows, x_ref.shape[2])                 # (rows, Cin)

    # ---- fused [downsample | conv1] 1x1 (BN scales folded into the weights) --
    xw = mm(x, w01_ref[...]) + b01_ref[...]                      # (rows, Cout+mid)
    ident = xw[:, :cout]                                         # ds + dsb + c3b
    x1 = jnp.maximum(xw[:, cout:], 0.0)                          # conv1 + ReLU

    # ---- hoisted constants for the depthwise stages -------------------------
    col = lax.broadcasted_iota(jnp.int32, (1, 1, W, 1), 2)
    mask_l = (col > 0).astype(ew_dtype)                          # zero at j == 0
    mask_r = (col < W - 1).astype(ew_dtype)                      # zero at j == W-1
    lane = lax.broadcasted_iota(jnp.int32, (1, C), 1)

    def roll_w(v, shift):             # roll along W (sublane axis -> XLU slot)
        v3 = v.reshape(Bt * H, W, C)
        return pltpu.roll(v3, shift, 1).reshape(Bt, H, W, C)

    def dw_stage(y, stage):
        # depthwise 3x3 (pad=1) + folded-BN bias + ReLU, all 4 branches stacked
        y4 = y.reshape(Bt, H, W, C).astype(ew_dtype)
        ym1 = roll_w(y4, 1) * mask_l                             # y[.., j-1, :]
        yp1 = roll_w(y4, W - 1) * mask_r                         # y[.., j+1, :]
        w = dw_ref[stage].astype(ew_dtype)                       # (9, C), scale folded
        g0 = w[0] * ym1 + w[1] * y4 + w[2] * yp1                 # kernel row u = 0
        g1 = w[3] * ym1 + w[4] * y4 + w[5] * yp1                 # u = 1
        g2 = w[6] * ym1 + w[7] * y4 + w[8] * yp1                 # u = 2
        # vertical combine: out[i] = g0[i-1] + g1[i] + g2[i+1]  (zero outside)
        top = g1[:, 0:1] + g2[:, 1:2]
        mid_rows = g0[:, 0:H - 2] + g1[:, 1:H - 1] + g2[:, 2:H]
        bot = g0[:, H - 2:H - 1] + g1[:, H - 1:H]
        acc = jnp.concatenate([top, mid_rows, bot], axis=1)
        bias = bnb_ref[stage].astype(ew_dtype)                   # (C,)
        return jnp.maximum(acc + bias, 0.0).reshape(rows, C)

    # ---- branch section: four LightConv chains stacked along the lane axis --
    y = dw_stage(mm(x1, pwf_ref[...]), 0)                        # stage 0: all branches
    for s in range(1, nb):
        y_new = dw_stage(mm(y, pwr_ref[s - 1]), s)               # block-diag pw + dw
        keep = lane < (s * mid)                                  # finished-branch lanes
        y = jnp.where(keep, y, y_new)                            # keep exact values

    # ---- shared ChannelGate on all four branches at once (block-diag fc) ----
    y3 = y.reshape(Bt, M, C)
    pooled = jnp.mean(y3.astype(f32), axis=1)                    # (Bt, C), per image
    h = jnp.maximum(jnp.dot(pooled, gw1_ref[...], preferred_element_type=f32)
                    + gb1_ref[...], 0.0)                         # (Bt, nb*cr)
    g = jax.nn.sigmoid(jnp.dot(h, gw2_ref[...], preferred_element_type=f32)
                       + gb2_ref[...])                           # (Bt, C)
    gated = (y3 * g[:, None, :].astype(y3.dtype)).reshape(rows, C)

    # ---- conv3 (branch sum folded into row-stacked weight, BN scale folded),
    #      residual add, final ReLU ------------------------------------------
    x3 = mm(gated, c3w_ref[...])                                 # (rows, Cout)
    out = jnp.maximum(x3.astype(f32) + ident, 0.0)
    o_ref[...] = out.reshape(Bt, M, cout).astype(o_ref.dtype)


# ---------------------------------------------------------------------------
# pallas_call wrapper
# ---------------------------------------------------------------------------
def _const_spec(arr):
    zeros = (0,) * arr.ndim
    return pl.BlockSpec(arr.shape, lambda n, _z=zeros: _z)


def _pick_batch_tile(N, M, target_rows=256):
    """Images per grid step: aim for >=256-row matmul LHS, keep >=2 grid steps."""
    want = max(1, target_rows // max(M, 1))
    bt = 1
    for d in range(1, N + 1):
        if N % d == 0 and d <= want:
            bt = d
    if N // bt < 2:                          # prefer work for both v7x TensorCores
        for d in range(bt - 1, 0, -1):
            if N % d == 0 and N // d >= 2:
                bt = d
                break
    return bt


def _osblock_pallas(x_flat, packed, H, W, mid, n_branches, out_channels,
                    ew_dtype=jnp.float32):
    N, M, Cin = x_flat.shape
    C = n_branches * mid
    names = ["w01", "b01", "pw_first", "pw_rest", "dw", "bnb",
             "gw1", "gb1", "gw2", "gb2", "c3w"]
    consts = [packed[k] for k in names]

    bt = _pick_batch_tile(N, M)
    grid = (N // bt,)

    kernel = functools.partial(_osblock_kernel, H=H, W=W, mid=mid,
                               cout=out_channels, n_branches=n_branches,
                               ew_dtype=ew_dtype)

    # advisory cost + explicit VMEM budget
    macs_px = (Cin * (out_channels + mid) + mid * C
               + (n_branches - 1) * C * C + n_branches * 9 * C
               + C * out_channels)
    const_bytes = int(sum(a.size * a.dtype.itemsize for a in consts))
    cost = pl.CostEstimate(
        flops=2 * N * M * macs_px,
        transcendentals=N * C,
        bytes_accessed=N * M * (Cin + out_channels) * 4 + const_bytes)

    live_bytes = 14 * bt * M * C * 4                       # rough live intermediates
    io_bytes = 2 * bt * M * (Cin + out_channels) * 4       # double-buffered in/out
    vmem_limit = int(min(64 * 2**20,
                         max(16 * 2**20, 2 * (const_bytes + live_bytes + io_bytes))))

    return pl.pallas_call(
        kernel,
        out_shape=jax.ShapeDtypeStruct((N, M, out_channels), jnp.float32),
        grid=grid,
        in_specs=[pl.BlockSpec((bt, M, Cin), lambda n: (n, 0, 0))]
                 + [_const_spec(a) for a in consts],
        out_specs=pl.BlockSpec((bt, M, out_channels), lambda n: (n, 0, 0)),
        compiler_params=pltpu.CompilerParams(
            dimension_semantics=("parallel",),
            vmem_limit_bytes=vmem_limit),
        cost_estimate=cost,
    )(x_flat, *consts)


# ---------------------------------------------------------------------------
# Parameter construction (deterministic, synthetic) and lane-dense packing
# ---------------------------------------------------------------------------
def make_params(key, in_channels, out_channels, reduction=16, bottleneck_reduction=4):
    mid = out_channels // bottleneck_reduction
    cr = mid // reduction
    assert cr >= 1
    keys = list(jax.random.split(key, 200))
    it = iter(keys)

    def nrm(shape, std=0.1):
        return std * jax.random.normal(next(it), shape, jnp.float32)

    def bn_fold(c):
        gamma = 1.0 + 0.1 * jax.random.normal(next(it), (c,), jnp.float32)
        beta = 0.1 * jax.random.normal(next(it), (c,), jnp.float32)
        mean = 0.1 * jax.random.normal(next(it), (c,), jnp.float32)
        var = jnp.abs(jax.random.normal(next(it), (c,), jnp.float32)) + 0.5
        scale = gamma / jnp.sqrt(var + 1e-5)
        return scale, beta - mean * scale

    def light_conv_params():
        s, b = bn_fold(mid)
        return {"pw_w": nrm((mid, mid)),       # 1x1 linear conv
                "dw_w": nrm((3, 3, mid)),      # depthwise 3x3, (kh, kw, C)
                "bn_s": s, "bn_b": b}

    p = {}
    p["conv1_w"] = nrm((in_channels, mid))
    p["conv1_s"], p["conv1_b"] = bn_fold(mid)
    p["conv2a"] = [light_conv_params() for _ in range(1)]
    p["conv2b"] = [light_conv_params() for _ in range(2)]
    p["conv2c"] = [light_conv_params() for _ in range(3)]
    p["conv2d"] = [light_conv_params() for _ in range(4)]
    p["gate_w1"] = nrm((mid, cr))
    p["gate_b1"] = nrm((cr,))
    p["gate_w2"] = nrm((cr, mid))
    p["gate_b2"] = nrm((mid,))
    p["conv3_w"] = nrm((mid, out_channels))
    p["conv3_s"], p["conv3_b"] = bn_fold(out_channels)
    p["ds_w"] = nrm((in_channels, out_channels))     # downsample (in != out)
    p["ds_s"], p["ds_b"] = bn_fold(out_channels)
    return p


def pack_params(p, matmul_dtype=jnp.bfloat16):
    """Stack / block-diagonalise branch weights and fold all BN scales (in f32)."""
    mid = p["conv1_w"].shape[1]
    cout = p["conv3_w"].shape[1]
    branches = [p["conv2a"], p["conv2b"], p["conv2c"], p["conv2d"]]
    nb = len(branches)
    C = nb * mid
    cr = p["gate_w1"].shape[1]
    f32 = jnp.float32

    eye = jnp.eye(mid, dtype=f32)
    dw_id = jnp.zeros((9, mid), f32).at[4, :].set(1.0)   # centre tap = 1
    zeros = jnp.zeros((mid,), f32)

    # fused [downsample | conv1] 1x1; BN scales folded, biases merged
    dsw = p["ds_w"] * p["ds_s"][None, :]
    c1w = p["conv1_w"] * p["conv1_s"][None, :]
    w01 = jnp.concatenate([dsw, c1w], axis=1)                        # (Cin, Cout+mid)
    b01 = jnp.concatenate([p["ds_b"] + p["conv3_b"],
                           p["conv1_b"]]).reshape(1, cout + mid)

    # stage 0: all four branches read x1 -> one (mid, 4*mid) weight
    pw_first = jnp.concatenate([b[0]["pw_w"] for b in branches], axis=1)

    pw_rest, dw_all, bnb_all = [], [], []
    for s in range(nb):
        blocks, dws, bs = [], [], []
        for b in branches:
            if s < len(b):
                lp = b[s]
                blocks.append(lp["pw_w"])
                dws.append(lp["dw_w"].reshape(9, mid) * lp["bn_s"][None, :])  # fold BN
                bs.append(lp["bn_b"])
            else:                       # finished branch: exact pass-through
                blocks.append(eye)
                dws.append(dw_id)
                bs.append(zeros)
        if s > 0:
            pw_rest.append(block_diag(*blocks))                      # (C, C)
        dw_all.append(jnp.concatenate(dws, axis=1))                  # (9, C)
        bnb_all.append(jnp.concatenate(bs))                          # (C,)

    # conv3: branch-sum folded (row-stacked), BN scale folded into columns
    c3w = jnp.concatenate([p["conv3_w"] * p["conv3_s"][None, :]] * nb, axis=0)

    md = matmul_dtype
    return {
        "w01": w01.astype(md),                                   # (Cin, Cout+mid)
        "b01": b01,                                              # (1, Cout+mid) f32
        "pw_first": pw_first.astype(md),                         # (mid, C)
        "pw_rest": jnp.stack(pw_rest).astype(md),                # (3, C, C)
        "dw": jnp.stack(dw_all),                                 # (4, 9, C) f32 (VPU)
        "bnb": jnp.stack(bnb_all),                               # (4, C)
        "gw1": block_diag(*([p["gate_w1"]] * nb)),               # (C, nb*cr) f32
        "gb1": jnp.tile(p["gate_b1"], nb).reshape(1, nb * cr),
        "gw2": block_diag(*([p["gate_w2"]] * nb)),               # (nb*cr, C) f32
        "gb2": jnp.tile(p["gate_b2"], nb).reshape(1, C),
        "c3w": c3w.astype(md),                                   # (C, Cout)
    }


# ---------------------------------------------------------------------------
# OSBlock forward (PyTorch-style NCHW in / NCHW out)
# ---------------------------------------------------------------------------
def osblock_forward(x_nchw, p, matmul_dtype=jnp.bfloat16, ew_dtype=jnp.float32):
    N, Cin, H, W = x_nchw.shape
    assert H >= 3, "row-strip / tiny-H path not implemented"   # TODO(synk)
    mid = p["conv1_w"].shape[1]
    Cout = p["conv3_w"].shape[1]
    nb = 4
    # TODO(synk): keep the surrounding model NHWC in production; these
    # transposes exist only for PyTorch interface parity.
    x = jnp.transpose(x_nchw, (0, 2, 3, 1)).reshape(N, H * W, Cin)
    packed = pack_params(p, matmul_dtype=matmul_dtype)
    out = _osblock_pallas(x, packed, H, W, mid, nb, Cout, ew_dtype=ew_dtype)
    return jnp.transpose(out.reshape(N, H, W, Cout), (0, 3, 1, 2))


# ---------------------------------------------------------------------------
# Pure-JAX reference (branch-by-branch, f32) for a self-check
# ---------------------------------------------------------------------------
def osblock_reference(x_nchw, p):
    x = jnp.transpose(x_nchw, (0, 2, 3, 1))          # NHWC
    N, H, W, Cin = x.shape

    def pw(v, w):                                    # 1x1 conv
        return jnp.einsum("nhwc,cd->nhwd", v, w)

    def dw3(v, w):                                   # depthwise 3x3, pad=1
        vp = jnp.pad(v, ((0, 0), (1, 1), (1, 1), (0, 0)))
        out = jnp.zeros_like(v)
        for dy in range(3):
            for dx in range(3):
                out = out + vp[:, dy:dy + H, dx:dx + W, :] * w[dy, dx]
        return out

    def light(v, lp):
        v = dw3(pw(v, lp["pw_w"]), lp["dw_w"])
        return jnp.maximum(v * lp["bn_s"] + lp["bn_b"], 0.0)

    def branch(v, lps):
        for lp in lps:
            v = light(v, lp)
        return v

    def gate(v):
        pooled = jnp.mean(v, axis=(1, 2))                              # (N, mid)
        h = jnp.maximum(pooled @ p["gate_w1"] + p["gate_b1"], 0.0)
        g = jax.nn.sigmoid(h @ p["gate_w2"] + p["gate_b2"])
        return v * g[:, None, None, :]

    x1 = jnp.maximum(pw(x, p["conv1_w"]) * p["conv1_s"] + p["conv1_b"], 0.0)
    x2 = (gate(branch(x1, p["conv2a"])) + gate(branch(x1, p["conv2b"]))
          + gate(branch(x1, p["conv2c"])) + gate(branch(x1, p["conv2d"])))
    x3 = pw(x2, p["conv3_w"]) * p["conv3_s"] + p["conv3_b"]
    ident = pw(x, p["ds_w"]) * p["ds_s"] + p["ds_b"]
    out = jnp.maximum(x3 + ident, 0.0)
    return jnp.transpose(out, (0, 3, 1, 2))


if __name__ == "__main__":
    key = jax.random.PRNGKey(0)
    kx, kp = jax.random.split(key)

    N, Cin, H, W = 4, 32, 8, 8
    Cout = 128                       # mid = 32 -> stacked branch width = 128 lanes

    x = jax.random.normal(kx, (N, Cin, H, W), jnp.float32)
    params = make_params(kp, Cin, Cout)

    fwd = jax.jit(functools.partial(osblock_forward, matmul_dtype=jnp.bfloat16))
    out = jax.block_until_ready(fwd(x, params))
    ref = jax.block_until_ready(jax.jit(osblock_reference)(x, params))

    assert out.shape == (N, Cout, H, W)
    assert bool(jnp.all(jnp.isfinite(out)))
    assert bool(jnp.all(out >= 0.0))            # final ReLU
    err = float(jnp.max(jnp.abs(out - ref)))
    tol = 0.05 * max(1.0, float(jnp.max(jnp.abs(ref))))   # loose: bf16 MXU operands
    assert err <= tol, f"max abs err {err} > tol {tol}"
    print("KERNEL_OK")
</pallas_src>

<mosaic_0001>
module attributes {stable_mosaic.version = 11 : i64} {
  func.func @_osblock_kernel(%arg0: i32, %arg1: memref<2x64x32xf32, #tpu.memory_space<vmem>>, %arg2: memref<32x160xbf16, #tpu.memory_space<vmem>>, %arg3: memref<1x160xf32, #tpu.memory_space<vmem>>, %arg4: memref<32x128xbf16, #tpu.memory_space<vmem>>, %arg5: memref<3x128x128xbf16, #tpu.memory_space<vmem>>, %arg6: memref<4x9x128xf32, #tpu.memory_space<vmem>>, %arg7: memref<4x128xf32, #tpu.memory_space<vmem>>, %arg8: memref<128x8xf32, #tpu.memory_space<vmem>>, %arg9: memref<1x8xf32, #tpu.memory_space<vmem>>, %arg10: memref<8x128xf32, #tpu.memory_space<vmem>>, %arg11: memref<1x128xf32, #tpu.memory_space<vmem>>, %arg12: memref<128x128xbf16, #tpu.memory_space<vmem>>, %arg13: memref<2x64x128xf32, #tpu.memory_space<vmem>>) attributes {dimension_semantics = [#tpu.dimension_semantics<parallel>], iteration_bounds = array<i64: 2>, scalar_prefetch = 0 : i64, scratch_operands = 0 : i64, tpu.core_type = #tpu.core_type<tc>, window_params = [{transform_indices = @transform_0, window_bounds = array<i64: 2, 64, 32>}, {pipeline_mode = #tpu.pipeline_mode<synchronous>, transform_indices = @transform_1, window_bounds = array<i64: 32, 160>}, {pipeline_mode = #tpu.pipeline_mode<synchronous>, transform_indices = @transform_2, window_bounds = array<i64: 1, 160>}, {pipeline_mode = #tpu.pipeline_mode<synchronous>, transform_indices = @transform_3, window_bounds = array<i64: 32, 128>}, {pipeline_mode = #tpu.pipeline_mode<synchronous>, transform_indices = @transform_4, window_bounds = array<i64: 3, 128, 128>}, {pipeline_mode = #tpu.pipeline_mode<synchronous>, transform_indices = @transform_5, window_bounds = array<i64: 4, 9, 128>}, {pipeline_mode = #tpu.pipeline_mode<synchronous>, transform_indices = @transform_6, window_bounds = array<i64: 4, 128>}, {pipeline_mode = #tpu.pipeline_mode<synchronous>, transform_indices = @transform_7, window_bounds = array<i64: 128, 8>}, {pipeline_mode = #tpu.pipeline_mode<synchronous>, transform_indices = @transform_8, window_bounds = array<i64: 1, 8>}, {pipeline_mode = #tpu.pipeline_mode<synchronous>, transform_indices = @transform_9, window_bounds = array<i64: 8, 128>}, {pipeline_mode = #tpu.pipeline_mode<synchronous>, transform_indices = @transform_10, window_bounds = array<i64: 1, 128>}, {pipeline_mode = #tpu.pipeline_mode<synchronous>, transform_indices = @transform_11, window_bounds = array<i64: 128, 128>}, {transform_indices = @transform_12, window_bounds = array<i64: 2, 64, 128>}]} {
    %c0 = arith.constant 0 : index
    %c0_0 = arith.constant 0 : index
    %c0_1 = arith.constant 0 : index
    %0 = vector.load %arg1[%c0, %c0_0, %c0_1] : memref<2x64x32xf32, #tpu.memory_space<vmem>>, vector<2x64x32xf32>
    %1 = vector.shape_cast %0 : vector<2x64x32xf32> to vector<128x32xf32>
    %c0_2 = arith.constant 0 : index
    %c0_3 = arith.constant 0 : index
    %2 = vector.load %arg2[%c0_2, %c0_3] : memref<32x160xbf16, #tpu.memory_space<vmem>>, vector<32x160xbf16>
    %3 = arith.truncf %1 : vector<128x32xf32> to vector<128x32xbf16>
    %cst = arith.constant dense<0.000000e+00> : vector<128x160xf32>
    %4 = tpu.matmul %3, %2, %cst {dimension_numbers = #tpu.dot_dimension_numbers<[1], [0], [0], [1], [0, 0, 1, 1], [], []>} : vector<128x32xbf16>, vector<32x160xbf16>, vector<128x160xf32> -> vector<128x160xf32>
    %c0_4 = arith.constant 0 : index
    %c0_5 = arith.constant 0 : index
    %5 = vector.load %arg3[%c0_4, %c0_5] : memref<1x160xf32, #tpu.memory_space<vmem>>, vector<1x160xf32>
    %6 = vector.broadcast %5 : vector<1x160xf32> to vector<128x160xf32>
    %7 = arith.addf %4, %6 : vector<128x160xf32>
    %8 = vector.extract_strided_slice %7 {offsets = [0, 0], sizes = [128, 128], strides = [1, 1]} : vector<128x160xf32> to vector<128x128xf32>
    %9 = vector.extract_strided_slice %7 {offsets = [0, 128], sizes = [128, 32], strides = [1, 1]} : vector<128x160xf32> to vector<128x32xf32>
    %cst_6 = arith.constant 0.000000e+00 : f32
    %10 = vector.broadcast %cst_6 : f32 to vector<128x32xf32>
    %11 = arith.maximumf %9, %10 : vector<128x32xf32>
    %12 = tpu.iota {dimensions = array<i32: 2>} : vector<1x1x8x1xi32>
    %c0_i32 = arith.constant 0 : i32
    %13 = vector.broadcast %c0_i32 : i32 to vector<1x1x8x1xi32>
    %14 = arith.cmpi sgt, %12, %13 : vector<1x1x8x1xi32>
    %15 = arith.extui %14 : vector<1x1x8x1xi1> to vector<1x1x8x1xi32>
    %16 = arith.sitofp %15 : vector<1x1x8x1xi32> to vector<1x1x8x1xf32>
    %c7_i32 = arith.constant 7 : i32
    %17 = vector.broadcast %c7_i32 : i32 to vector<1x1x8x1xi32>
    %18 = arith.cmpi slt, %12, %17 : vector<1x1x8x1xi32>
    %19 = arith.extui %18 : vector<1x1x8x1xi1> to vector<1x1x8x1xi32>
    %20 = arith.sitofp %19 : vector<1x1x8x1xi32> to vector<1x1x8x1xf32>
    %21 = tpu.iota {dimensions = array<i32: 1>} : vector<1x128xi32>
    %c0_7 = arith.constant 0 : index
    %c0_8 = arith.constant 0 : index
    %22 = vector.load %arg4[%c0_7, %c0_8] : memref<32x128xbf16, #tpu.memory_space<vmem>>, vector<32x128xbf16>
    %23 = arith.truncf %11 : vector<128x32xf32> to vector<128x32xbf16>
    %cst_9 = arith.constant dense<0.000000e+00> : vector<128x128xf32>
    %24 = tpu.matmul %23, %22, %cst_9 {dimension_numbers = #tpu.dot_dimension_numbers<[1], [0], [0], [1], [0, 0, 1, 1], [], []>} : vector<128x32xbf16>, vector<32x128xbf16>, vector<128x128xf32> -> vector<128x128xf32>
    %25 = vector.shape_cast %24 : vector<128x128xf32> to vector<2x8x8x128xf32>
    %26 = vector.shape_cast %25 : vector<2x8x8x128xf32> to vector<16x8x128xf32>
    %c1_i32 = arith.constant 1 : i32
    %27 = tpu.dynamic_rotate %26 by %c1_i32 dim 1 : vector<16x8x128xf32>, i32 -> vector<16x8x128xf32>
    %28 = vector.shape_cast %27 : vector<16x8x128xf32> to vector<2x8x8x128xf32>
    %29 = vector.broadcast %16 : vector<1x1x8x1xf32> to vector<2x8x8x128xf32>
    %30 = arith.mulf %28, %29 : vector<2x8x8x128xf32>
    %31 = vector.shape_cast %25 : vector<2x8x8x128xf32> to vector<16x8x128xf32>
    %c7_i32_10 = arith.constant 7 : i32
    %32 = tpu.dynamic_rotate %31 by %c7_i32_10 dim 1 : vector<16x8x128xf32>, i32 -> vector<16x8x128xf32>
    %33 = vector.shape_cast %32 : vector<16x8x128xf32> to vector<2x8x8x128xf32>
    %34 = vector.broadcast %20 : vector<1x1x8x1xf32> to vector<2x8x8x128xf32>
    %35 = arith.mulf %33, %34 : vector<2x8x8x128xf32>
    %c0_11 = arith.constant 0 : index
    %c0_12 = arith.constant 0 : index
    %c0_13 = arith.constant 0 : index
    %36 = vector.load %arg6[%c0_11, %c0_12, %c0_13] : memref<4x9x128xf32, #tpu.memory_space<vmem>>, vector<1x9x128xf32>
    %37 = vector.shape_cast %36 : vector<1x9x128xf32> to vector<9x128xf32>
    %38 = vector.extract_strided_slice %37 {offsets = [0, 0], sizes = [1, 128], strides = [1, 1]} : vector<9x128xf32> to vector<1x128xf32>
    %39 = vector.shape_cast %38 : vector<1x128xf32> to vector<128xf32>
    %40 = vector.shape_cast %39 : vector<128xf32> to vector<1x1x1x128xf32>
    %41 = vector.broadcast %40 : vector<1x1x1x128xf32> to vector<2x8x8x128xf32>
    %42 = arith.mulf %41, %30 : vector<2x8x8x128xf32>
    %43 = vector.extract_strided_slice %37 {offsets = [1, 0], sizes = [1, 128], strides = [1, 1]} : vector<9x128xf32> to vector<1x128xf32>
    %44 = vector.shape_cast %43 : vector<1x128xf32> to vector<128xf32>
    %45 = vector.shape_cast %44 : vector<128xf32> to vector<1x1x1x128xf32>
    %46 = vector.broadcast %45 : vector<1x1x1x128xf32> to vector<2x8x8x128xf32>
    %47 = arith.mulf %46, %25 : vector<2x8x8x128xf32>
    %48 = arith.addf %42, %47 : vector<2x8x8x128xf32>
    %49 = vector.extract_strided_slice %37 {offsets = [2, 0], sizes = [1, 128], strides = [1, 1]} : vector<9x128xf32> to vector<1x128xf32>
    %50 = vector.shape_cast %49 : vector<1x128xf32> to vector<128xf32>
    %51 = vector.shape_cast %50 : vector<128xf32> to vector<1x1x1x128xf32>
    %52 = vector.broadcast %51 : vector<1x1x1x128xf32> to vector<2x8x8x128xf32>
    %53 = arith.mulf %52, %35 : vector<2x8x8x128xf32>
    %54 = arith.addf %48, %53 : vector<2x8x8x128xf32>
    %55 = vector.extract_strided_slice %37 {offsets = [3, 0], sizes = [1, 128], strides = [1, 1]} : vector<9x128xf32> to vector<1x128xf32>
    %56 = vector.shape_cast %55 : vector<1x128xf32> to vector<128xf32>
    %57 = vector.shape_cast %56 : vector<128xf32> to vector<1x1x1x128xf32>
    %58 = vector.broadcast %57 : vector<1x1x1x128xf32> to vector<2x8x8x128xf32>
    %59 = arith.mulf %58, %30 : vector<2x8x8x128xf32>
    %60 = vector.extract_strided_slice %37 {offsets = [4, 0], sizes = [1, 128], strides = [1, 1]} : vector<9x128xf32> to vector<1x128xf32>
    %61 = vector.shape_cast %60 : vector<1x128xf32> to vector<128xf32>
    %62 = vector.shape_cast %61 : vector<128xf32> to vector<1x1x1x128xf32>
    %63 = vector.broadcast %62 : vector<1x1x1x128xf32> to vector<2x8x8x128xf32>
    %64 = arith.mulf %63, %25 : vector<2x8x8x128xf32>
    %65 = arith.addf %59, %64 : vector<2x8x8x128xf32>
    %66 = vector.extract_strided_slice %37 {offsets = [5, 0], sizes = [1, 128], strides = [1, 1]} : vector<9x128xf32> to vector<1x128xf32>
    %67 = vector.shape_cast %66 : vector<1x128xf32> to vector<128xf32>
    %68 = vector.shape_cast %67 : vector<128xf32> to vector<1x1x1x128xf32>
    %69 = vector.broadcast %68 : vector<1x1x1x128xf32> to vector<2x8x8x128xf32>
    %70 = arith.mulf %69, %35 : vector<2x8x8x128xf32>
    %71 = arith.addf %65, %70 : vector<2x8x8x128xf32>
    %72 = vector.extract_strided_slice %37 {offsets = [6, 0], sizes = [1, 128], strides = [1, 1]} : vector<9x128xf32> to vector<1x128xf32>
    %73 = vector.shape_cast %72 : vector<1x128xf32> to vector<128xf32>
    %74 = vector.shape_cast %73 : vector<128xf32> to vector<1x1x1x128xf32>
    %75 = vector.broadcast %74 : vector<1x1x1x128xf32> to vector<2x8x8x128xf32>
    %76 = arith.mulf %75, %30 : vector<2x8x8x128xf32>
    %77 = vector.extract_strided_slice %37 {offsets = [7, 0], sizes = [1, 128], strides = [1, 1]} : vector<9x128xf32> to vector<1x128xf32>
    %78 = vector.shape_cast %77 : vector<1x128xf32> to vector<128xf32>
    %79 = vector.shape_cast %78 : vector<128xf32> to vector<1x1x1x128xf32>
    %80 = vector.broadcast %79 : vector<1x1x1x128xf32> to vector<2x8x8x128xf32>
    %81 = arith.mulf %80, %25 : vector<2x8x8x128xf32>
    %82 = arith.addf %76, %81 : vector<2x8x8x128xf32>
    %83 = vector.extract_strided_slice %37 {offsets = [8, 0], sizes = [1, 128], strides = [1, 1]} : vector<9x128xf32> to vector<1x128xf32>
    %84 = vector.shape_cast %83 : vector<1x128xf32> to vector<128xf32>
    %85 = vector.shape_cast %84 : vector<128xf32> to vector<1x1x1x128xf32>
    %86 = vector.broadcast %85 : vector<1x1x1x128xf32> to vector<2x8x8x128xf32>
    %87 = arith.mulf %86, %35 : vector<2x8x8x128xf32>
    %88 = arith.addf %82, %87 : vector<2x8x8x128xf32>
    %89 = vector.extract_strided_slice %71 {offsets = [0, 0, 0, 0], sizes = [2, 1, 8, 128], strides = [1, 1, 1, 1]} : vector<2x8x8x128xf32> to vector<2x1x8x128xf32>
    %90 = vector.extract_strided_slice %88 {offsets = [0, 1, 0, 0], sizes = [2, 1, 8, 128], strides = [1, 1, 1, 1]} : vector<2x8x8x128xf32> to vector<2x1x8x128xf32>
    %91 = arith.addf %89, %90 : vector<2x1x8x128xf32>
    %92 = vector.extract_strided_slice %54 {offsets = [0, 0, 0, 0], sizes = [2, 6, 8, 128], strides = [1, 1, 1, 1]} : vector<2x8x8x128xf32> to vector<2x6x8x128xf32>
    %93 = vector.extract_strided_slice %71 {offsets = [0, 1, 0, 0], sizes = [2, 6, 8, 128], strides = [1, 1, 1, 1]} : vector<2x8x8x128xf32> to vector<2x6x8x128xf32>
    %94 = arith.addf %92, %93 : vector<2x6x8x128xf32>
    %95 = vector.extract_strided_slice %88 {offsets = [0, 2, 0, 0], sizes = [2, 6, 8, 128], strides = [1, 1, 1, 1]} : vector<2x8x8x128xf32> to vector<2x6x8x128xf32>
    %96 = arith.addf %94, %95 : vector<2x6x8x128xf32>
    %97 = vector.extract_strided_slice %54 {offsets = [0, 6, 0, 0], sizes = [2, 1, 8, 128], strides = [1, 1, 1, 1]} : vector<2x8x8x128xf32> to vector<2x1x8x128xf32>
    %98 = vector.extract_strided_slice %71 {offsets = [0, 7, 0, 0], sizes = [2, 1, 8, 128], strides = [1, 1, 1, 1]} : vector<2x8x8x128xf32> to vector<2x1x8x128xf32>
    %99 = arith.addf %97, %98 : vector<2x1x8x128xf32>
    %100 = tpu.concatenate %91, %96, %99 in 1 : vector<2x1x8x128xf32>, vector<2x6x8x128xf32>, vector<2x1x8x128xf32> -> vector<2x8x8x128xf32>
    %c0_14 = arith.constant 0 : index
    %c0_15 = arith.constant 0 : index
    %101 = vector.load %arg7[%c0_14, %c0_15] : memref<4x128xf32, #tpu.memory_space<vmem>>, vector<1x128xf32>
    %102 = vector.shape_cast %101 : vector<1x128xf32> to vector<128xf32>
    %103 = vector.shape_cast %102 : vector<128xf32> to vector<1x1x1x128xf32>
    %104 = vector.broadcast %103 : vector<1x1x1x128xf32> to vector<2x8x8x128xf32>
    %105 = arith.addf %100, %104 : vector<2x8x8x128xf32>
    %cst_16 = arith.constant 0.000000e+00 : f32
    %106 = vector.broadcast %cst_16 : f32 to vector<2x8x8x128xf32>
    %107 = arith.maximumf %105, %106 : vector<2x8x8x128xf32>
    %108 = vector.shape_cast %107 : vector<2x8x8x128xf32> to vector<128x128xf32>
    %c0_17 = arith.constant 0 : index
    %c0_18 = arith.constant 0 : index
    %c0_19 = arith.constant 0 : index
    %109 = vector.load %arg5[%c0_17, %c0_18, %c0_19] : memref<3x128x128xbf16, #tpu.memory_space<vmem>>, vector<1x128x128xbf16>
    %110 = vector.shape_cast %109 : vector<1x128x128xbf16> to vector<128x128xbf16>
    %111 = arith.truncf %108 : vector<128x128xf32> to vector<128x128xbf16>
    %cst_20 = arith.constant dense<0.000000e+00> : vector<128x128xf32>
    %112 = tpu.matmul %111, %110, %cst_20 {dimension_numbers = #tpu.dot_dimension_numbers<[1], [0], [0], [1], [0, 0, 1, 1], [], []>} : vector<128x128xbf16>, vector<128x128xbf16>, vector<128x128xf32> -> vector<128x128xf32>
    %113 = vector.shape_cast %112 : vector<128x128xf32> to vector<2x8x8x128xf32>
    %114 = vector.shape_cast %113 : vector<2x8x8x128xf32> to vector<16x8x128xf32>
    %c1_i32_21 = arith.constant 1 : i32
    %115 = tpu.dynamic_rotate %114 by %c1_i32_21 dim 1 : vector<16x8x128xf32>, i32 -> vector<16x8x128xf32>
    %116 = vector.shape_cast %115 : vector<16x8x128xf32> to vector<2x8x8x128xf32>
    %117 = vector.broadcast %16 : vector<1x1x8x1xf32> to vector<2x8x8x128xf32>
    %118 = arith.mulf %116, %117 : vector<2x8x8x128xf32>
    %119 = vector.shape_cast %113 : vector<2x8x8x128xf32> to vector<16x8x128xf32>
    %c7_i32_22 = arith.constant 7 : i32
    %120 = tpu.dynamic_rotate %119 by %c7_i32_22 dim 1 : vector<16x8x128xf32>, i32 -> vector<16x8x128xf32>
    %121 = vector.shape_cast %120 : vector<16x8x128xf32> to vector<2x8x8x128xf32>
    %122 = vector.broadcast %20 : vector<1x1x8x1xf32> to vector<2x8x8x128xf32>
    %123 = arith.mulf %121, %122 : vector<2x8x8x128xf32>
    %c1 = arith.constant 1 : index
    %c0_23 = arith.constant 0 : index
    %c0_24 = arith.constant 0 : index
    %124 = vector.load %arg6[%c1, %c0_23, %c0_24] : memref<4x9x128xf32, #tpu.memory_space<vmem>>, vector<1x9x128xf32>
    %125 = vector.shape_cast %124 : vector<1x9x128xf32> to vector<9x128xf32>
    %126 = vector.extract_strided_slice %125 {offsets = [0, 0], sizes = [1, 128], strides = [1, 1]} : vector<9x128xf32> to vector<1x128xf32>
    %127 = vector.shape_cast %126 : vector<1x128xf32> to vector<128xf32>
    %128 = vector.shape_cast %127 : vector<128xf32> to vector<1x1x1x128xf32>
    %129 = vector.broadcast %128 : vector<1x1x1x128xf32> to vector<2x8x8x128xf32>
    %130 = arith.mulf %129, %118 : vector<2x8x8x128xf32>
    %131 = vector.extract_strided_slice %125 {offsets = [1, 0], sizes = [1, 128], strides = [1, 1]} : vector<9x128xf32> to vector<1x128xf32>
    %132 = vector.shape_cast %131 : vector<1x128xf32> to vector<128xf32>
    %133 = vector.shape_cast %132 : vector<128xf32> to vector<1x1x1x128xf32>
    %134 = vector.broadcast %133 : vector<1x1x1x128xf32> to vector<2x8x8x128xf32>
    %135 = arith.mulf %134, %113 : vector<2x8x8x128xf32>
    %136 = arith.addf %130, %135 : vector<2x8x8x128xf32>
    %137 = vector.extract_strided_slice %125 {offsets = [2, 0], sizes = [1, 128], strides = [1, 1]} : vector<9x128xf32> to vector<1x128xf32>
    %138 = vector.shape_cast %137 : vector<1x128xf32> to vector<128xf32>
    %139 = vector.shape_cast %138 : vector<128xf32> to vector<1x1x1x128xf32>
    %140 = vector.broadcast %139 : vector<1x1x1x128xf32> to vector<2x8x8x128xf32>
    %141 = arith.mulf %140, %123 : vector<2x8x8x128xf32>
    %142 = arith.addf %136, %141 : vector<2x8x8x128xf32>
    %143 = vector.extract_strided_slice %125 {offsets = [3, 0], sizes = [1, 128], strides = [1, 1]} : vector<9x128xf32> to vector<1x128xf32>
    %144 = vector.shape_cast %143 : vector<1x128xf32> to vector<128xf32>
    %145 = vector.shape_cast %144 : vector<128xf32> to vector<1x1x1x128xf32>
    %146 = vector.broadcast %145 : vector<1x1x1x128xf32> to vector<2x8x8x128xf32>
    %147 = arith.mulf %146, %118 : vector<2x8x8x128xf32>
    %148 = vector.extract_strided_slice %125 {offsets = [4, 0], sizes = [1, 128], strides = [1, 1]} : vector<9x128xf32> to vector<1x128xf32>
    %149 = vector.shape_cast %148 : vector<1x128xf32> to vector<128xf32>
    %150 = vector.shape_cast %149 : vector<128xf32> to vector<1x1x1x128xf32>
    %151 = vector.broadcast %150 : vector<1x1x1x128xf32> to vector<2x8x8x128xf32>
    %152 = arith.mulf %151, %113 : vector<2x8x8x128xf32>
    %153 = arith.addf %147, %152 : vector<2x8x8x128xf32>
    %154 = vector.extract_strided_slice %125 {offsets = [5, 0], sizes = [1, 128], strides = [1, 1]} : vector<9x128xf32> to vector<1x128xf32>
    %155 = vector.shape_cast %154 : vector<1x128xf32> to vector<128xf32>
    %156 = vector.shape_cast %155 : vector<128xf32> to vector<1x1x1x128xf32>
    %157 = vector.broadcast %156 : vector<1x1x1x128xf32> to vector<2x8x8x128xf32>
    %158 = arith.mulf %157, %123 : vector<2x8x8x128xf32>
    %159 = arith.addf %153, %158 : vector<2x8x8x128xf32>
    %160 = vector.extract_strided_slice %125 {offsets = [6, 0], sizes = [1, 128], strides = [1, 1]} : vector<9x128xf32> to vector<1x128xf32>
    %161 = vector.shape_cast %160 : vector<1x128xf32> to vector<128xf32>
    %162 = vector.shape_cast %161 : vector<128xf32> to vector<1x1x1x128xf32>
    %163 = vector.broadcast %162 : vector<1x1x1x128xf32> to vector<2x8x8x128xf32>
    %164 = arith.mulf %163, %118 : vector<2x8x8x128xf32>
    %165 = vector.extract_strided_slice %125 {offsets = [7, 0], sizes = [1, 128], strides = [1, 1]} : vector<9x128xf32> to vector<1x128xf32>
    %166 = vector.shape_cast %165 : vector<1x128xf32> to vector<128xf32>
    %167 = vector.shape_cast %166 : vector<128xf32> to vector<1x1x1x128xf32>
    %168 = vector.broadcast %167 : vector<1x1x1x128xf32> to vector<2x8x8x128xf32>
    %169 = arith.mulf %168, %113 : vector<2x8x8x128xf32>
    %170 = arith.addf %164, %169 : vector<2x8x8x128xf32>
    %171 = vector.extract_strided_slice %125 {offsets = [8, 0], sizes = [1, 128], strides = [1, 1]} : vector<9x128xf32> to vector<1x128xf32>
    %172 = vector.shape_cast %171 : vector<1x128xf32> to vector<128xf32>
    %173 = vector.shape_cast %172 : vector<128xf32> to vector<1x1x1x128xf32>
    %174 = vector.broadcast %173 : vector<1x1x1x128xf32> to vector<2x8x8x128xf32>
    %175 = arith.mulf %174, %123 : vector<2x8x8x128xf32>
    %176 = arith.addf %170, %175 : vector<2x8x8x128xf32>
    %177 = vector.extract_strided_slice %159 {offsets = [0, 0, 0, 0], sizes = [2, 1, 8, 128], strides = [1, 1, 1, 1]} : vector<2x8x8x128xf32> to vector<2x1x8x128xf32>
    %178 = vector.extract_strided_slice %176 {offsets = [0, 1, 0, 0], sizes = [2, 1, 8, 128], strides = [1, 1, 1, 1]} : vector<2x8x8x128xf32> to vector<2x1x8x128xf32>
    %179 = arith.addf %177, %178 : vector<2x1x8x128xf32>
    %180 = vector.extract_strided_slice %142 {offsets = [0, 0, 0, 0], sizes = [2, 6, 8, 128], strides = [1, 1, 1, 1]} : vector<2x8x8x128xf32> to vector<2x6x8x128xf32>
    %181 = vector.extract_strided_slice %159 {offsets = [0, 1, 0, 0], sizes = [2, 6, 8, 128], strides = [1, 1, 1, 1]} : vector<2x8x8x128xf32> to vector<2x6x8x128xf32>
    %182 = arith.addf %180, %181 : vector<2x6x8x128xf32>
    %183 = vector.extract_strided_slice %176 {offsets = [0, 2, 0, 0], sizes = [2, 6, 8, 128], strides = [1, 1, 1, 1]} : vector<2x8x8x128xf32> to vector<2x6x8x128xf32>
    %184 = arith.addf %182, %183 : vector<2x6x8x128xf32>
    %185 = vector.extract_strided_slice %142 {offsets = [0, 6, 0, 0], sizes = [2, 1, 8, 128], strides = [1, 1, 1, 1]} : vector<2x8x8x128xf32> to vector<2x1x8x128xf32>
    %186 = vector.extract_strided_slice %159 {offsets = [0, 7, 0, 0], sizes = [2, 1, 8, 128], strides = [1, 1, 1, 1]} : vector<2x8x8x128xf32> to vector<2x1x8x128xf32>
    %187 = arith.addf %185, %186 : vector<2x1x8x128xf32>
    %188 = tpu.concatenate %179, %184, %187 in 1 : vector<2x1x8x128xf32>, vector<2x6x8x128xf32>, vector<2x1x8x128xf32> -> vector<2x8x8x128xf32>
    %c1_25 = arith.constant 1 : index
    %c0_26 = arith.constant 0 : index
    %189 = vector.load %arg7[%c1_25, %c0_26] : memref<4x128xf32, #tpu.memory_space<vmem>>, vector<1x128xf32>
    %190 = vector.shape_cast %189 : vector<1x128xf32> to vector<128xf32>
    %191 = vector.shape_cast %190 : vector<128xf32> to vector<1x1x1x128xf32>
    %192 = vector.broadcast %191 : vector<1x1x1x128xf32> to vector<2x8x8x128xf32>
    %193 = arith.addf %188, %192 : vector<2x8x8x128xf32>
    %cst_27 = arith.constant 0.000000e+00 : f32
    %194 = vector.broadcast %cst_27 : f32 to vector<2x8x8x128xf32>
    %195 = arith.maximumf %193, %194 : vector<2x8x8x128xf32>
    %196 = vector.shape_cast %195 : vector<2x8x8x128xf32> to vector<128x128xf32>
    %c32_i32 = arith.constant 32 : i32
    %197 = vector.broadcast %c32_i32 : i32 to vector<1x128xi32>
    %198 = arith.cmpi slt, %21, %197 : vector<1x128xi32>
    %199 = vector.shape_cast %198 : vector<1x128xi1> to vector<1x128xi1>
    %200 = vector.broadcast %199 : vector<1x128xi1> to vector<128x128xi1>
    %201 = arith.select %200, %108, %196 : vector<128x128xi1>, vector<128x128xf32>
    %c1_28 = arith.constant 1 : index
    %c0_29 = arith.constant 0 : index
    %c0_30 = arith.constant 0 : index
    %202 = vector.load %arg5[%c1_28, %c0_29, %c0_30] : memref<3x128x128xbf16, #tpu.memory_space<vmem>>, vector<1x128x128xbf16>
    %203 = vector.shape_cast %202 : vector<1x128x128xbf16> to vector<128x128xbf16>
    %204 = arith.truncf %201 : vector<128x128xf32> to vector<128x128xbf16>
    %cst_31 = arith.constant dense<0.000000e+00> : vector<128x128xf32>
    %205 = tpu.matmul %204, %203, %cst_31 {dimension_numbers = #tpu.dot_dimension_numbers<[1], [0], [0], [1], [0, 0, 1, 1], [], []>} : vector<128x128xbf16>, vector<128x128xbf16>, vector<128x128xf32> -> vector<128x128xf32>
    %206 = vector.shape_cast %205 : vector<128x128xf32> to vector<2x8x8x128xf32>
    %207 = vector.shape_cast %206 : vector<2x8x8x128xf32> to vector<16x8x128xf32>
    %c1_i32_32 = arith.constant 1 : i32
    %208 = tpu.dynamic_rotate %207 by %c1_i32_32 dim 1 : vector<16x8x128xf32>, i32 -> vector<16x8x128xf32>
    %209 = vector.shape_cast %208 : vector<16x8x128xf32> to vector<2x8x8x128xf32>
    %210 = vector.broadcast %16 : vector<1x1x8x1xf32> to vector<2x8x8x128xf32>
    %211 = arith.mulf %209, %210 : vector<2x8x8x128xf32>
    %212 = vector.shape_cast %206 : vector<2x8x8x128xf32> to vector<16x8x128xf32>
    %c7_i32_33 = arith.constant 7 : i32
    %213 = tpu.dynamic_rotate %212 by %c7_i32_33 dim 1 : vector<16x8x128xf32>, i32 -> vector<16x8x128xf32>
    %214 = vector.shape_cast %213 : vector<16x8x128xf32> to vector<2x8x8x128xf32>
    %215 = vector.broadcast %20 : vector<1x1x8x1xf32> to vector<2x8x8x128xf32>
    %216 = arith.mulf %214, %215 : vector<2x8x8x128xf32>
    %c2 = arith.constant 2 : index
    %c0_34 = arith.constant 0 : index
    %c0_35 = arith.constant 0 : index
    %217 = vector.load %arg6[%c2, %c0_34, %c0_35] : memref<4x9x128xf32, #tpu.memory_space<vmem>>, vector<1x9x128xf32>
    %218 = vector.shape_cast %217 : vector<1x9x128xf32> to vector<9x128xf32>
    %219 = vector.extract_strided_slice %218 {offsets = [0, 0], sizes = [1, 128], strides = [1, 1]} : vector<9x128xf32> to vector<1x128xf32>
    %220 = vector.shape_cast %219 : vector<1x128xf32> to vector<128xf32>
    %221 = vector.shape_cast %220 : vector<128xf32> to vector<1x1x1x128xf32>
    %222 = vector.broadcast %221 : vector<1x1x1x128xf32> to vector<2x8x8x128xf32>
    %223 = arith.mulf %222, %211 : vector<2x8x8x128xf32>
    %224 = vector.extract_strided_slice %218 {offsets = [1, 0], sizes = [1, 128], strides = [1, 1]} : vector<9x128xf32> to vector<1x128xf32>
    %225 = vector.shape_cast %224 : vector<1x128xf32> to vector<128xf32>
    %226 = vector.shape_cast %225 : vector<128xf32> to vector<1x1x1x128xf32>
    %227 = vector.broadcast %226 : vector<1x1x1x128xf32> to vector<2x8x8x128xf32>
    %228 = arith.mulf %227, %206 : vector<2x8x8x128xf32>
    %229 = arith.addf %223, %228 : vector<2x8x8x128xf32>
    %230 = vector.extract_strided_slice %218 {offsets = [2, 0], sizes = [1, 128], strides = [1, 1]} : vector<9x128xf32> to vector<1x128xf32>
    %231 = vector.shape_cast %230 : vector<1x128xf32> to vector<128xf32>
    %232 = vector.shape_cast %231 : vector<128xf32> to vector<1x1x1x128xf32>
    %233 = vector.broadcast %232 : vector<1x1x1x128xf32> to vector<2x8x8x128xf32>
    %234 = arith.mulf %233, %216 : vector<2x8x8x128xf32>
    %235 = arith.addf %229, %234 : vector<2x8x8x128xf32>
    %236 = vector.extract_strided_slice %218 {offsets = [3, 0], sizes = [1, 128], strides = [1, 1]} : vector<9x128xf32> to vector<1x128xf32>
    %237 = vector.shape_cast %236 : vector<1x128xf32> to vector<128xf32>
    %238 = vector.shape_cast %237 : vector<128xf32> to vector<1x1x1x128xf32>
    %239 = vector.broadcast %238 : vector<1x1x1x128xf32> to vector<2x8x8x128xf32>
    %240 = arith.mulf %239, %211 : vector<2x8x8x128xf32>
    %241 = vector.extract_strided_slice %218 {offsets = [4, 0], sizes = [1, 128], strides = [1, 1]} : vector<9x128xf32> to vector<1x128xf32>
    %242 = vector.shape_cast %241 : vector<1x128xf32> to vector<128xf32>
    %243 = vector.shape_cast %242 : vector<128xf32> to vector<1x1x1x128xf32>
    %244 = vector.broadcast %243 : vector<1x1x1x128xf32> to vector<2x8x8x128xf32>
    %245 = arith.mulf %244, %206 : vector<2x8x8x128xf32>
    %246 = arith.addf %240, %245 : vector<2x8x8x128xf32>
    %247 = vector.extract_strided_slice %218 {offsets = [5, 0], sizes = [1, 128], strides = [1, 1]} : vector<9x128xf32> to vector<1x128xf32>
    %248 = vector.shape_cast %247 : vector<1x128xf32> to vector<128xf32>
    %249 = vector.shape_cast %248 : vector<128xf32> to vector<1x1x1x128xf32>
    %250 = vector.broadcast %249 : vector<1x1x1x128xf32> to vector<2x8x8x128xf32>
    %251 = arith.mulf %250, %216 : vector<2x8x8x128xf32>
    %252 = arith.addf %246, %251 : vector<2x8x8x128xf32>
    %253 = vector.extract_strided_slice %218 {offsets = [6, 0], sizes = [1, 128], strides = [1, 1]} : vector<9x128xf32> to vector<1x128xf32>
    %254 = vector.shape_cast %253 : vector<1x128xf32> to vector<128xf32>
    %255 = vector.shape_cast %254 : vector<128xf32> to vector<1x1x1x128xf32>
    %256 = vector.broadcast %255 : vector<1x1x1x128xf32> to vector<2x8x8x128xf32>
    %257 = arith.mulf %256, %211 : vector<2x8x8x128xf32>
    %258 = vector.extract_strided_slice %218 {offsets = [7, 0], sizes = [1, 128], strides = [1, 1]} : vector<9x128xf32> to vector<1x128xf32>
    %259 = vector.shape_cast %258 : vector<1x128xf32> to vector<128xf32>
    %260 = vector.shape_cast %259 : vector<128xf32> to vector<1x1x1x128xf32>
    %261 = vector.broadcast %260 : vector<1x1x1x128xf32> to vector<2x8x8x128xf32>
    %262 = arith.mulf %261, %206 : vector<2x8x8x128xf32>
    %263 = arith.addf %257, %262 : vector<2x8x8x128xf32>
    %264 = vector.extract_strided_slice %218 {offsets = [8, 0], sizes = [1, 128], strides = [1, 1]} : vector<9x128xf32> to vector<1x128xf32>
    %265 = vector.shape_cast %264 : vector<1x128xf32> to vector<128xf32>
    %266 = vector.shape_cast %265 : vector<128xf32> to vector<1x1x1x128xf32>
    %267 = vector.broadcast %266 : vector<1x1x1x128xf32> to vector<2x8x8x128xf32>
    %268 = arith.mulf %267, %216 : vector<2x8x8x128xf32>
    %269 = arith.addf %263, %268 : vector<2x8x8x128xf32>
    %270 = vector.extract_strided_slice %252 {offsets = [0, 0, 0, 0], sizes = [2, 1, 8, 128], strides = [1, 1, 1, 1]} : vector<2x8x8x128xf32> to vector<2x1x8x128xf32>
    %271 = vector.extract_strided_slice %269 {offsets = [0, 1, 0, 0], sizes = [2, 1, 8, 128], strides = [1, 1, 1, 1]} : vector<2x8x8x128xf32> to vector<2x1x8x128xf32>
    %272 = arith.addf %270, %271 : vector<2x1x8x128xf32>
    %273 = vector.extract_strided_slice %235 {offsets = [0, 0, 0, 0], sizes = [2, 6, 8, 128], strides = [1, 1, 1, 1]} : vector<2x8x8x128xf32> to vector<2x6x8x128xf32>
    %274 = vector.extract_strided_slice %252 {offsets = [0, 1, 0, 0], sizes = [2, 6, 8, 128], strides = [1, 1, 1, 1]} : vector<2x8x8x128xf32> to vector<2x6x8x128xf32>
    %275 = arith.addf %273, %274 : vector<2x6x8x128xf32>
    %276 = vector.extract_strided_slice %269 {offsets = [0, 2, 0, 0], sizes = [2, 6, 8, 128], strides = [1, 1, 1, 1]} : vector<2x8x8x128xf32> to vector<2x6x8x128xf32>
    %277 = arith.addf %275, %276 : vector<2x6x8x128xf32>
    %278 = vector.extract_strided_slice %235 {offsets = [0, 6, 0, 0], sizes = [2, 1, 8, 128], strides = [1, 1, 1, 1]} : vector<2x8x8x128xf32> to vector<2x1x8x128xf32>
    %279 = vector.extract_strided_slice %252 {offsets = [0, 7, 0, 0], sizes = [2, 1, 8, 128], strides = [1, 1, 1, 1]} : vector<2x8x8x128xf32> to vector<2x1x8x128xf32>
    %280 = arith.addf %278, %279 : vector<2x1x8x128xf32>
    %281 = tpu.concatenate %272, %277, %280 in 1 : vector<2x1x8x128xf32>, vector<2x6x8x128xf32>, vector<2x1x8x128xf32> -> vector<2x8x8x128xf32>
    %c2_36 = arith.constant 2 : index
    %c0_37 = arith.constant 0 : index
    %282 = vector.load %arg7[%c2_36, %c0_37] : memref<4x128xf32, #tpu.memory_space<vmem>>, vector<1x128xf32>
    %283 = vector.shape_cast %282 : vector<1x128xf32> to vector<128xf32>
    %284 = vector.shape_cast %283 : vector<128xf32> to vector<1x1x1x128xf32>
    %285 = vector.broadcast %284 : vector<1x1x1x128xf32> to vector<2x8x8x128xf32>
    %286 = arith.addf %281, %285 : vector<2x8x8x128xf32>
    %cst_38 = arith.constant 0.000000e+00 : f32
    %287 = vector.broadcast %cst_38 : f32 to vector<2x8x8x128xf32>
    %288 = arith.maximumf %286, %287 : vector<2x8x8x128xf32>
    %289 = vector.shape_cast %288 : vector<2x8x8x128xf32> to vector<128x128xf32>
    %c64_i32 = arith.constant 64 : i32
    %290 = vector.broadcast %c64_i32 : i32 to vector<1x128xi32>
    %291 = arith.cmpi slt, %21, %290 : vector<1x128xi32>
    %292 = vector.shape_cast %291 : vector<1x128xi1> to vector<1x128xi1>
    %293 = vector.broadcast %292 : vector<1x128xi1> to vector<128x128xi1>
    %294 = arith.select %293, %201, %289 : vector<128x128xi1>, vector<128x128xf32>
    %c2_39 = arith.constant 2 : index
    %c0_40 = arith.constant 0 : index
    %c0_41 = arith.constant 0 : index
    %295 = vector.load %arg5[%c2_39, %c0_40, %c0_41] : memref<3x128x128xbf16, #tpu.memory_space<vmem>>, vector<1x128x128xbf16>
    %296 = vector.shape_cast %295 : vector<1x128x128xbf16> to vector<128x128xbf16>
    %297 = arith.truncf %294 : vector<128x128xf32> to vector<128x128xbf16>
    %cst_42 = arith.constant dense<0.000000e+00> : vector<128x128xf32>
    %298 = tpu.matmul %297, %296, %cst_42 {dimension_numbers = #tpu.dot_dimension_numbers<[1], [0], [0], [1], [0, 0, 1, 1], [], []>} : vector<128x128xbf16>, vector<128x128xbf16>, vector<128x128xf32> -> vector<128x128xf32>
    %299 = vector.shape_cast %298 : vector<128x128xf32> to vector<2x8x8x128xf32>
    %300 = vector.shape_cast %299 : vector<2x8x8x128xf32> to vector<16x8x128xf32>
    %c1_i32_43 = arith.constant 1 : i32
    %301 = tpu.dynamic_rotate %300 by %c1_i32_43 dim 1 : vector<16x8x128xf32>, i32 -> vector<16x8x128xf32>
    %302 = vector.shape_cast %301 : vector<16x8x128xf32> to vector<2x8x8x128xf32>
    %303 = vector.broadcast %16 : vector<1x1x8x1xf32> to vector<2x8x8x128xf32>
    %304 = arith.mulf %302, %303 : vector<2x8x8x128xf32>
    %305 = vector.shape_cast %299 : vector<2x8x8x128xf32> to vector<16x8x128xf32>
    %c7_i32_44 = arith.constant 7 : i32
    %306 = tpu.dynamic_rotate %305 by %c7_i32_44 dim 1 : vector<16x8x128xf32>, i32 -> vector<16x8x128xf32>
    %307 = vector.shape_cast %306 : vector<16x8x128xf32> to vector<2x8x8x128xf32>
    %308 = vector.broadcast %20 : vector<1x1x8x1xf32> to vector<2x8x8x128xf32>
    %309 = arith.mulf %307, %308 : vector<2x8x8x128xf32>
    %c3 = arith.constant 3 : index
    %c0_45 = arith.constant 0 : index
    %c0_46 = arith.constant 0 : index
    %310 = vector.load %arg6[%c3, %c0_45, %c0_46] : memref<4x9x128xf32, #tpu.memory_space<vmem>>, vector<1x9x128xf32>
    %311 = vector.shape_cast %310 : vector<1x9x128xf32> to vector<9x128xf32>
    %312 = vector.extract_strided_slice %311 {offsets = [0, 0], sizes = [1, 128], strides = [1, 1]} : vector<9x128xf32> to vector<1x128xf32>
    %313 = vector.shape_cast %312 : vector<1x128xf32> to vector<128xf32>
    %314 = vector.shape_cast %313 : vector<128xf32> to vector<1x1x1x128xf32>
    %315 = vector.broadcast %314 : vector<1x1x1x128xf32> to vector<2x8x8x128xf32>
    %316 = arith.mulf %315, %304 : vector<2x8x8x128xf32>
    %317 = vector.extract_strided_slice %311 {offsets = [1, 0], sizes = [1, 128], strides = [1, 1]} : vector<9x128xf32> to vector<1x128xf32>
    %318 = vector.shape_cast %317 : vector<1x128xf32> to vector<128xf32>
    %319 = vector.shape_cast %318 : vector<128xf32> to vector<1x1x1x128xf32>
    %320 = vector.broadcast %319 : vector<1x1x1x128xf32> to vector<2x8x8x128xf32>
    %321 = arith.mulf %320, %299 : vector<2x8x8x128xf32>
    %322 = arith.addf %316, %321 : vector<2x8x8x128xf32>
    %323 = vector.extract_strided_slice %311 {offsets = [2, 0], sizes = [1, 128], strides = [1, 1]} : vector<9x128xf32> to vector<1x128xf32>
    %324 = vector.shape_cast %323 : vector<1x128xf32> to vector<128xf32>
    %325 = vector.shape_cast %324 : vector<128xf32> to vector<1x1x1x128xf32>
    %326 = vector.broadcast %325 : vector<1x1x1x128xf32> to vector<2x8x8x128xf32>
    %327 = arith.mulf %326, %309 : vector<2x8x8x128xf32>
    %328 = arith.addf %322, %327 : vector<2x8x8x128xf32>
    %329 = vector.extract_strided_slice %311 {offsets = [3, 0], sizes = [1, 128], strides = [1, 1]} : vector<9x128xf32> to vector<1x128xf32>
    %330 = vector.shape_cast %329 : vector<1x128xf32> to vector<128xf32>
    %331 = vector.shape_cast %330 : vector<128xf32> to vector<1x1x1x128xf32>
    %332 = vector.broadcast %331 : vector<1x1x1x128xf32> to vector<2x8x8x128xf32>
    %333 = arith.mulf %332, %304 : vector<2x8x8x128xf32>
    %334 = vector.extract_strided_slice %311 {offsets = [4, 0], sizes = [1, 128], strides = [1, 1]} : vector<9x128xf32> to vector<1x128xf32>
    %335 = vector.shape_cast %334 : vector<1x128xf32> to vector<128xf32>
    %336 = vector.shape_cast %335 : vector<128xf32> to vector<1x1x1x128xf32>
    %337 = vector.broadcast %336 : vector<1x1x1x128xf32> to vector<2x8x8x128xf32>
    %338 = arith.mulf %337, %299 : vector<2x8x8x128xf32>
    %339 = arith.addf %333, %338 : vector<2x8x8x128xf32>
    %340 = vector.extract_strided_slice %311 {offsets = [5, 0], sizes = [1, 128], strides = [1, 1]} : vector<9x128xf32> to vector<1x128xf32>
    %341 = vector.shape_cast %340 : vector<1x128xf32> to vector<128xf32>
    %342 = vector.shape_cast %341 : vector<128xf32> to vector<1x1x1x128xf32>
    %343 = vector.broadcast %342 : vector<1x1x1x128xf32> to vector<2x8x8x128xf32>
    %344 = arith.mulf %343, %309 : vector<2x8x8x128xf32>
    %345 = arith.addf %339, %344 : vector<2x8x8x128xf32>
    %346 = vector.extract_strided_slice %311 {offsets = [6, 0], sizes = [1, 128], strides = [1, 1]} : vector<9x128xf32> to vector<1x128xf32>
    %347 = vector.shape_cast %346 : vector<1x128xf32> to vector<128xf32>
    %348 = vector.shape_cast %347 : vector<128xf32> to vector<1x1x1x128xf32>
    %349 = vector.broadcast %348 : vector<1x1x1x128xf32> to vector<2x8x8x128xf32>
    %350 = arith.mulf %349, %304 : vector<2x8x8x128xf32>
    %351 = vector.extract_strided_slice %311 {offsets = [7, 0], sizes = [1, 128], strides = [1, 1]} : vector<9x128xf32> to vector<1x128xf32>
    %352 = vector.shape_cast %351 : vector<1x128xf32> to vector<128xf32>
    %353 = vector.shape_cast %352 : vector<128xf32> to vector<1x1x1x128xf32>
    %354 = vector.broadcast %353 : vector<1x1x1x128xf32> to vector<2x8x8x128xf32>
    %355 = arith.mulf %354, %299 : vector<2x8x8x128xf32>
    %356 = arith.addf %350, %355 : vector<2x8x8x128xf32>
    %357 = vector.extract_strided_slice %311 {offsets = [8, 0], sizes = [1, 128], strides = [1, 1]} : vector<9x128xf32> to vector<1x128xf32>
    %358 = vector.shape_cast %357 : vector<1x128xf32> to vector<128xf32>
    %359 = vector.shape_cast %358 : vector<128xf32> to vector<1x1x1x128xf32>
    %360 = vector.broadcast %359 : vector<1x1x1x128xf32> to vector<2x8x8x128xf32>
    %361 = arith.mulf %360, %309 : vector<2x8x8x128xf32>
    %362 = arith.addf %356, %361 : vector<2x8x8x128xf32>
    %363 = vector.extract_strided_slice %345 {offsets = [0, 0, 0, 0], sizes = [2, 1, 8, 128], strides = [1, 1, 1, 1]} : vector<2x8x8x128xf32> to vector<2x1x8x128xf32>
    %364 = vector.extract_strided_slice %362 {offsets = [0, 1, 0, 0], sizes = [2, 1, 8, 128], strides = [1, 1, 1, 1]} : vector<2x8x8x128xf32> to vector<2x1x8x128xf32>
    %365 = arith.addf %363, %364 : vector<2x1x8x128xf32>
    %366 = vector.extract_strided_slice %328 {offsets = [0, 0, 0, 0], sizes = [2, 6, 8, 128], strides = [1, 1, 1, 1]} : vector<2x8x8x128xf32> to vector<2x6x8x128xf32>
    %367 = vector.extract_strided_slice %345 {offsets = [0, 1, 0, 0], sizes = [2, 6, 8, 128], strides = [1, 1, 1, 1]} : vector<2x8x8x128xf32> to vector<2x6x8x128xf32>
    %368 = arith.addf %366, %367 : vector<2x6x8x128xf32>
    %369 = vector.extract_strided_slice %362 {offsets = [0, 2, 0, 0], sizes = [2, 6, 8, 128], strides = [1, 1, 1, 1]} : vector<2x8x8x128xf32> to vector<2x6x8x128xf32>
    %370 = arith.addf %368, %369 : vector<2x6x8x128xf32>
    %371 = vector.extract_strided_slice %328 {offsets = [0, 6, 0, 0], sizes = [2, 1, 8, 128], strides = [1, 1, 1, 1]} : vector<2x8x8x128xf32> to vector<2x1x8x128xf32>
    %372 = vector.extract_strided_slice %345 {offsets = [0, 7, 0, 0], sizes = [2, 1, 8, 128], strides = [1, 1, 1, 1]} : vector<2x8x8x128xf32> to vector<2x1x8x128xf32>
    %373 = arith.addf %371, %372 : vector<2x1x8x128xf32>
    %374 = tpu.concatenate %365, %370, %373 in 1 : vector<2x1x8x128xf32>, vector<2x6x8x128xf32>, vector<2x1x8x128xf32> -> vector<2x8x8x128xf32>
    %c3_47 = arith.constant 3 : index
    %c0_48 = arith.constant 0 : index
    %375 = vector.load %arg7[%c3_47, %c0_48] : memref<4x128xf32, #tpu.memory_space<vmem>>, vector<1x128xf32>
    %376 = vector.shape_cast %375 : vector<1x128xf32> to vector<128xf32>
    %377 = vector.shape_cast %376 : vector<128xf32> to vector<1x1x1x128xf32>
    %378 = vector.broadcast %377 : vector<1x1x1x128xf32> to vector<2x8x8x128xf32>
    %379 = arith.addf %374, %378 : vector<2x8x8x128xf32>
    %cst_49 = arith.constant 0.000000e+00 : f32
    %380 = vector.broadcast %cst_49 : f32 to vector<2x8x8x128xf32>
    %381 = arith.maximumf %379, %380 : vector<2x8x8x128xf32>
    %382 = vector.shape_cast %381 : vector<2x8x8x128xf32> to vector<128x128xf32>
    %c96_i32 = arith.constant 96 : i32
    %383 = vector.broadcast %c96_i32 : i32 to vector<1x128xi32>
    %384 = arith.cmpi slt, %21, %383 : vector<1x128xi32>
    %385 = vector.shape_cast %384 : vector<1x128xi1> to vector<1x128xi1>
    %386 = vector.broadcast %385 : vector<1x128xi1> to vector<128x128xi1>
    %387 = arith.select %386, %294, %382 : vector<128x128xi1>, vector<128x128xf32>
    %388 = vector.shape_cast %387 : vector<128x128xf32> to vector<2x64x128xf32>
    %cst_50 = arith.constant dense<0.000000e+00> : vector<2x128xf32>
    %389 = vector.multi_reduction <add>, %388, %cst_50 [1] : vector<2x64x128xf32> to vector<2x128xf32>
    %cst_51 = arith.constant 6.400000e+01 : f32
    %390 = vector.broadcast %cst_51 : f32 to vector<2x128xf32>
    %391 = arith.divf %389, %390 : vector<2x128xf32>
    %c0_52 = arith.constant 0 : index
    %c0_53 = arith.constant 0 : index
    %392 = vector.load %arg8[%c0_52, %c0_53] : memref<128x8xf32, #tpu.memory_space<vmem>>, vector<128x8xf32>
    %cst_54 = arith.constant dense<0.000000e+00> : vector<2x8xf32>
    %393 = tpu.matmul %391, %392, %cst_54 {dimension_numbers = #tpu.dot_dimension_numbers<[1], [0], [0], [1], [0, 0, 1, 1], [], []>} : vector<2x128xf32>, vector<128x8xf32>, vector<2x8xf32> -> vector<2x8xf32>
    %c0_55 = arith.constant 0 : index
    %c0_56 = arith.constant 0 : index
    %394 = vector.load %arg9[%c0_55, %c0_56] : memref<1x8xf32, #tpu.memory_space<vmem>>, vector<1x8xf32>
    %395 = vector.broadcast %394 : vector<1x8xf32> to vector<2x8xf32>
    %396 = arith.addf %393, %395 : vector<2x8xf32>
    %cst_57 = arith.constant 0.000000e+00 : f32
    %397 = vector.broadcast %cst_57 : f32 to vector<2x8xf32>
    %398 = arith.maximumf %396, %397 : vector<2x8xf32>
    %c0_58 = arith.constant 0 : index
    %c0_59 = arith.constant 0 : index
    %399 = vector.load %arg10[%c0_58, %c0_59] : memref<8x128xf32, #tpu.memory_space<vmem>>, vector<8x128xf32>
    %cst_60 = arith.constant dense<0.000000e+00> : vector<2x128xf32>
    %400 = tpu.matmul %398, %399, %cst_60 {dimension_numbers = #tpu.dot_dimension_numbers<[1], [0], [0], [1], [0, 0, 1, 1], [], []>} : vector<2x8xf32>, vector<8x128xf32>, vector<2x128xf32> -> vector<2x128xf32>
    %c0_61 = arith.constant 0 : index
    %c0_62 = arith.constant 0 : index
    %401 = vector.load %arg11[%c0_61, %c0_62] : memref<1x128xf32, #tpu.memory_space<vmem>>, vector<1x128xf32>
    %402 = vector.broadcast %401 : vector<1x128xf32> to vector<2x128xf32>
    %403 = arith.addf %400, %402 : vector<2x128xf32>
    %404 = arith.negf %403 : vector<2x128xf32>
    %405 = math.exp %404 : vector<2x128xf32>
    %cst_63 = arith.constant 1.000000e+00 : f32
    %406 = vector.broadcast %cst_63 : f32 to vector<2x128xf32>
    %407 = arith.addf %406, %405 : vector<2x128xf32>
    %408 = arith.divf %406, %407 : vector<2x128xf32>
    %409 = vector.shape_cast %408 : vector<2x128xf32> to vector<2x1x128xf32>
    %410 = vector.broadcast %409 : vector<2x1x128xf32> to vector<2x64x128xf32>
    %411 = arith.mulf %388, %410 : vector<2x64x128xf32>
    %412 = vector.shape_cast %411 : vector<2x64x128xf32> to vector<128x128xf32>
    %c0_64 = arith.constant 0 : index
    %c0_65 = arith.constant 0 : index
    %413 = vector.load %arg12[%c0_64, %c0_65] : memref<128x128xbf16, #tpu.memory_space<vmem>>, vector<128x128xbf16>
    %414 = arith.truncf %412 : vector<128x128xf32> to vector<128x128xbf16>
    %cst_66 = arith.constant dense<0.000000e+00> : vector<128x128xf32>
    %415 = tpu.matmul %414, %413, %cst_66 {dimension_numbers = #tpu.dot_dimension_numbers<[1], [0], [0], [1], [0, 0, 1, 1], [], []>} : vector<128x128xbf16>, vector<128x128xbf16>, vector<128x128xf32> -> vector<128x128xf32>
    %416 = arith.addf %415, %8 : vector<128x128xf32>
    %cst_67 = arith.constant 0.000000e+00 : f32
    %417 = vector.broadcast %cst_67 : f32 to vector<128x128xf32>
    %418 = arith.maximumf %416, %417 : vector<128x128xf32>
    %419 = vector.shape_cast %418 : vector<128x128xf32> to vector<2x64x128xf32>
    %c0_68 = arith.constant 0 : index
    %c0_69 = arith.constant 0 : index
    %c0_70 = arith.constant 0 : index
    %420 = vector.load %arg13[%c0_68, %c0_69, %c0_70] : memref<2x64x128xf32, #tpu.memory_space<vmem>>, vector<2x64x128xf32>
    tpu.vector_store %arg13[%c0_68, %c0_69, %c0_70], %419 {strides = array<i32>} : memref<2x64x128xf32, #tpu.memory_space<vmem>>, vector<2x64x128xf32>,
    return
  }
  func.func @transform_0(%arg0: i32) -> (i32, i32, i32) {
    %c0_i32 = arith.constant 0 : i32
    %c0_i32_0 = arith.constant 0 : i32
    %c0_i32_1 = arith.constant 0 : i32
    return %arg0, %c0_i32, %c0_i32_0 : i32, i32, i32
  }
  func.func @transform_1(%arg0: i32) -> (i32, i32) {
    %c0_i32 = arith.constant 0 : i32
    %c0_i32_0 = arith.constant 0 : i32
    %c0_i32_1 = arith.constant 0 : i32
    return %c0_i32, %c0_i32_0 : i32, i32
  }
  func.func @transform_2(%arg0: i32) -> (i32, i32) {
    %c0_i32 = arith.constant 0 : i32
    %c0_i32_0 = arith.constant 0 : i32
    %c0_i32_1 = arith.constant 0 : i32
    return %c0_i32, %c0_i32_0 : i32, i32
  }
  func.func @transform_3(%arg0: i32) -> (i32, i32) {
    %c0_i32 = arith.constant 0 : i32
    %c0_i32_0 = arith.constant 0 : i32
    %c0_i32_1 = arith.constant 0 : i32
    return %c0_i32, %c0_i32_0 : i32, i32
  }
  func.func @transform_4(%arg0: i32) -> (i32, i32, i32) {
    %c0_i32 = arith.constant 0 : i32
    %c0_i32_0 = arith.constant 0 : i32
    %c0_i32_1 = arith.constant 0 : i32
    %c0_i32_2 = arith.constant 0 : i32
    return %c0_i32, %c0_i32_0, %c0_i32_1 : i32, i32, i32
  }
  func.func @transform_5(%arg0: i32) -> (i32, i32, i32) {
    %c0_i32 = arith.constant 0 : i32
    %c0_i32_0 = arith.constant 0 : i32
    %c0_i32_1 = arith.constant 0 : i32
    %c0_i32_2 = arith.constant 0 : i32
    return %c0_i32, %c0_i32_0, %c0_i32_1 : i32, i32, i32
  }
  func.func @transform_6(%arg0: i32) -> (i32, i32) {
    %c0_i32 = arith.constant 0 : i32
    %c0_i32_0 = arith.constant 0 : i32
    %c0_i32_1 = arith.constant 0 : i32
    return %c0_i32, %c0_i32_0 : i32, i32
  }
  func.func @transform_7(%arg0: i32) -> (i32, i32) {
    %c0_i32 = arith.constant 0 : i32
    %c0_i32_0 = arith.constant 0 : i32
    %c0_i32_1 = arith.constant 0 : i32
    return %c0_i32, %c0_i32_0 : i32, i32
  }
  func.func @transform_8(%arg0: i32) -> (i32, i32) {
    %c0_i32 = arith.constant 0 : i32
    %c0_i32_0 = arith.constant 0 : i32
    %c0_i32_1 = arith.constant 0 : i32
    return %c0_i32, %c0_i32_0 : i32, i32
  }
  func.func @transform_9(%arg0: i32) -> (i32, i32) {
    %c0_i32 = arith.constant 0 : i32
    %c0_i32_0 = arith.constant 0 : i32
    %c0_i32_1 = arith.constant 0 : i32
    return %c0_i32, %c0_i32_0 : i32, i32
  }
  func.func @transform_10(%arg0: i32) -> (i32, i32) {
    %c0_i32 = arith.constant 0 : i32
    %c0_i32_0 = arith.constant 0 : i32
    %c0_i32_1 = arith.constant 0 : i32
    return %c0_i32, %c0_i32_0 : i32, i32
  }
  func.func @transform_11(%arg0: i32) -> (i32, i32) {
    %c0_i32 = arith.constant 0 : i32
    %c0_i32_0 = arith.constant 0 : i32
    %c0_i32_1 = arith.constant 0 : i32
    return %c0_i32, %c0_i32_0 : i32, i32
  }
  func.func @transform_12(%arg0: i32) -> (i32, i32, i32) {
    %c0_i32 = arith.constant 0 : i32
    %c0_i32_0 = arith.constant 0 : i32
    %c0_i32_1 = arith.constant 0 : i32
    return %arg0, %c0_i32, %c0_i32_0 : i32, i32, i32
  }
}

</mosaic_0001>

<bundles_post_ra>
// kernel: tile.13
= control target key start
LH: loop header
LB: loop body
LE: loop exit
PB: predicated region body
PF: predicated region fallthrough
CT: control target
= control target key end

     0   :  { %s22_s0 = inlined_call_operand.vmem [shape: f32[2], index: 0, kind: input, shape index: {}]   ;;  %s23_s1 = inlined_call_operand.vmem [shape: f32[4,2], index: 1, kind: output, shape index: {}]  }
   0x1   :  { %v4_v0 = vld [vmem:[%s22_s0] ss:$0 sm:$0xff] }
   0x2   :  { %5 = vst [vmem:[%s23_s1] sm:$0xf] %v4_v0 }

// kernel: tile.18
= control target key start
LH: loop header
LB: loop body
LE: loop exit
PB: predicated region body
PF: predicated region fallthrough
CT: control target
= control target key end

     0   :  { %s22_s0 = inlined_call_operand.vmem [shape: f32[32], index: 0, kind: input, shape index: {}]   ;;  %s23_s1 = inlined_call_operand.vmem [shape: f32[4,32], index: 1, kind: output, shape index: {}]  }
   0x1   :  { %v4_v0 = vld [vmem:[%s22_s0] ss:$0 sm:$0xff] }
   0x2   :  { %5 = vst [vmem:[%s23_s1] sm:$0xf] %v4_v0 }

// kernel: tile.14
= control target key start
LH: loop header
LB: loop body
LE: loop exit
PB: predicated region body
PF: predicated region fallthrough
CT: control target
= control target key end

     0   :  { %vm8_vm0 = vcmask 15360   ;;  %s40_s8 = smov 2   ;;  %s41_s9 = smov 4   ;;  %vm14_vm1 = vcmask 64560   ;;  %vm20_vm2 = vcmask 48160   ;;  %vm26_vm3 = vcmask 31760   ;;  %s58_s0 = inlined_call_operand.vmem [shape: f32[4,2], index: 0, kind: input, shape index: {}]   ;;  %s59_s1 = inlined_call_operand.vmem [shape: f32[1,8], index: 1, kind: output, shape index: {}]  }
   0x1   :  { %v5_v0 = vld [vmem:[%s58_s0] sm:$0xf]  ;;  %s39_s0 = smov 6  }
   0x2   :  { %6 = vst [vmem:[#allocation1] sm:$0xf] %v5_v0 }
   0x9   :  { %v11_v1 = vld [vmem:[#allocation1 + $0x3] sm:$0x1]   ;;  %v23_v2 = vld [vmem:[#allocation1 + $0x1] sm:$0x1]   ;;  %v7_v3 = vld [vmem:[#allocation1] sm:$0x1]  }
   0xa   :  { %12 = vrot.lane.b32.xlu0 %v11_v1, %s39_s0  ;;  %24 = vrot.lane.b32.xlu1 %v23_v2, %s40_s8  ;;  %v17_v4 = vld [vmem:[#allocation1 + $0x2] sm:$0x1]   ;;  %9 = vst.msk [vmem:[#allocation0] sm:$0x1] %vm8_vm0, %v7_v3  }
   0xe   :  { %18 = vrot.lane.b32.xlu0 %v17_v4, %s41_s9 }
  0x7c   :  { %v13_v5 = vpop.permute.xlu0 %12   ;;  %v25_v6 = vpop.permute.xlu1 %24  }
  0x7d   :  { %15 = vst.msk [vmem:[#allocation0] sm:$0x1] %vm14_vm1, %v13_v5  }
  0x80   :  { %v19_v7 = vpop.permute.xlu0 %18  }
  0x81   :  { %21 = vst.msk [vmem:[#allocation0] sm:$0x1] %vm20_vm2, %v19_v7  }
  0x82   :  { %27 = vst.msk [vmem:[#allocation0] sm:$0x1] %vm26_vm3, %v25_v6  }
  0x89   :  { %v32_v8 = vld [vmem:[#allocation0] sm:$0x1] }
  0x8a   :  { %35 = vst [vmem:[%s59_s1] sm:$0x1] %v32_v8 }

// kernel: tile.19
= control target key start
LH: loop header
LB: loop body
LE: loop exit
PB: predicated region body
PF: predicated region fallthrough
CT: control target
= control target key end

     0   :  { %vm8_vm0 = vcmask 261120   ;;  %s40_s8 = smov 32   ;;  %s41_s9 = smov 64   ;;  %vm14_vm1 = vcmask 1048320   ;;  %vm20_vm2 = vcmask 785920   ;;  %vm26_vm3 = vcmask 523520   ;;  %s58_s0 = inlined_call_operand.vmem [shape: f32[4,32], index: 0, kind: input, shape index: {}]   ;;  %s59_s1 = inlined_call_operand.vmem [shape: f32[1,128], index: 1, kind: output, shape index: {}]  }
   0x1   :  { %v5_v0 = vld [vmem:[%s58_s0] sm:$0xf]  ;;  %s39_s0 = smov 96  }
   0x2   :  { %6 = vst [vmem:[#allocation1] sm:$0xf] %v5_v0 }
   0x9   :  { %v11_v1 = vld [vmem:[#allocation1 + $0x3] sm:$0x1]   ;;  %v23_v2 = vld [vmem:[#allocation1 + $0x1] sm:$0x1]   ;;  %v7_v3 = vld [vmem:[#allocation1] sm:$0x1]  }
   0xa   :  { %12 = vrot.lane.b32.xlu0 %v11_v1, %s39_s0  ;;  %24 = vrot.lane.b32.xlu1 %v23_v2, %s40_s8  ;;  %v17_v4 = vld [vmem:[#allocation1 + $0x2] sm:$0x1]   ;;  %9 = vst.msk [vmem:[#allocation0] sm:$0x1] %vm8_vm0, %v7_v3  }
   0xe   :  { %18 = vrot.lane.b32.xlu0 %v17_v4, %s41_s9 }
  0x7c   :  { %v13_v5 = vpop.permute.xlu0 %12   ;;  %v25_v6 = vpop.permute.xlu1 %24  }
  0x7d   :  { %15 = vst.msk [vmem:[#allocation0] sm:$0x1] %vm14_vm1, %v13_v5  }
  0x80   :  { %v19_v7 = vpop.permute.xlu0 %18  }
  0x81   :  { %21 = vst.msk [vmem:[#allocation0] sm:$0x1] %vm20_vm2, %v19_v7  }
  0x82   :  { %27 = vst.msk [vmem:[#allocation0] sm:$0x1] %vm26_vm3, %v25_v6  }
  0x89   :  { %v32_v8 = vld [vmem:[#allocation0] sm:$0x1] }
  0x8a   :  { %35 = vst [vmem:[%s59_s1] sm:$0x1] %v32_v8 }

// kernel: osblock_forward.1
= control target key start
LH: loop header
LB: loop body
LE: loop exit
PB: predicated region body
PF: predicated region fallthrough
CT: control target
= control target key end

     0   :  { %s6217_s0 = inlined_call_operand.vmem [shape: f32[4,64,32], index: 0, kind: input, shape index: {}]   ;;  %s6218_s1 = inlined_call_operand.vmem [shape: bf16[32,160], index: 1, kind: input, shape index: {}]   ;;  %s6219_s2 = inlined_call_operand.vmem [shape: f32[1,160], index: 2, kind: input, shape index: {}]   ;;  %s6220_s3 = inlined_call_operand.vmem [shape: bf16[32,128], index: 3, kind: input, shape index: {}]   ;;  %s6221_s4 = inlined_call_operand.vmem [shape: bf16[3,128,128], index: 4, kind: input, shape index: {}]   ;;  %s6222_s5 = inlined_call_operand.vmem [shape: f32[4,9,128], index: 5, kind: input, shape index: {}]   ;;  %s6223_s6 = inlined_call_operand.vmem [shape: f32[4,128], index: 6, kind: input, shape index: {}]   ;;  %s6224_s7 = inlined_call_operand.vmem [shape: f32[128,8], index: 7, kind: input, shape index: {}]   ;;  %s6225_s8 = inlined_call_operand.vmem [shape: f32[1,8], index: 8, kind: input, shape index: {}]   ;;  %s6226_s9 = inlined_call_operand.vmem [shape: f32[8,128], index: 9, kind: input, shape index: {}]   ;;  %s6227_s10 = inlined_call_operand.vmem [shape: f32[1,128], index: 10, kind: input, shape index: {}]   ;;  %s6228_s11 = inlined_call_operand.vmem [shape: bf16[128,128], index: 11, kind: input, shape index: {}]   ;;  %s6229_s12 = inlined_call_operand.hbm [shape: f32[4,64,128], index: 12, kind: output, shape index: {}]  }
   0x1   :  { %6299 = sst [smem:[#allocation42_spill]] %s6217_s0 }
   0x2   :  { %6300 = sst [smem:[#allocation43_spill]] %s6218_s1 }
   0x3   :  { %17 = vsyncpa [#allocation3], 0 }
   0x4   :  { %19 = vsyncpa [#allocation3 + $0x1], 0  ;;  %s4080_s21 = smov 0   ;;  %s4082_s22 = smov 0  }
   0x5   :  { %s4084_s23 = smov 0   ;;  %s4086_s24 = smov 0  }
   0x6 LB: > { %s4101_s25 = sadd.s32 4294967295, %s4006_s24   ;;  %s3448_s26 = sadd.s32 4294967294, %s4006_s24   ;;  %s4006_s24 = sphi %s4086_s24, %s6472_s24   ;;  %s4002_s23 = sphi %s4084_s23, %s6471_s23   ;;  %s3998_s22 = sphi %s4082_s22, %s6470_s22   ;;  %s3994_s21 = sphi %s4080_s21, %s6469_s21  }
   0x7   : > { %s4105_s27 = sadd.s32 1, %s4006_s24   ;;  %s289_s28 = sadd.s32 1, %s4002_s23 }
   0x8   : > { %s286_s29 = ssub.s32 %s4006_s24, %s4105_s27  ;;  %p299_p0 = scmp.ne.s32.totalorder %s4002_s23, %s3998_s22 }
   0x9   : > { %p287_p1 = scmp.eq.s32.totalorder %s286_s29, 0  ;;  %p300_p2 = scmp.eq.s32.totalorder %s4101_s25, 1 }
   0xa   : > { %p305_p3 = scmp.ne.s32.totalorder %s3998_s22, %s3994_s21  ;;  %p306_p4 = scmp.eq.s32.totalorder %s3448_s26, 1 }
   0xb   : > { %s4116_s30 = scalar_select %p287_p1, %s4002_s23, %s289_s28  }
   0xc   : > { %p4118_p5 = por %p300_p2, %p299_p0  ;;  %p4122_p6 = por %p306_p4, %p305_p3 }
   0xd   : > { %p3451_p7 = scmp.ge.s32.totalorder %s4006_s24, 1  ;;  %p367_p8 = scmp.lt.s32.totalorder %s4006_s24, 3 }
   0xf   : > { %p368_p9 = pnand %p3451_p7, %p367_p8 }
  0x11   : > { %371 = sbr.rel (%p368_p9) target bundleno = 1998 (0x7ce), region = 68 }
  0x16   : > { %s6303_s1 = sld [smem:[#allocation43_spill]]  ;;  %s3453_s17 = sshll.u32 %s4101_s25, 1  ;;  %v4008_v2 = vmov 0   ;;  %vm479_vm0 = vcmask 261120   ;;  %v3907_v29 = vld [vmem:[%s6220_s3 + $0x8] sm:$0xff]   ;;  %v3908_v30 = vld [vmem:[%s6220_s3] sm:$0xff]   ;;  %v6232_v31 = vlaneseq }
  0x17   : > { %536 = vmatprep.mubr.bf16.mxu0 %v4008_v2  ;;  %p411_p10 = scmp.lt.s32.totalorder %s3453_s17, 3  ;;  %606 = vmatprep.mubr.bf16.mxu1 %v4008_v2  ;;  %s6304_s0 = sld [smem:[#allocation42_spill]]  ;;  %v447_v34 = vld [vmem:[%s6219_s2] sm:$0x3]  ;;  %vm4010_vm5 = vmmov 0   ;;  %vm2959_vm7 = vcmask 1041409  }
  0x18   : > { %v4177_v32 = vshrl.u32 %v6232_v31, 7  ;;  %vm3041_vm8 = vcmask 64512   ;;  %s407_s16 = sand.u32 1, %s3998_s22   ;;  %s3570_s26 = sshll.u32 %s4101_s25, 11 }
  0x19   : > { %s6474_s17 = smov (!%p411_p10, %s3453_s17), 3  ;;  %s6169_s18 = scalar_lea.hbm %s6229_s12, %s3570_s26 }
  0x1a   : > { %s3568_s15 = sshll.u32 %s6474_s17, 6  ;;  %6305 = vst [vmem:[#allocation5_spill] sm:$0xff] %v4177_v32  ;;  %v4180_v33 = vsub.s32 1, %v4177_v32  ;;  %vm635_vm1 = vcmp.gt.s32.totalorder %v4177_v32, 0  ;;  %vm638_vm2 = vcmp.lt.s32.totalorder %v4177_v32, 7  ;;  %s3452_s17 = sshll.u32 %s407_s16, 7 }
  0x1b   : > { %s6124_s20 = scalar_lea.vmem [#allocation2], %s3452_s17  ;;  %s6177_s25 = scalar_lea.sflag [#allocation3], %s407_s16 }
  0x1c   : > { %v3901_v0 = vld [vmem:[%s6303_s1 + $0x14] ss:$8 sps:$4 sm:$0xff]   ;;  %v3903_v1 = vld [vmem:[%s6303_s1 + $0x10] ss:$8 sps:$4 sm:$0xff]   ;;  %v3904_v3 = vld [vmem:[%s6303_s1 + $0x4] ss:$8 sps:$4 sm:$0xff]   ;;  %v4188_v36 = vrot.slane %v447_v34, %v4180_v33 }
  0x1d   : > { %516 = vmatprep.subr.bf16.mxu0 %v3901_v0  ;;  %v3906_v4 = vld [vmem:[%s6303_s1] ss:$8 sps:$4 sm:$0xff]   ;;  %3852 = vmatprep.subr.bf16.mxu1 %v3901_v0  ;;  %s4144_s19 = scalar_lea.vmem %s6304_s0, %s3568_s15  ;;  %6306 = vst [vmem:[#allocation6_spill] sm:$0xff] %v4180_v33  ;;  %s3386_s28 = sshll.u32 %s6124_s20, 4  ;;  %s6171_s28 = int_to_ptr.vmem [resolvable:$true] %s3386_s28 }
  0x1e   : > { %517 = vmatpush1.bf16.msra.mxu0 %v3903_v1  ;;  %3854 = vmatpush1.bf16.msra.mxu1 %v3903_v1  ;;  %v419_v5 = vld [vmem:[%s4144_s19] sm:$0xff]  ;;  %v420_v6 = vld [vmem:[%s4144_s19 + $0x8] sm:$0xff]  ;;  %v421_v8 = vld [vmem:[%s4144_s19 + $0x10] sm:$0xff]  ;;  %s4012_s17 = smov [#allocation2]  }
  0x1f   : > { %518 = vmatprep.subr.bf16.mxu0 %v3904_v3  ;;  %3853 = vmatprep.subr.bf16.mxu1 %v3904_v3  ;;  %v439_v7 = vpack.c.bf16 %v420_v6, %v419_v5  ;;  %v422_v9 = vld [vmem:[%s4144_s19 + $0x18] sm:$0xff]  ;;  %v433_v10 = vld [vmem:[%s4144_s19 + $0x70] sm:$0xff]  ;;  %v423_v14 = vld [vmem:[%s4144_s19 + $0x20] sm:$0xff]  ;;  %s3950_s29 = sshll.u32 %s4012_s17, 4  ;;  %s3951_s29 = int_to_ptr.vmem [resolvable:$false] %s3950_s29 }
  0x20   : > { %v434_v11 = vld [vmem:[%s4144_s19 + $0x78] sm:$0xff]  ;;  %v440_v13 = vpack.c.bf16 %v422_v9, %v421_v8  ;;  %v424_v15 = vld [vmem:[%s4144_s19 + $0x28] sm:$0xff]  ;;  %v425_v17 = vld [vmem:[%s4144_s19 + $0x30] sm:$0xff]  ;;  %s3952_s26 = scalar_lea.vmem %s3951_s29, 4096  ;;  %p3953_p0 = scmp.lt.s32.totalorder %s6171_s28, %s3951_s29 }
  0x21   : > { %v446_v12 = vpack.c.bf16 %v434_v11, %v433_v10  ;;  %v441_v16 = vpack.c.bf16 %v424_v15, %v423_v14  ;;  %v426_v18 = vld [vmem:[%s4144_s19 + $0x38] sm:$0xff]  ;;  %v427_v20 = vld [vmem:[%s4144_s19 + $0x40] sm:$0xff]  ;;  %v428_v21 = vld [vmem:[%s4144_s19 + $0x48] sm:$0xff] }
  0x22   : > { %519 = vmatpush1.bf16.msra.mxu0 %v3906_v4  ;;  %3855 = vmatpush1.bf16.msra.mxu1 %v3906_v4  ;;  %v442_v19 = vpack.c.bf16 %v426_v18, %v425_v17  ;;  %v443_v22 = vpack.c.bf16 %v428_v21, %v427_v20  ;;  %v429_v23 = vld [vmem:[%s4144_s19 + $0x50] sm:$0xff]  ;;  %v430_v24 = vld [vmem:[%s4144_s19 + $0x58] sm:$0xff]  ;;  %v431_v26 = vld [vmem:[%s4144_s19 + $0x60] sm:$0xff] }
  0x23   : > { %v444_v25 = vpack.c.bf16 %v430_v24, %v429_v23  ;;  %v432_v27 = vld [vmem:[%s4144_s19 + $0x68] sm:$0xff]  ;;  %3664 = vmatprep.subr.bf16.mxu1 %v3907_v29  ;;  %s3946_s19 = scalar_lea.vmem %s6171_s28, 2048 }
  0x24   : > { %v445_v28 = vpack.c.bf16 %v432_v27, %v431_v26  ;;  %p3947_p11 = scmp.ne.s32.totalorder %s6171_s28, %s3946_s19  ;;  %p3954_p1 = scmp.lt.s32.totalorder %s3952_s26, %s3946_s19 }
  0x25   : > { %3460 = vmatmul.mubr.msk.bf16.vlgmr.msra.gmra.mxu0 %vm479_vm0, %v439_v7  ;;  %3467 = vmatmul.mubr.msk.bf16.vlgmr.msra.gmra.mxu1 %vm479_vm0, %v446_v12 }
  0x26   : > { %546 = vmatprep.mubr.bf16.mxu0 %v4008_v2  ;;  %3665 = vmatpush3.bf16.msra.mxu1 %v3907_v29  ;;  %p3948_p12 = pnand %p3947_p11, %p4118_p5  ;;  %p3955_p2 = por %p3954_p1, %p3953_p0 }
  0x27   : > { %3666 = vmatprep.subr.bf16.mxu1 %v3908_v30 }
  0x28   : > { %p3949_p13 = pneg %p3948_p12 }
  0x2a   : > { %3667 = vmatpush3.bf16.msra.mxu1 %v3908_v30  ;;  %p3956_p3 = pnand %p3955_p2, %p3949_p13 }
  0x2d   : > { %3461 = vmatmul.mubr.msk.bf16.gmra.mxu0 %vm479_vm0, %v440_v13 }
  0x2e   : > { %556 = vmatprep.mubr.bf16.mxu0 %v4008_v2 }
  0x35   : > { %3462 = vmatmul.mubr.msk.bf16.gmra.mxu0 %vm479_vm0, %v441_v16 }
  0x36   : > { %566 = vmatprep.mubr.bf16.mxu0 %v4008_v2 }
  0x3d   : > { %3463 = vmatmul.mubr.msk.bf16.gmra.mxu0 %vm479_vm0, %v442_v19 }
  0x3e   : > { %576 = vmatprep.mubr.bf16.mxu0 %v4008_v2 }
  0x45   : > { %3464 = vmatmul.mubr.msk.bf16.gmra.mxu0 %vm479_vm0, %v443_v22 }
  0x46   : > { %586 = vmatprep.mubr.bf16.mxu0 %v4008_v2 }
  0x4d   : > { %3465 = vmatmul.mubr.msk.bf16.gmra.mxu0 %vm479_vm0, %v444_v25 }
  0x4e   : > { %596 = vmatprep.mubr.bf16.mxu0 %v4008_v2 }
  0x55   : > { %3466 = vmatmul.mubr.msk.bf16.gmra.mxu0 %vm479_vm0, %v445_v28 }
  0xe5   : > { %v4185_v35 = vpop.f32.mrf.mxu0  ;;  %v4221_v12 = vpop.f32.mrf.mxu1 }
  0xe6   : > { %6307 = vst [vmem:[#allocation7_spill] sm:$0xff] %v4185_v35  ;;  %6317 = vst [vmem:[#allocation17_spill] sm:$0xff] %v4221_v12 }
  0xe7   : > { %v540_v37 = vpop.f32.mrf.mxu0  ;;  %v610_v18 = vpop.f32.mrf.mxu1 }
  0xe8   : > { %v541_v39 = vadd.f32 %v540_v37, %v4188_v36  ;;  %v611_v37 = vadd.f32 %v610_v18, %v4188_v36 }
  0xe9   : > { %v4190_v38 = vpop.f32.mrf.mxu0  ;;  %v4230_v23 = vpop.f32.mrf.mxu1 }
  0xea   : > { %6308 = vst [vmem:[#allocation8_spill] sm:$0xff] %v4190_v38  ;;  %v617_v43 = vmax.f32 %v541_v39, 0.0  ;;  %6320 = vst [vmem:[#allocation20_spill] sm:$0xff] %v4230_v23 }
  0xeb   : > { %v544_v40 = vpop.f32.mrf.mxu0  ;;  %v614_v29 = vpop.f32.mrf.mxu1 }
  0xec   : > { %v545_v41 = vadd.f32 %v544_v40, %v4188_v36  ;;  %v615_v39 = vadd.f32 %v614_v29, %v4188_v36 }
  0xed   : > { %v4194_v42 = vpop.f32.mrf.mxu0 }
  0xee   : > { %6309 = vst [vmem:[#allocation9_spill] sm:$0xff] %v4194_v42  ;;  %v618_v44 = vmax.f32 %v545_v41, 0.0 }
  0xef   : > { %v550_v45 = vpop.f32.mrf.mxu0 }
  0xf0   : > { %v647_v46 = vpack.c.bf16 %v618_v44, %v617_v43  ;;  %v551_v48 = vadd.f32 %v550_v45, %v4188_v36  ;;  %v631_v45 = vmax.f32 %v611_v37, 0.0 }
  0xf1   : > { %v4196_v47 = vpop.f32.mrf.mxu0 }
  0xf2   : > { %6310 = vst [vmem:[#allocation10_spill] sm:$0xff] %v4196_v47  ;;  %3668 = vmatprep.mubr.msk.bf16.mxu1 %vm479_vm0, %v647_v46  ;;  %v619_v52 = vmax.f32 %v551_v48, 0.0  ;;  %v632_v46 = vmax.f32 %v615_v39, 0.0 }
  0xf3   : > { %v554_v49 = vpop.f32.mrf.mxu0 }
  0xf4   : > { %v555_v50 = vadd.f32 %v554_v49, %v4188_v36 }
  0xf5   : > { %v4201_v51 = vpop.f32.mrf.mxu0 }
  0xf6   : > { %6311 = vst [vmem:[#allocation11_spill] sm:$0xff] %v4201_v51  ;;  %v620_v53 = vmax.f32 %v555_v50, 0.0 }
  0xf7   : > { %v560_v54 = vpop.f32.mrf.mxu0 }
  0xf8   : > { %v648_v55 = vpack.c.bf16 %v620_v53, %v619_v52  ;;  %v561_v57 = vadd.f32 %v560_v54, %v4188_v36  ;;  %v654_v52 = vpack.c.bf16 %v632_v46, %v631_v45  ;;  %v3909_v53 = vld [vmem:[%s6221_s4 + $0x38] sm:$0xff]   ;;  %v3911_v54 = vld [vmem:[%s6221_s4 + $0x28] sm:$0xff]  }
  0xf9   : > { %v4203_v56 = vpop.f32.mrf.mxu0  ;;  %3684 = vmatprep.subr.bf16.mxu1 %v3909_v53 }
  0xfa   : > { %6312 = vst [vmem:[#allocation12_spill] sm:$0xff] %v4203_v56  ;;  %3669 = vmatmul.mubr.msk.bf16.vlgmr.msra.gmra.mxu1 %vm479_vm0, %v648_v55  ;;  %v621_v61 = vmax.f32 %v561_v57, 0.0  ;;  %v3912_v55 = vld [vmem:[%s6221_s4 + $0x20] sm:$0xff]   ;;  %v3913_v57 = vld [vmem:[%s6221_s4 + $0x18] sm:$0xff]  }
  0xfb   : > { %v564_v58 = vpop.f32.mrf.mxu0  ;;  %3685 = vmatpush3.bf16.msra.mxu1 %v3909_v53 }
  0xfc   : > { %v565_v59 = vadd.f32 %v564_v58, %v4188_v36  ;;  %v3914_v58 = vld [vmem:[%s6221_s4 + $0x10] sm:$0xff]  }
  0xfd   : > { %v4208_v60 = vpop.f32.mrf.mxu0 }
  0xfe   : > { %6313 = vst [vmem:[#allocation13_spill] sm:$0xff] %v4208_v60  ;;  %v622_v62 = vmax.f32 %v565_v59, 0.0  ;;  %v3915_v59 = vld [vmem:[%s6221_s4 + $0x8] sm:$0xff]  }
  0xff   : > { %v570_v63 = vpop.f32.mrf.mxu0 }
 0x100   : > { %v649_v0 = vpack.c.bf16 %v622_v62, %v621_v61  ;;  %v571_v2 = vadd.f32 %v570_v63, %v4188_v36  ;;  %v3916_v61 = vld [vmem:[%s6221_s4] sm:$0xff]   ;;  %v3917_v62 = vld [vmem:[%s6221_s4 + $0x78] sm:$0xff]   ;;  %v3918_v63 = vld [vmem:[%s6221_s4 + $0x70] sm:$0xff]  }
 0x101   : > { %v4210_v1 = vpop.f32.mrf.mxu0  ;;  %3716 = vmatprep.subr.bf16.mxu0 %v3917_v62 }
 0x102   : > { %6314 = vst [vmem:[#allocation14_spill] sm:$0xff] %v4210_v1  ;;  %3672 = vmatprep.mubr.msk.bf16.mxu1 %vm479_vm0, %v649_v0  ;;  %v623_v6 = vmax.f32 %v571_v2, 0.0  ;;  %3717 = vmatpush3.bf16.msra.mxu0 %v3917_v62  ;;  %v3919_v0 = vld [vmem:[%s6221_s4 + $0x68] sm:$0xff]   ;;  %v4279_v2 = vsub.s32 4, %v4177_v32 }
 0x103   : > { %v574_v3 = vpop.f32.mrf.mxu0  ;;  %3718 = vmatprep.subr.bf16.mxu0 %v3918_v63 }
 0x104   : > { %v575_v4 = vadd.f32 %v574_v3, %v4188_v36  ;;  %6323 = vst [vmem:[#allocation23_spill] sm:$0xff] %v4279_v2  ;;  %v852_v3 = vld [vmem:[%s6222_s5] sm:$0xff] }
 0x105   : > { %v4215_v5 = vpop.f32.mrf.mxu0  ;;  %v4310_v18 = vrot.slane %v852_v3, %v4279_v2 }
 0x106   : > { %6315 = vst [vmem:[#allocation15_spill] sm:$0xff] %v4215_v5  ;;  %v624_v7 = vmax.f32 %v575_v4, 0.0  ;;  %3719 = vmatpush3.bf16.msra.mxu0 %v3918_v63  ;;  %v4286_v4 = vsub.s32 3, %v4177_v32 }
 0x107   : > { %v580_v8 = vpop.f32.mrf.mxu0  ;;  %3720 = vmatprep.subr.bf16.mxu0 %v3919_v0 }
 0x108   : > { %v650_v9 = vpack.c.bf16 %v624_v7, %v623_v6  ;;  %v581_v11 = vadd.f32 %v580_v8, %v4188_v36  ;;  %6324 = vst [vmem:[#allocation24_spill] sm:$0xff] %v4286_v4  ;;  %v4289_v6 = vsub.s32 2, %v4177_v32  ;;  %v4292_v7 = vsub.s32 7, %v4177_v32 }
 0x109   : > { %v4217_v10 = vpop.f32.mrf.mxu0  ;;  %v4295_v8 = vsub.s32 0, %v4177_v32 }
 0x10a   : > { %6316 = vst [vmem:[#allocation16_spill] sm:$0xff] %v4217_v10  ;;  %3673 = vmatmul.mubr.msk.bf16.gmra.mxu1 %vm479_vm0, %v650_v9  ;;  %v625_v16 = vmax.f32 %v581_v11, 0.0  ;;  %3721 = vmatpush3.bf16.msra.mxu0 %v3919_v0  ;;  %6325 = vst [vmem:[#allocation25_spill] sm:$0xff] %v4289_v6  ;;  %v6230_v9 = vmov 0.0  }
 0x10b   : > { %v584_v13 = vpop.f32.mrf.mxu0  ;;  %6326 = vst [vmem:[#allocation26_spill] sm:$0xff] %v4292_v7  ;;  %6327 = vst [vmem:[#allocation27_spill] sm:$0xff] %v4295_v8  ;;  %v4298_v11 = vsel %vm635_vm1, 1.0, %v6230_v9 }
 0x10c   : > { %v585_v14 = vadd.f32 %v584_v13, %v4188_v36  ;;  %v4301_v13 = vsub.s32 6, %v4177_v32 }
 0x10d   : > { %v4224_v15 = vpop.f32.mrf.mxu0 }
 0x10e   : > { %6318 = vst [vmem:[#allocation18_spill] sm:$0xff] %v4224_v15  ;;  %v626_v17 = vmax.f32 %v585_v14, 0.0  ;;  %6328 = vst [vmem:[#allocation28_spill] sm:$0xff] %v4301_v13  ;;  %v4304_v14 = vsel %vm638_vm2, 1.0, %v6230_v9  ;;  %v4332_v37 = vrot.slane %v852_v3, %v4301_v13 }
 0x10f   : > { %v590_v19 = vpop.f32.mrf.mxu0 }
 0x110   : > { %v651_v20 = vpack.c.bf16 %v626_v17, %v625_v16  ;;  %v591_v22 = vadd.f32 %v590_v19, %v4188_v36  ;;  %v4307_v17 = vrot.slane %v852_v3, %v4180_v33  ;;  %v4313_v19 = vsub.s32 5, %v4177_v32 }
 0x111   : > { %v4226_v21 = vpop.f32.mrf.mxu0 }
 0x112   : > { %6319 = vst [vmem:[#allocation19_spill] sm:$0xff] %v4226_v21  ;;  %3676 = vmatprep.mubr.msk.bf16.mxu1 %vm479_vm0, %v651_v20  ;;  %v627_v27 = vmax.f32 %v591_v22, 0.0  ;;  %6329 = vst [vmem:[#allocation29_spill] sm:$0xff] %v4313_v19 }
 0x113   : > { %v594_v24 = vpop.f32.mrf.mxu0 }
 0x114   : > { %v595_v25 = vadd.f32 %v594_v24, %v4188_v36  ;;  %v4316_v24 = vrot.slane %v852_v3, %v4295_v8 }
 0x115   : > { %v4233_v26 = vpop.f32.mrf.mxu0 }
 0x116   : > { %6321 = vst [vmem:[#allocation21_spill] sm:$0xff] %v4233_v26  ;;  %v628_v28 = vmax.f32 %v595_v25, 0.0  ;;  %v4319_v25 = vrot.slane %v852_v3, %v4286_v4 }
 0x117   : > { %v600_v30 = vpop.f32.mrf.mxu0 }
 0x118   : > { %v652_v34 = vpack.c.bf16 %v628_v28, %v627_v27  ;;  %v601_v41 = vadd.f32 %v600_v30, %v4188_v36  ;;  %v4322_v27 = vrot.slane %v852_v3, %v4289_v6  ;;  %v4325_v28 = vrot.slane %v852_v3, %v4292_v7 }
 0x119   : > { %v4237_v40 = vpop.f32.mrf.mxu0 }
 0x11a   : > { %6322 = vst [vmem:[#allocation22_spill] sm:$0xff] %v4237_v40  ;;  %3677 = vmatmul.mubr.msk.bf16.gmra.mxu1 %vm479_vm0, %v652_v34  ;;  %v629_v48 = vmax.f32 %v601_v41, 0.0  ;;  %v4335_v41 = vrot.slane %v852_v3, %v4313_v19 }
 0x11b   : > { %v604_v43 = vpop.f32.mrf.mxu0 }
 0x11c   : > { %v605_v44 = vadd.f32 %v604_v43, %v4188_v36  ;;  %v3910_v36 = vld [vmem:[%s6221_s4 + $0x30] sm:$0xff]  }
 0x11d   : > { %3686 = vmatprep.subr.bf16.mxu1 %v3910_v36 }
 0x11e   : > { %v630_v49 = vmax.f32 %v605_v44, 0.0  ;;  %3687 = vmatpush3.bf16.msra.mxu1 %v3910_v36 }
 0x11f   : > { %3688 = vmatprep.subr.bf16.mxu1 %v3911_v54 }
 0x120   : > { %v653_v50 = vpack.c.bf16 %v630_v49, %v629_v48 }
 0x122   : > { %3680 = vmatprep.mubr.msk.bf16.mxu1 %vm479_vm0, %v653_v50  ;;  %3689 = vmatpush3.bf16.msra.mxu1 %v3911_v54 }
 0x123   : > { %3681 = vmatmul.mubr.msk.bf16.gmra.mxu1 %vm479_vm0, %v654_v52  ;;  %3690 = vmatprep.subr.bf16.mxu1 %v3912_v55 }
 0x126   : > { %3691 = vmatpush3.bf16.msra.mxu1 %v3912_v55 }
 0x127   : > { %3692 = vmatprep.subr.bf16.mxu1 %v3913_v57 }
 0x12a   : > { %3693 = vmatpush3.bf16.msra.mxu1 %v3913_v57 }
 0x12b   : > { %3694 = vmatprep.subr.bf16.mxu1 %v3914_v58 }
 0x12e   : > { %3695 = vmatpush3.bf16.msra.mxu1 %v3914_v58 }
 0x12f   : > { %3696 = vmatprep.subr.bf16.mxu1 %v3915_v59 }
 0x132   : > { %3697 = vmatpush3.bf16.msra.mxu1 %v3915_v59 }
 0x133   : > { %3698 = vmatprep.subr.bf16.mxu1 %v3916_v61 }
 0x136   : > { %3699 = vmatpush3.bf16.msra.mxu1 %v3916_v61 }
 0x1ba   : > { %v3670_v16 = vpop.f32.mrf.mxu1 }
 0x1bb   : > { %v790_v20 = vrot.slane %v3670_v16, 7  ;;  %v822_v22 = vrot.slane %v3670_v16, 1  ;;  %v878_v46 = vmul.f32 %v3670_v16, %v4307_v17  ;;  %v962_v49 = vmul.f32 %v3670_v16, %v4310_v18 }
 0x1bc   : > { %v725_v29 = vpop.f32.mrf.mxu1  ;;  %v1051_v50 = vmul.f32 %v3670_v16, %v4325_v28 }
 0x1bd   : > { %v806_v30 = vmul.f32 %v4298_v11, %v790_v20  ;;  %v4329_v34 = vmul.f32 %v4304_v14, %v822_v22  ;;  %v788_v39 = vrot.slane %v725_v29, 7  ;;  %v820_v43 = vrot.slane %v725_v29, 1 }
 0x1be   : > { %v3671_v44 = vpop.f32.mrf.mxu1  ;;  %v876_v53 = vmul.f32 %v4307_v17, %v725_v29  ;;  %v960_v57 = vmul.f32 %v4310_v18, %v725_v29 }
 0x1bf   : > { %v860_v45 = vmul.f32 %v4316_v24, %v806_v30  ;;  %v942_v48 = vmul.f32 %v4319_v25, %v806_v30  ;;  %v804_v52 = vmul.f32 %v4298_v11, %v788_v39  ;;  %v791_v36 = vrot.slane %v3671_v44, 7 }
 0x1c0   : > { %v910_v54 = vmul.f32 %v4322_v27, %v4329_v34  ;;  %v1033_v55 = vmul.f32 %v4332_v37, %v806_v30  ;;  %v823_v58 = vrot.slane %v3671_v44, 1  ;;  %v836_v61 = vmul.f32 %v4304_v14, %v820_v43 }
 0x1c1   : > { %v892_v59 = vadd.f32 %v878_v46, %v860_v45  ;;  %v858_v62 = vmul.f32 %v4316_v24, %v804_v52  ;;  %v940_v63 = vmul.f32 %v4319_v25, %v804_v52  ;;  %v978_v0 = vadd.f32 %v962_v49, %v942_v48  ;;  %v728_v45 = vpop.f32.mrf.mxu1 }
 0x1c2   : > { %v998_v3 = vmul.f32 %v4335_v41, %v4329_v34  ;;  %v807_v16 = vmul.f32 %v4298_v11, %v791_v36  ;;  %v879_v20 = vmul.f32 %v3671_v44, %v4307_v17  ;;  %v839_v29 = vmul.f32 %v4304_v14, %v823_v58 }
 0x1c3   : > { %v890_v22 = vadd.f32 %v876_v53, %v858_v62  ;;  %v976_v30 = vadd.f32 %v960_v57, %v940_v63  ;;  %v963_v39 = vmul.f32 %v3671_v44, %v4310_v18  ;;  %v1052_v49 = vmul.f32 %v3671_v44, %v4325_v28  ;;  %v4373_v44 = vld [vmem:[%s6222_s5 + $0x8] ss:$0 sm:$0xff] }
 0x1c4   : > { %v861_v43 = vmul.f32 %v4316_v24, %v807_v16  ;;  %v943_v46 = vmul.f32 %v4319_v25, %v807_v16  ;;  %v1034_v48 = vmul.f32 %v4332_v37, %v807_v16  ;;  %v924_v52 = vadd.f32 %v910_v54, %v892_v59 }
 0x1c5   : > { %v4361_v9 = vadd.f32 %v1051_v50, %v1033_v55  ;;  %v908_v36 = vmul.f32 %v4322_v27, %v836_v61  ;;  %v996_v53 = vmul.f32 %v4335_v41, %v836_v61  ;;  %v999_v58 = vmul.f32 %v4335_v41, %v839_v29 }
 0x1c6   : > { %v979_v57 = vadd.f32 %v963_v39, %v943_v46  ;;  %v1066_v62 = vadd.f32 %v1052_v49, %v1034_v48  ;;  %v789_v63 = vrot.slane %v728_v45, 7  ;;  %v1014_v31 = vadd.f32 %v998_v3, %v978_v0 }
 0x1c7   : > { %v4366_v40 = vadd.f32 %v908_v36, %v890_v22  ;;  %v4368_v23 = vadd.f32 %v996_v53, %v976_v30  ;;  %v821_v50 = vrot.slane %v728_v45, 1  ;;  %v4375_v54 = vadd.f32 %v879_v20, %v861_v43 }
 0x1c8   : > { %v1015_v55 = vadd.f32 %v999_v58, %v979_v57  ;;  %v1084_v59 = vmul.f32 %v4373_v44, %v839_v29  ;;  %v805_v61 = vmul.f32 %v4298_v11, %v789_v63  ;;  %v877_v0 = vmul.f32 %v4307_v17, %v728_v45 }
 0x1c9   : > { %v4380_v16 = vmul.f32 %v4304_v14, %v821_v50  ;;  %v961_v3 = vmul.f32 %v4310_v18, %v728_v45  ;;  %v1050_v22 = vmul.f32 %v4325_v28, %v728_v45  ;;  %v4392_v53 = vmul.f32 %v4373_v44, %v4329_v34 }
 0x1ca   : > { %v3674_v30 = vpop.f32.mrf.mxu1  ;;  %v4385_v39 = vadd.f32 %v1084_v59, %v1066_v62  ;;  %v859_v20 = vmul.f32 %v4316_v24, %v805_v61  ;;  %v941_v43 = vmul.f32 %v4319_v25, %v805_v61  ;;  %v1032_v46 = vmul.f32 %v4332_v37, %v805_v61 }
 0x1cb   : > { %v794_v48 = vrot.slane %v3674_v30, 7  ;;  %v826_v49 = vrot.slane %v3674_v30, 1  ;;  %v4395_v57 = vmul.f32 %v4322_v27, %v839_v29  ;;  %v1114_v45 = vadd.f32 %v1015_v55, %v924_v52 }
 0x1cc   : > { %v741_v36 = vpop.f32.mrf.mxu1  ;;  %v891_v58 = vadd.f32 %v877_v0, %v859_v20  ;;  %v909_v62 = vmul.f32 %v4322_v27, %v4380_v16  ;;  %v882_v63 = vmul.f32 %v3674_v30, %v4307_v17  ;;  %v977_v50 = vadd.f32 %v961_v3, %v941_v43 }
 0x1cd   : > { %v1064_v59 = vadd.f32 %v1050_v22, %v1032_v46  ;;  %v810_v61 = vmul.f32 %v4298_v11, %v794_v48  ;;  %v792_v26 = vrot.slane %v741_v36, 7  ;;  %v4402_v34 = vmul.f32 %v4304_v14, %v826_v49 }
 0x1ce   : > { %v3675_v12 = vpop.f32.mrf.mxu1  ;;  %v923_v10 = vadd.f32 %v909_v62, %v891_v58  ;;  %v966_v29 = vmul.f32 %v3674_v30, %v4310_v18  ;;  %v824_v21 = vrot.slane %v741_v36, 1  ;;  %v1055_v22 = vmul.f32 %v3674_v30, %v4325_v28 }
 0x1cf   : > { %v864_v52 = vmul.f32 %v4316_v24, %v810_v61  ;;  %v946_v55 = vmul.f32 %v4319_v25, %v810_v61  ;;  %v1037_v0 = vmul.f32 %v4332_v37, %v810_v61  ;;  %v808_v3 = vmul.f32 %v4298_v11, %v792_v26 }
 0x1d0   : > { %v4411_v20 = vmul.f32 %v4304_v14, %v824_v21  ;;  %v880_v43 = vmul.f32 %v4307_v17, %v741_v36  ;;  %v795_v46 = vrot.slane %v3675_v12, 7  ;;  %v4414_v48 = vadd.f32 %v1014_v31, %v923_v10  ;;  %v744_v5 = vpop.f32.mrf.mxu1 }
 0x1d1   : > { %v4416_v49 = vadd.f32 %v882_v63, %v864_v52  ;;  %v964_v58 = vmul.f32 %v4310_v18, %v741_v36  ;;  %v1053_v62 = vmul.f32 %v4325_v28, %v741_v36  ;;  %v862_v61 = vmul.f32 %v4316_v24, %v808_v3 }
 0x1d2   : > { %v944_v26 = vmul.f32 %v4319_v25, %v808_v3  ;;  %v1035_v30 = vmul.f32 %v4332_v37, %v808_v3  ;;  %v811_v21 = vmul.f32 %v4298_v11, %v795_v46  ;;  %v4424_v15 = vadd.f32 %v966_v29, %v946_v55 }
 0x1d3   : > { %v4426_v56 = vadd.f32 %v1055_v22, %v1037_v0  ;;  %v1085_v31 = vmul.f32 %v4373_v44, %v4411_v20  ;;  %v827_v10 = vrot.slane %v3675_v12, 1  ;;  %v967_v52 = vmul.f32 %v3675_v12, %v4310_v18 }
 0x1d4   : > { %v1067_v63 = vadd.f32 %v1053_v62, %v1035_v30  ;;  %v947_v36 = vmul.f32 %v4319_v25, %v811_v21  ;;  %v1038_v1 = vmul.f32 %v4332_v37, %v811_v21  ;;  %v1056_v46 = vmul.f32 %v3675_v12, %v4325_v28 }
 0x1d5   : > { %v843_v3 = vmul.f32 %v4304_v14, %v827_v10  ;;  %v793_v51 = vrot.slane %v744_v5, 7  ;;  %v825_v29 = vrot.slane %v744_v5, 1  ;;  %v4435_v55 = vadd.f32 %v880_v43, %v862_v61 }
 0x1d6   : > { %v4437_v0 = vadd.f32 %v964_v58, %v944_v26  ;;  %v1099_v22 = vadd.f32 %v1085_v31, %v1067_v63  ;;  %v881_v60 = vmul.f32 %v4307_v17, %v744_v5  ;;  %v983_v62 = vadd.f32 %v967_v52, %v947_v36 }
 0x1d7   : > { %v1070_v30 = vadd.f32 %v1056_v46, %v1038_v1  ;;  %v809_v38 = vmul.f32 %v4298_v11, %v793_v51  ;;  %v965_v47 = vmul.f32 %v4310_v18, %v744_v5  ;;  %v1003_v21 = vmul.f32 %v4335_v41, %v843_v3 }
 0x1d8   : > { %v1088_v10 = vmul.f32 %v4373_v44, %v843_v3  ;;  %v997_v12 = vmul.f32 %v4335_v41, %v4380_v16  ;;  %v1082_v43 = vmul.f32 %v4373_v44, %v4380_v16  ;;  %v1126_v58 = vadd.f32 %v1114_v45, %v1099_v22  ;;  %v4462_v16 = vld [vmem:[%s6223_s6] ss:$0 sm:$0xff] }
 0x1d9   : > { %v4449_v61 = vmul.f32 %v4304_v14, %v825_v29  ;;  %v863_v1 = vmul.f32 %v4316_v24, %v809_v38  ;;  %v945_v51 = vmul.f32 %v4319_v25, %v809_v38  ;;  %v1036_v31 = vmul.f32 %v4332_v37, %v809_v38 }
 0x1da   : > { %v3678_v26 = vpop.f32.mrf.mxu1  ;;  %v1054_v63 = vmul.f32 %v4325_v28, %v744_v5  ;;  %v1013_v36 = vadd.f32 %v997_v12, %v977_v50  ;;  %v1096_v52 = vadd.f32 %v1082_v43, %v1064_v59  ;;  %v4455_v3 = vadd.f32 %v1003_v21, %v983_v62 }
 0x1db   : > { %v4457_v46 = vadd.f32 %v1088_v10, %v1070_v30  ;;  %v798_v45 = vrot.slane %v3678_v26, 7  ;;  %v830_v29 = vrot.slane %v3678_v26, 1  ;;  %v4464_v35 = vadd.f32 %v881_v60, %v863_v1 }
 0x1dc   : > { %v757_v22 = vpop.f32.mrf.mxu1  ;;  %v1097_v38 = vadd.f32 %v4392_v53, %v4361_v9  ;;  %v1110_v5 = vadd.f32 %v1096_v52, %v4368_v23  ;;  %v1112_v50 = vadd.f32 %v1013_v36, %v4366_v40  ;;  %v4470_v59 = vadd.f32 %v965_v47, %v945_v51 }
 0x1dd   : > { %v4472_v62 = vadd.f32 %v1054_v63, %v1036_v31  ;;  %v814_v30 = vmul.f32 %v4298_v11, %v798_v45  ;;  %v885_v21 = vmul.f32 %v3678_v26, %v4307_v17  ;;  %v796_v60 = vrot.slane %v757_v22, 7 }
 0x1de   : > { %v1124_v10 = vadd.f32 %v1112_v50, %v1097_v38  ;;  %v4477_v12 = vadd.f32 %v4462_v16, %v1110_v5  ;;  %v828_v43 = vrot.slane %v757_v22, 1  ;;  %v4480_v9 = vmul.f32 %v4304_v14, %v830_v29  ;;  %v3679_v53 = vpop.f32.mrf.mxu1 }
 0x1df   : > { %v867_v23 = vmul.f32 %v4316_v24, %v814_v30  ;;  %v950_v47 = vmul.f32 %v4319_v25, %v814_v30  ;;  %v1040_v40 = vmul.f32 %v4332_v37, %v814_v30  ;;  %v970_v51 = vmul.f32 %v3678_v26, %v4310_v18 }
 0x1e0   : > { %6330 = vst [vmem:[#allocation30_spill] sm:$0xff] %v4477_v12  ;;  %v4486_v1 = vadd.f32 %v4462_v16, %v1124_v10  ;;  %v812_v31 = vmul.f32 %v4298_v11, %v796_v60  ;;  %v844_v63 = vmul.f32 %v4304_v14, %v828_v43  ;;  %v1058_v45 = vmul.f32 %v3678_v26, %v4325_v28 }
 0x1e1   : > { %v4492_v52 = vadd.f32 %v885_v21, %v867_v23  ;;  %v883_v29 = vmul.f32 %v4307_v17, %v757_v22  ;;  %v4497_v5 = vadd.f32 %v970_v51, %v950_v47  ;;  %v968_v60 = vmul.f32 %v4310_v18, %v757_v22  ;;  %v760_v21 = vpop.f32.mrf.mxu1 }
 0x1e2   : > { %6331 = vst [vmem:[#allocation31_spill] sm:$0xff] %v4486_v1  ;;  %v6235_v38 = vmax.f32 %v4486_v1, 0.0  ;;  %v865_v50 = vmul.f32 %v4316_v24, %v812_v31  ;;  %v948_v30 = vmul.f32 %v4319_v25, %v812_v31  ;;  %v4501_v10 = vadd.f32 %v1058_v45, %v1040_v40 }
 0x1e3   : > { %v799_v43 = vrot.slane %v3679_v53, 7  ;;  %v831_v36 = vrot.slane %v3679_v53, 1  ;;  %v6332_v23 = vmax.f32 %v4477_v12, 0.0  ;;  %v915_v42 = vmul.f32 %v4322_v27, %v844_v63 }
 0x1e4   : > { %v1004_v47 = vmul.f32 %v4335_v41, %v844_v63  ;;  %v886_v51 = vmul.f32 %v3679_v53, %v4307_v17  ;;  %v897_v32 = vadd.f32 %v883_v29, %v865_v50  ;;  %v984_v31 = vadd.f32 %v968_v60, %v948_v30 }
 0x1e5   : > { %v1191_v26 = vpack.c.bf16 %v6235_v38, %v6332_v23  ;;  %v815_v40 = vmul.f32 %v4298_v11, %v799_v43  ;;  %v1125_v22 = vadd.f32 %v4414_v48, %v4385_v39  ;;  %v4515_v45 = vmul.f32 %v4304_v14, %v831_v36  ;;  %v3682_v39 = vpop.f32.mrf.mxu1 }
 0x1e6   : > { %v971_v1 = vmul.f32 %v3679_v53, %v4310_v18  ;;  %v4519_v23 = vadd.f32 %v4462_v16, %v1126_v58  ;;  %v797_v38 = vrot.slane %v760_v21, 7  ;;  %v1059_v50 = vmul.f32 %v3679_v53, %v4325_v28 }
 0x1e7   : > { %3700 = vmatprep.mubr.bf16.mxu1 %v1191_v26  ;;  %v868_v63 = vmul.f32 %v4316_v24, %v815_v40  ;;  %v951_v29 = vmul.f32 %v4319_v25, %v815_v40  ;;  %v4525_v30 = vadd.f32 %v4462_v16, %v1125_v22  ;;  %v1041_v48 = vmul.f32 %v4332_v37, %v815_v40 }
 0x1e8   : > { %6333 = vst [vmem:[#allocation32_spill] sm:$0xff] %v4519_v23  ;;  %v6245_v36 = vmax.f32 %v4519_v23, 0.0  ;;  %v813_v60 = vmul.f32 %v4298_v11, %v797_v38  ;;  %v829_v43 = vrot.slane %v760_v21, 1  ;;  %v4530_v58 = vadd.f32 %v915_v42, %v897_v32 }
 0x1e9   : > { %6334 = vst [vmem:[#allocation33_spill] sm:$0xff] %v4525_v30  ;;  %v4532_v26 = vadd.f32 %v1004_v47, %v984_v31  ;;  %v6244_v12 = vmax.f32 %v4525_v30, 0.0  ;;  %v884_v6 = vmul.f32 %v4307_v17, %v760_v21  ;;  %v4536_v53 = vadd.f32 %v886_v51, %v868_v63  ;;  %v773_v31 = vpop.f32.mrf.mxu1 }
 0x1ea   : > { %v4538_v22 = vadd.f32 %v971_v1, %v951_v29  ;;  %v866_v19 = vmul.f32 %v4316_v24, %v813_v60  ;;  %v949_v40 = vmul.f32 %v4319_v25, %v813_v60  ;;  %v969_v42 = vmul.f32 %v4310_v18, %v760_v21 }
 0x1eb   : > { %v1192_v32 = vpack.c.bf16 %v6245_v36, %v6244_v12  ;;  %v1039_v38 = vmul.f32 %v4332_v37, %v813_v60  ;;  %v802_v47 = vrot.slane %v3682_v39, 7  ;;  %v4548_v7 = vadd.f32 %v1059_v50, %v1041_v48 }
 0x1ec   : > { %v4551_v1 = vmul.f32 %v4304_v14, %v829_v43  ;;  %v1057_v51 = vmul.f32 %v4325_v28, %v760_v21  ;;  %v834_v63 = vrot.slane %v3682_v39, 1  ;;  %v4554_v29 = vadd.f32 %v884_v6, %v866_v19 }
 0x1ed   : > { %3701 = vmatmul.mubr.bf16.vlgmr.msra.gmra.mxu1 %v1192_v32  ;;  %v4556_v30 = vadd.f32 %v969_v42, %v949_v40  ;;  %v818_v12 = vmul.f32 %v4298_v11, %v802_v47  ;;  %v889_v36 = vmul.f32 %v3682_v39, %v4307_v17  ;;  %v974_v50 = vmul.f32 %v3682_v39, %v4310_v18 }
 0x1ee   : > { %v4560_v60 = vadd.f32 %v1057_v51, %v1039_v38  ;;  %v800_v48 = vrot.slane %v773_v31, 7  ;;  %v832_v23 = vrot.slane %v773_v31, 1  ;;  %v1062_v6 = vmul.f32 %v3682_v39, %v4325_v28  ;;  %v3683_v39 = vpop.f32.mrf.mxu1 }
 0x1ef   : > { %v871_v43 = vmul.f32 %v4316_v24, %v818_v12  ;;  %v954_v21 = vmul.f32 %v4319_v25, %v818_v12  ;;  %v1044_v32 = vmul.f32 %v4332_v37, %v818_v12  ;;  %v4568_v19 = vmul.f32 %v4304_v14, %v834_v63 }
 0x1f0   : > { %v816_v40 = vmul.f32 %v4298_v11, %v800_v48  ;;  %v887_v42 = vmul.f32 %v4307_v17, %v773_v31  ;;  %v972_v38 = vmul.f32 %v4310_v18, %v773_v31  ;;  %v4576_v51 = vmul.f32 %v4304_v14, %v832_v23 }
 0x1f1   : > { %v4573_v47 = vadd.f32 %v889_v36, %v871_v43  ;;  %v1060_v33 = vmul.f32 %v4325_v28, %v773_v31  ;;  %v912_v12 = vmul.f32 %v4322_v27, %v4411_v20  ;;  %v4581_v13 = vadd.f32 %v974_v50, %v954_v21 }
 0x1f2   : > { %v4583_v63 = vadd.f32 %v1062_v6, %v1044_v32  ;;  %v869_v48 = vmul.f32 %v4316_v24, %v816_v40  ;;  %v925_v8 = vadd.f32 %v4395_v57, %v4375_v54  ;;  %v952_v36 = vmul.f32 %v4319_v25, %v816_v40 }
 0x1f3   : > { %6335 = vst [vmem:[#allocation34_spill] sm:$0xff] %v4573_v47  ;;  %6336 = vst [vmem:[#allocation35_spill] sm:$0xff] %v4581_v13  ;;  %v1000_v23 = vmul.f32 %v4335_v41, %v4411_v20  ;;  %v1001_v31 = vmul.f32 %v4335_v41, %v4449_v61  ;;  %v1086_v43 = vmul.f32 %v4373_v44, %v4449_v61  ;;  %v803_v6 = vrot.slane %v3683_v39, 7 }
 0x1f4   : > { %6337 = vst [vmem:[#allocation36_spill] sm:$0xff] %v4583_v63  ;;  %v1042_v50 = vmul.f32 %v4332_v37, %v816_v40  ;;  %v926_v21 = vadd.f32 %v912_v12, %v4435_v55  ;;  %v1087_v32 = vmul.f32 %v4373_v44, %v4402_v34  ;;  %v4599_v54 = vadd.f32 %v887_v42, %v869_v48 }
 0x1f5   : > { %v1016_v57 = vadd.f32 %v1000_v23, %v4437_v0  ;;  %v1017_v20 = vadd.f32 %v1001_v31, %v4470_v59  ;;  %v1100_v2 = vadd.f32 %v1086_v43, %v4472_v62  ;;  %v819_v13 = vmul.f32 %v4298_v11, %v803_v6 }
 0x1f6   : > { %v1101_v4 = vadd.f32 %v1087_v32, %v4426_v56  ;;  %v835_v47 = vrot.slane %v3683_v39, 1  ;;  %v975_v40 = vmul.f32 %v3683_v39, %v4310_v18  ;;  %v913_v63 = vmul.f32 %v4322_v27, %v4449_v61  ;;  %v776_v61 = vpop.f32.mrf.mxu1 }
 0x1f7   : > { %v1115_v55 = vadd.f32 %v1016_v57, %v925_v8  ;;  %v1116_v12 = vadd.f32 %v1017_v20, %v926_v21  ;;  %v914_v42 = vmul.f32 %v4322_v27, %v4402_v34  ;;  %v955_v59 = vmul.f32 %v4319_v25, %v819_v13 }
 0x1f8   : > { %v4612_v0 = vmul.f32 %v4304_v14, %v835_v47  ;;  %v1045_v56 = vmul.f32 %v4332_v37, %v819_v13  ;;  %v1002_v62 = vmul.f32 %v4335_v41, %v4402_v34  ;;  %v927_v8 = vadd.f32 %v913_v63, %v4464_v35 }
 0x1f9   : > { %v1127_v48 = vadd.f32 %v1115_v55, %v1100_v2  ;;  %v1128_v23 = vadd.f32 %v1116_v12, %v1101_v4  ;;  %v928_v31 = vadd.f32 %v914_v42, %v4416_v49  ;;  %v4620_v43 = vadd.f32 %v972_v38, %v952_v36 }
 0x1fa   : > { %v1074_v21 = vadd.f32 %v1060_v33, %v1042_v50  ;;  %v991_v32 = vadd.f32 %v975_v40, %v955_v59  ;;  %v1063_v47 = vmul.f32 %v3683_v39, %v4325_v28  ;;  %v1018_v2 = vadd.f32 %v1002_v62, %v4424_v15 }
 0x1fb   : > { %v4624_v6 = vadd.f32 %v4462_v16, %v1127_v48  ;;  %v4627_v13 = vadd.f32 %v4462_v16, %v1128_v23  ;;  %v1136_v4 = vadd.f32 %v4455_v3, %v928_v31  ;;  %v1011_v35 = vmul.f32 %v4335_v41, %v4612_v0 }
 0x1fc   : > { %v4633_v34 = vadd.f32 %v1063_v47, %v1045_v56  ;;  %v801_v49 = vrot.slane %v776_v61, 7  ;;  %v833_v33 = vrot.slane %v776_v61, 1  ;;  %v1117_v63 = vadd.f32 %v1018_v2, %v927_v8 }
 0x1fd   : > { %v6268_v38 = vmax.f32 %v4624_v6, 0.0  ;;  %v6267_v39 = vmax.f32 %v4627_v13, 0.0  ;;  %v4638_v36 = vadd.f32 %v4462_v16, %v1136_v4  ;;  %v4640_v50 = vadd.f32 %v1011_v35, %v991_v32 }
 0x1fe   : > { %v817_v15 = vmul.f32 %v4298_v11, %v801_v49  ;;  %v849_v3 = vmul.f32 %v4304_v14, %v833_v33  ;;  %v888_v57 = vmul.f32 %v4307_v17, %v776_v61  ;;  %v1129_v40 = vadd.f32 %v1117_v63, %v4457_v46 }
 0x1ff   : > { %v1193_v20 = vpack.c.bf16 %v6267_v39, %v6268_v38  ;;  %v6266_v55 = vmax.f32 %v4638_v36, 0.0  ;;  %v973_v12 = vmul.f32 %v4310_v18, %v776_v61  ;;  %v1061_v56 = vmul.f32 %v4325_v28, %v776_v61 }
 0x200   : > { %v870_v42 = vmul.f32 %v4316_v24, %v817_v15  ;;  %v953_v59 = vmul.f32 %v4319_v25, %v817_v15  ;;  %v1005_v17 = vmul.f32 %v4335_v41, %v4551_v1  ;;  %v4658_v62 = vadd.f32 %v4462_v16, %v1129_v40 }
 0x201   : > { %3704 = vmatprep.mubr.bf16.mxu1 %v1193_v20  ;;  %v1043_v48 = vmul.f32 %v4332_v37, %v817_v15  ;;  %v1089_v46 = vmul.f32 %v4373_v44, %v4551_v1  ;;  %v1090_v18 = vmul.f32 %v4373_v44, %v4480_v9  ;;  %v916_v28 = vmul.f32 %v4322_v27, %v4551_v1 }
 0x202   : > { %v902_v24 = vadd.f32 %v888_v57, %v870_v42  ;;  %v989_v23 = vadd.f32 %v973_v12, %v953_v59  ;;  %v1021_v25 = vadd.f32 %v1005_v17, %v4556_v30  ;;  %v6265_v8 = vmax.f32 %v4658_v62, 0.0 }
 0x203   : > { %v1103_v31 = vadd.f32 %v1089_v46, %v4560_v60  ;;  %v1104_v61 = vadd.f32 %v1090_v18, %v4501_v10  ;;  %v917_v37 = vmul.f32 %v4322_v27, %v4480_v9  ;;  %v930_v47 = vadd.f32 %v916_v28, %v4554_v29 }
 0x204   : > { %v1118_v32 = vadd.f32 %v1021_v25, %v4530_v58  ;;  %v1006_v2 = vmul.f32 %v4335_v41, %v4480_v9  ;;  %v1007_v30 = vmul.f32 %v4335_v41, %v4515_v45  ;;  %v1194_v1 = vpack.c.bf16 %v6266_v55, %v6265_v8 }
 0x205   : > { %v1111_v10 = vadd.f32 %v1103_v31, %v4532_v26  ;;  %v931_v60 = vadd.f32 %v917_v37, %v4492_v52  ;;  %v1091_v58 = vmul.f32 %v4373_v44, %v4515_v45  ;;  %v1092_v35 = vmul.f32 %v4373_v44, %v4576_v51  ;;  %v6342_v37 = vld [vmem:[#allocation36_spill] sm:$0xff] }
 0x206   : > { %v1130_v4 = vadd.f32 %v1118_v32, %v1104_v61  ;;  %v1022_v29 = vadd.f32 %v1006_v2, %v4497_v5  ;;  %v1023_v9 = vadd.f32 %v1007_v30, %v4538_v22  ;;  %3705 = vmatmul.mubr.bf16.gmra.mxu1 %v1194_v1  ;;  %v1075_v49 = vadd.f32 %v1061_v56, %v1043_v48  ;;  %v6343_v1 = vld [vmem:[#allocation34_spill] sm:$0xff] }
 0x207   : > { %v4692_v33 = vadd.f32 %v4462_v16, %v1111_v10  ;;  %v1105_v26 = vadd.f32 %v1091_v58, %v4548_v7  ;;  %v918_v52 = vmul.f32 %v4322_v27, %v4515_v45  ;;  %v1106_v15 = vadd.f32 %v1092_v35, %v1074_v21 }
 0x208   : > { %v4698_v63 = vadd.f32 %v4462_v16, %v1130_v4  ;;  %v1119_v5 = vadd.f32 %v1022_v29, %v930_v47  ;;  %v1120_v57 = vadd.f32 %v1023_v9, %v931_v60  ;;  %v919_v20 = vmul.f32 %v4322_v27, %v4576_v51  ;;  %v6345_v4 = vld [vmem:[#allocation35_spill] sm:$0xff] }
 0x209   : > { %6338 = vst [vmem:[#allocation37_spill] sm:$0xff] %v4692_v33  ;;  %v6264_v22 = vmax.f32 %v4692_v33, 0.0  ;;  %v932_v40 = vadd.f32 %v918_v52, %v4536_v53  ;;  %v1008_v12 = vmul.f32 %v4335_v41, %v4576_v51  ;;  %v1009_v59 = vmul.f32 %v4335_v41, %v849_v3 }
 0x20a   : > { %6339 = vst [vmem:[#allocation38_spill] sm:$0xff] %v4698_v63  ;;  %v6263_v7 = vmax.f32 %v4698_v63, 0.0  ;;  %v1131_v42 = vadd.f32 %v1119_v5, %v1105_v26  ;;  %v1132_v45 = vadd.f32 %v1120_v57, %v1106_v15  ;;  %v933_v21 = vadd.f32 %v919_v20, %v4599_v54  ;;  %v3920_v5 = vld [vmem:[%s6221_s4 + $0x60] sm:$0xff]   ;;  %v3922_v57 = vld [vmem:[%s6221_s4 + $0x50] sm:$0xff]   ;;  %v3923_v20 = vld [vmem:[%s6221_s4 + $0x48] sm:$0xff]  }
 0x20b   : > { %v1024_v56 = vadd.f32 %v1008_v12, %v4620_v43  ;;  %v1093_v17 = vmul.f32 %v4373_v44, %v849_v3  ;;  %v1094_v48 = vmul.f32 %v4373_v44, %v4568_v19  ;;  %v1025_v18 = vadd.f32 %v1009_v59, %v989_v23  ;;  %3722 = vmatprep.subr.bf16.mxu0 %v3920_v5  ;;  %v3925_v12 = vld [vmem:[%s6221_s4 + $0xb8] sm:$0xff]   ;;  %v3490_v59 = vld [vmem:[%s6222_s5 + $0x10] sm:$0xff] }
 0x20c   : > { %v1195_v53 = vpack.c.bf16 %v6263_v7, %v6264_v22  ;;  %v4718_v51 = vadd.f32 %v4462_v16, %v1131_v42  ;;  %v4721_v46 = vadd.f32 %v4462_v16, %v1132_v45  ;;  %v920_v43 = vmul.f32 %v4322_v27, %v849_v3  ;;  %3723 = vmatpush3.bf16.msra.mxu0 %v3920_v5  ;;  %v4820_v5 = vld [vmem:[%s6222_s5 + $0x18] ss:$0 sm:$0xff] }
 0x20d   : > { %v1107_v54 = vadd.f32 %v1093_v17, %v1075_v49  ;;  %v1121_v25 = vadd.f32 %v1024_v56, %v932_v40  ;;  %v921_v28 = vmul.f32 %v4322_v27, %v4568_v19  ;;  %v1108_v32 = vadd.f32 %v1094_v48, %v6342_v37  ;;  %v3924_v40 = vld [vmem:[%s6221_s4 + $0x40] sm:$0xff]   ;;  %3748 = vmatprep.subr.bf16.mxu1 %v3925_v12 }
 0x20e   : > { %6340 = vst [vmem:[#allocation39_spill] sm:$0xff] %v4718_v51  ;;  %6341 = vst [vmem:[#allocation40_spill] sm:$0xff] %v4721_v46  ;;  %3708 = vmatprep.mubr.bf16.mxu1 %v1195_v53  ;;  %v6262_v31 = vmax.f32 %v4718_v51, 0.0  ;;  %v6261_v61 = vmax.f32 %v4721_v46, 0.0  ;;  %v1122_v47 = vadd.f32 %v1025_v18, %v933_v21  ;;  %v934_v30 = vadd.f32 %v920_v43, %v902_v24  ;;  %v6349_v21 = vld [vmem:[#allocation24_spill] sm:$0xff] }
 0x20f   : > { %v1133_v2 = vadd.f32 %v1121_v25, %v1107_v54  ;;  %v935_v10 = vadd.f32 %v921_v28, %v6343_v1  ;;  %v1010_v23 = vmul.f32 %v4335_v41, %v4568_v19  ;;  %v1095_v60 = vmul.f32 %v4373_v44, %v4612_v0  ;;  %3749 = vmatpush3.bf16.msra.mxu1 %v3925_v12  ;;  %v6350_v54 = vld [vmem:[#allocation23_spill] sm:$0xff] }
 0x210   : > { %v1196_v27 = vpack.c.bf16 %v6261_v61, %v6262_v31  ;;  %v1134_v3 = vadd.f32 %v1122_v47, %v1108_v32  ;;  %v4787_v56 = vrot.slane %v3490_v59, %v6349_v21  ;;  %v4791_v25 = vrot.slane %v3490_v59, %v6350_v54  ;;  %v6351_v28 = vld [vmem:[#allocation27_spill] sm:$0xff]  ;;  %v6352_v32 = vld [vmem:[#allocation28_spill] sm:$0xff] }
 0x211   : > { %v4739_v58 = vadd.f32 %v4462_v16, %v1133_v2  ;;  %v1026_v29 = vadd.f32 %v1010_v23, %v6345_v4  ;;  %v1137_v24 = vadd.f32 %v4640_v50, %v935_v10  ;;  %v1109_v41 = vadd.f32 %v1095_v60, %v4633_v34  ;;  %v6353_v2 = vld [vmem:[#allocation6_spill] sm:$0xff]  ;;  %v6362_v54 = vld [vmem:[#allocation31_spill] sm:$0xff] }
 0x212   : > { %3709 = vmatmul.mubr.bf16.gmra.mxu1 %v1196_v27  ;;  %v4744_v9 = vadd.f32 %v4462_v16, %v1134_v3  ;;  %v4794_v37 = vrot.slane %v3490_v59, %v6351_v28  ;;  %v4797_v47 = vrot.slane %v3490_v59, %v6352_v32  ;;  %v6354_v23 = vld [vmem:[#allocation26_spill] sm:$0xff]  ;;  %v6363_v21 = vmax.f32 %v6362_v54, 0.0 }
 0x213   : > { %6344 = vst [vmem:[#allocation36_spill] sm:$0xff] %v4739_v58  ;;  %v1123_v19 = vadd.f32 %v1026_v29, %v934_v30  ;;  %v6260_v35 = vmax.f32 %v4739_v58, 0.0  ;;  %v4750_v44 = vadd.f32 %v4462_v16, %v1137_v24  ;;  %v4800_v30 = vrot.slane %v3490_v59, %v6353_v2  ;;  %v6355_v24 = vld [vmem:[#allocation29_spill] sm:$0xff] }
 0x214   : > { %6346 = vst [vmem:[#allocation34_spill] sm:$0xff] %v4744_v9  ;;  %v6259_v49 = vmax.f32 %v4744_v9, 0.0  ;;  %v4804_v27 = vrot.slane %v3490_v59, %v6354_v23 }
 0x215   : > { %v1135_v26 = vadd.f32 %v1123_v19, %v1109_v41  ;;  %6347 = vst [vmem:[#allocation35_spill] sm:$0xff] %v4750_v44  ;;  %v6257_v52 = vmax.f32 %v4750_v44, 0.0  ;;  %v4810_v41 = vrot.slane %v3490_v59, %v6355_v24 }
 0x216   : > { %v1197_v0 = vpack.c.bf16 %v6259_v49, %v6260_v35 }
 0x217   : > { %v4757_v50 = vadd.f32 %v4462_v16, %v1135_v26  ;;  %v3921_v16 = vld [vmem:[%s6221_s4 + $0x58] sm:$0xff]   ;;  %v6356_v26 = vld [vmem:[#allocation25_spill] sm:$0xff] }
 0x218   : > { %3712 = vmatprep.mubr.bf16.mxu1 %v1197_v0  ;;  %3724 = vmatprep.subr.bf16.mxu0 %v3921_v16  ;;  %v4814_v0 = vrot.slane %v3490_v59, %v6356_v26 }
 0x219   : > { %6348 = vst [vmem:[#allocation41_spill] sm:$0xff] %v4757_v50  ;;  %v6258_v34 = vmax.f32 %v4757_v50, 0.0  ;;  %3725 = vmatpush3.bf16.msra.mxu0 %v3921_v16 }
 0x21a   : > { %3726 = vmatprep.subr.bf16.mxu0 %v3922_v57 }
 0x21b   : > { %v1198_v15 = vpack.c.bf16 %v6257_v52, %v6258_v34 }
 0x21d   : > { %3713 = vmatmul.mubr.bf16.gmra.mxu1 %v1198_v15  ;;  %3727 = vmatpush3.bf16.msra.mxu0 %v3922_v57 }
 0x21e   : > { %3728 = vmatprep.subr.bf16.mxu0 %v3923_v20 }
 0x221   : > { %3729 = vmatpush3.bf16.msra.mxu0 %v3923_v20 }
 0x222   : > { %3730 = vmatprep.subr.bf16.mxu0 %v3924_v40 }
 0x225   : > { %3731 = vmatpush3.bf16.msra.mxu0 %v3924_v40 }
 0x2ad   : > { %v3702_v42 = vpop.f32.mrf.mxu1 }
 0x2ae   : > { %v1346_v45 = vrot.slane %v3702_v42, 7  ;;  %v1378_v18 = vrot.slane %v3702_v42, 1  ;;  %v1519_v29 = vmul.f32 %v3702_v42, %v4791_v25  ;;  %v1435_v16 = vmul.f32 %v3702_v42, %v4800_v30 }
 0x2af   : > { %v1281_v17 = vpop.f32.mrf.mxu1  ;;  %v1608_v40 = vmul.f32 %v3702_v42, %v4804_v27 }
 0x2b0   : > { %v1362_v48 = vmul.f32 %v4298_v11, %v1346_v45  ;;  %v1344_v53 = vrot.slane %v1281_v17, 7  ;;  %v1376_v10 = vrot.slane %v1281_v17, 1  ;;  %v1394_v4 = vmul.f32 %v4304_v14, %v1378_v18 }
 0x2b1   : > { %v3703_v43 = vpop.f32.mrf.mxu1  ;;  %v1433_v45 = vmul.f32 %v4800_v30, %v1281_v17  ;;  %v1517_v52 = vmul.f32 %v4791_v25, %v1281_v17 }
 0x2b2   : > { %v1499_v1 = vmul.f32 %v4787_v56, %v1362_v48  ;;  %v1360_v3 = vmul.f32 %v4298_v11, %v1344_v53  ;;  %v1347_v60 = vrot.slane %v3703_v43, 7  ;;  %v1417_v19 = vmul.f32 %v4794_v37, %v1362_v48 }
 0x2b3   : > { %v1590_v15 = vmul.f32 %v4797_v47, %v1362_v48  ;;  %v1392_v20 = vmul.f32 %v4304_v14, %v1376_v10  ;;  %v1284_v53 = vpop.f32.mrf.mxu1  ;;  %v1555_v48 = vmul.f32 %v4810_v41, %v1394_v4  ;;  %v1379_v34 = vrot.slane %v3703_v43, 1 }
 0x2b4   : > { %v1535_v57 = vadd.f32 %v1519_v29, %v1499_v1  ;;  %v1415_v12 = vmul.f32 %v4794_v37, %v1360_v3  ;;  %v1363_v59 = vmul.f32 %v4298_v11, %v1347_v60  ;;  %v1497_v18 = vmul.f32 %v4787_v56, %v1360_v3 }
 0x2b5   : > { %v1449_v49 = vadd.f32 %v1435_v16, %v1417_v19  ;;  %v1467_v1 = vmul.f32 %v4814_v0, %v1394_v4  ;;  %v1622_v10 = vadd.f32 %v1608_v40, %v1590_v15  ;;  %v1640_v42 = vmul.f32 %v4820_v5, %v1394_v4 }
 0x2b6   : > { %v1571_v29 = vadd.f32 %v1555_v48, %v1535_v57  ;;  %v1465_v35 = vmul.f32 %v4814_v0, %v1392_v20  ;;  %v1345_v61 = vrot.slane %v1284_v53, 7  ;;  %v1377_v31 = vrot.slane %v1284_v53, 1 }
 0x2b7   : > { %v1447_v60 = vadd.f32 %v1433_v45, %v1415_v12  ;;  %v1553_v7 = vmul.f32 %v4810_v41, %v1392_v20  ;;  %v1500_v22 = vmul.f32 %v4787_v56, %v1363_v59  ;;  %v1591_v3 = vmul.f32 %v4797_v47, %v1363_v59 }
 0x2b8   : > { %v1533_v17 = vadd.f32 %v1517_v52, %v1497_v18  ;;  %v1395_v19 = vmul.f32 %v4304_v14, %v1379_v34  ;;  %v1361_v16 = vmul.f32 %v4298_v11, %v1345_v61  ;;  %v1393_v15 = vmul.f32 %v4304_v14, %v1377_v31 }
 0x2b9   : > { %v1418_v4 = vmul.f32 %v4794_v37, %v1363_v59  ;;  %v1436_v57 = vmul.f32 %v3703_v43, %v4800_v30  ;;  %v1520_v40 = vmul.f32 %v3703_v43, %v4791_v25  ;;  %v1609_v12 = vmul.f32 %v3703_v43, %v4804_v27 }
 0x2ba   : > { %v1416_v20 = vmul.f32 %v4794_v37, %v1361_v16  ;;  %v1434_v45 = vmul.f32 %v4800_v30, %v1284_v53  ;;  %v1498_v52 = vmul.f32 %v4787_v56, %v1361_v16  ;;  %v1518_v34 = vmul.f32 %v4791_v25, %v1284_v53 }
 0x2bb   : > { %v1536_v48 = vadd.f32 %v1520_v40, %v1500_v22  ;;  %v1623_v61 = vadd.f32 %v1609_v12, %v1591_v3  ;;  %v1589_v31 = vmul.f32 %v4797_v47, %v1361_v16  ;;  %v1607_v59 = vmul.f32 %v4804_v27, %v1284_v53 }
 0x2bc   : > { %v1448_v18 = vadd.f32 %v1434_v45, %v1416_v20  ;;  %v1466_v8 = vmul.f32 %v4814_v0, %v1393_v15  ;;  %v1534_v55 = vadd.f32 %v1518_v34, %v1498_v52  ;;  %v1554_v43 = vmul.f32 %v4810_v41, %v1393_v15 }
 0x2bd   : > { %v1479_v39 = vadd.f32 %v1465_v35, %v1447_v60  ;;  %v1556_v38 = vmul.f32 %v4810_v41, %v1395_v19  ;;  %v1621_v26 = vadd.f32 %v1607_v59, %v1589_v31  ;;  %v1639_v24 = vmul.f32 %v4820_v5, %v1393_v15  ;;  %v4859_v60 = vld [vmem:[%s6223_s6 + $0x1] ss:$0 sm:$0xff] }
 0x2be   : > { %v1450_v23 = vadd.f32 %v1436_v57, %v1418_v4  ;;  %v1641_v22 = vmul.f32 %v4820_v5, %v1395_v19  ;;  %v1480_v3 = vadd.f32 %v1466_v8, %v1448_v18  ;;  %v1570_v40 = vadd.f32 %v1554_v43, %v1534_v55 }
 0x2bf   : > { %v1654_v16 = vadd.f32 %v1640_v42, %v1622_v10  ;;  %v1569_v12 = vadd.f32 %v1553_v7, %v1533_v17  ;;  %v1572_v53 = vadd.f32 %v1556_v38, %v1536_v48  ;;  %v1653_v20 = vadd.f32 %v1639_v24, %v1621_v26 }
 0x2c0   : > { %v1468_v45 = vmul.f32 %v4814_v0, %v1395_v19  ;;  %v1655_v52 = vadd.f32 %v1641_v22, %v1623_v61  ;;  %v1670_v34 = vadd.f32 %v1571_v29, %v1480_v3  ;;  %v1669_v2 = vadd.f32 %v1570_v40, %v1479_v39 }
 0x2c1   : > { %v1481_v35 = vadd.f32 %v1467_v1, %v1449_v49  ;;  %v1667_v15 = vadd.f32 %v1653_v20, %v1569_v12  ;;  %v6357_v10 = vlaneseq }
 0x2c2   : > { %v4861_v4 = vadd.f32 %v1468_v45, %v1450_v23  ;;  %v1682_v8 = vadd.f32 %v1670_v34, %v1655_v52  ;;  %v1681_v38 = vadd.f32 %v1669_v2, %v1654_v16 }
 0x2c3   : > { %v4864_v7 = vand.u32 127, %v6357_v10  ;;  %v1671_v24 = vadd.f32 %v1572_v53, %v1481_v35  ;;  %v4870_v17 = vadd.f32 %v4859_v60, %v1667_v15 }
 0x2c4   : > { %v4873_v23 = vadd.f32 %v4859_v60, %v1681_v38  ;;  %v4881_v43 = vadd.f32 %v4859_v60, %v1682_v8 }
 0x2c5   : > { %vm1732_vm3 = vcmp.lt.s32.totalorder %v4864_v7, 32  ;;  %vm2309_vm4 = vcmp.lt.s32.totalorder %v4864_v7, 64  ;;  %vm2886_vm6 = vcmp.lt.s32.totalorder %v4864_v7, 96  ;;  %v3033_v7 = vld [vmem:[%s6226_s9] sm:$0xff] }
 0x2c6   : > { %v3706_v55 = vpop.f32.mrf.mxu1 }
 0x2c7   : > { %v1350_v26 = vrot.slane %v3706_v55, 7  ;;  %v1382_v42 = vrot.slane %v3706_v55, 1  ;;  %v1439_v39 = vmul.f32 %v3706_v55, %v4800_v30  ;;  %v1523_v49 = vmul.f32 %v3706_v55, %v4791_v25 }
 0x2c8   : > { %v1612_v1 = vmul.f32 %v3706_v55, %v4804_v27  ;;  %v1297_v29 = vpop.f32.mrf.mxu1 }
 0x2c9   : > { %v1366_v19 = vmul.f32 %v4298_v11, %v1350_v26  ;;  %v1398_v2 = vmul.f32 %v4304_v14, %v1382_v42  ;;  %v1348_v57 = vrot.slane %v1297_v29, 7  ;;  %v1380_v48 = vrot.slane %v1297_v29, 1 }
 0x2ca   : > { %v1437_v61 = vmul.f32 %v4800_v30, %v1297_v29  ;;  %v1521_v31 = vmul.f32 %v4791_v25, %v1297_v29  ;;  %v1610_v59 = vmul.f32 %v4804_v27, %v1297_v29  ;;  %v3707_v18 = vpop.f32.mrf.mxu1 }
 0x2cb   : > { %v1421_v22 = vmul.f32 %v4794_v37, %v1366_v19  ;;  %v1471_v3 = vmul.f32 %v4814_v0, %v1398_v2  ;;  %v1503_v40 = vmul.f32 %v4787_v56, %v1366_v19  ;;  %v1559_v12 = vmul.f32 %v4810_v41, %v1398_v2 }
 0x2cc   : > { %v1594_v53 = vmul.f32 %v4797_v47, %v1366_v19  ;;  %v1364_v20 = vmul.f32 %v4298_v11, %v1348_v57  ;;  %v1396_v45 = vmul.f32 %v4304_v14, %v1380_v48  ;;  %v1351_v35 = vrot.slane %v3707_v18, 7  ;;  %v1300_v57 = vpop.f32.mrf.mxu1 }
 0x2cd   : > { %v1453_v52 = vadd.f32 %v1439_v39, %v1421_v22  ;;  %v1539_v34 = vadd.f32 %v1523_v49, %v1503_v40  ;;  %v1383_v15 = vrot.slane %v3707_v18, 1  ;;  %v1644_v55 = vmul.f32 %v4820_v5, %v1398_v2 }
 0x2ce   : > { %v1626_v8 = vadd.f32 %v1612_v1, %v1594_v53  ;;  %v1419_v10 = vmul.f32 %v4794_v37, %v1364_v20  ;;  %v1501_v38 = vmul.f32 %v4787_v56, %v1364_v20  ;;  %v1469_v29 = vmul.f32 %v4814_v0, %v1396_v45 }
 0x2cf   : > { %v1485_v26 = vadd.f32 %v1471_v3, %v1453_v52  ;;  %v4894_v42 = vadd.f32 %v1559_v12, %v1539_v34  ;;  %v1592_v19 = vmul.f32 %v4797_v47, %v1364_v20  ;;  %v1557_v1 = vmul.f32 %v4810_v41, %v1396_v45 }
 0x2d0   : > { %v4898_v48 = vadd.f32 %v1644_v55, %v1626_v8  ;;  %v1451_v39 = vadd.f32 %v1437_v61, %v1419_v10  ;;  %v1537_v49 = vadd.f32 %v1521_v31, %v1501_v38  ;;  %v1642_v2 = vmul.f32 %v4820_v5, %v1396_v45 }
 0x2d1   : > { %v1624_v22 = vadd.f32 %v1610_v59, %v1592_v19  ;;  %v1367_v40 = vmul.f32 %v4298_v11, %v1351_v35  ;;  %v1399_v3 = vmul.f32 %v4304_v14, %v1383_v15  ;;  %v1524_v53 = vmul.f32 %v3707_v18, %v4791_v25 }
 0x2d2   : > { %v4904_v12 = vadd.f32 %v1469_v29, %v1451_v39  ;;  %v1613_v20 = vmul.f32 %v3707_v18, %v4804_v27  ;;  %v1349_v52 = vrot.slane %v1300_v57, 7  ;;  %v1381_v15 = vrot.slane %v1300_v57, 1  ;;  %v3710_v29 = vpop.f32.mrf.mxu1 }
 0x2d3   : > { %v1656_v34 = vadd.f32 %v1642_v2, %v1624_v22  ;;  %v1504_v61 = vmul.f32 %v4787_v56, %v1367_v40  ;;  %v1560_v31 = vmul.f32 %v4810_v41, %v1399_v3  ;;  %v1595_v59 = vmul.f32 %v4797_v47, %v1367_v40 }
 0x2d4   : > { %v1645_v45 = vmul.f32 %v4820_v5, %v1399_v3  ;;  %v1365_v35 = vmul.f32 %v4298_v11, %v1349_v52  ;;  %v1438_v8 = vmul.f32 %v4800_v30, %v1300_v57  ;;  %v1522_v38 = vmul.f32 %v4791_v25, %v1300_v57 }
 0x2d5   : > { %v1683_v55 = vadd.f32 %v1671_v24, %v1656_v34  ;;  %v1540_v10 = vadd.f32 %v1524_v53, %v1504_v61  ;;  %v1627_v18 = vadd.f32 %v1613_v20, %v1595_v59  ;;  %v1397_v19 = vmul.f32 %v4304_v14, %v1381_v15 }
 0x2d6   : > { %v1420_v39 = vmul.f32 %v4794_v37, %v1365_v35  ;;  %v1502_v22 = vmul.f32 %v4787_v56, %v1365_v35  ;;  %v1593_v2 = vmul.f32 %v4797_v47, %v1365_v35  ;;  %v4920_v40 = vadd.f32 %v1557_v1, %v1537_v49  ;;  %v1313_v1 = vpop.f32.mrf.mxu1 }
 0x2d7   : > { %v4923_v3 = vadd.f32 %v4859_v60, %v1683_v55  ;;  %v1576_v52 = vadd.f32 %v1560_v31, %v1540_v10  ;;  %v1611_v24 = vmul.f32 %v4804_v27, %v1300_v57  ;;  %v4926_v53 = vadd.f32 %v1645_v45, %v1627_v18 }
 0x2d8   : > { %v1452_v20 = vadd.f32 %v1438_v8, %v1420_v39  ;;  %v1470_v34 = vmul.f32 %v4814_v0, %v1397_v19  ;;  %v1538_v61 = vadd.f32 %v1522_v38, %v1502_v22  ;;  %v1558_v15 = vmul.f32 %v4810_v41, %v1397_v19 }
 0x2d9   : > { %v1719_v59 = vmax.f32 %v4923_v3, 0.0  ;;  %v1625_v16 = vadd.f32 %v1611_v24, %v1593_v2  ;;  %v1643_v49 = vmul.f32 %v4820_v5, %v1397_v19  ;;  %v4932_v35 = vadd.f32 %v1576_v52, %v1485_v26 }
 0x2da   : > { %v4934_v55 = vadd.f32 %v1470_v34, %v1452_v20  ;;  %v1354_v31 = vrot.slane %v3710_v29, 7  ;;  %v1386_v57 = vrot.slane %v3710_v29, 1  ;;  %v4936_v45 = vadd.f32 %v1558_v15, %v1538_v61  ;;  %v6359_v15 = vld [vmem:[#allocation30_spill] sm:$0xff] }
 0x2db   : > { %v4938_v8 = vadd.f32 %v1643_v49, %v1625_v16  ;;  %v1442_v10 = vmul.f32 %v3710_v29, %v4800_v30  ;;  %v1527_v18 = vmul.f32 %v3710_v29, %v4791_v25  ;;  %v1352_v19 = vrot.slane %v1313_v1, 7  ;;  %v3711_v16 = vpop.f32.mrf.mxu1 }
 0x2dc   : > { %v1370_v38 = vmul.f32 %v4298_v11, %v1354_v31  ;;  %v1402_v39 = vmul.f32 %v4304_v14, %v1386_v57  ;;  %v1384_v22 = vrot.slane %v1313_v1, 1  ;;  %v1615_v26 = vmul.f32 %v3710_v29, %v4804_v27 }
 0x2dd   : > { %v1440_v2 = vmul.f32 %v4800_v30, %v1313_v1  ;;  %v1525_v3 = vmul.f32 %v4791_v25, %v1313_v1  ;;  %v1717_v52 = vmax.f32 %v4873_v23, 0.0  ;;  %v6358_v61 = vmax.f32 %v4870_v17, 0.0 }
 0x2de   : > { %v1424_v24 = vmul.f32 %v4794_v37, %v1370_v38  ;;  %v1474_v20 = vmul.f32 %v4814_v0, %v1402_v39  ;;  %v1507_v34 = vmul.f32 %v4787_v56, %v1370_v38  ;;  %v6360_v49 = vmax.f32 %v6359_v15, 0.0 }
 0x2df   : > { %v1563_v31 = vmul.f32 %v4810_v41, %v1402_v39  ;;  %v1597_v1 = vmul.f32 %v4797_v47, %v1370_v38  ;;  %v1368_v23 = vmul.f32 %v4298_v11, %v1352_v19  ;;  %v1400_v57 = vmul.f32 %v4304_v14, %v1384_v22 }
 0x2e0   : > { %v4957_v29 = vsel %vm1732_vm3, %v6360_v49, %v6358_v61  ;;  %v1456_v32 = vadd.f32 %v1442_v10, %v1424_v24  ;;  %v1543_v28 = vadd.f32 %v1527_v18, %v1507_v34  ;;  %v4967_v17 = vsel %vm1732_vm3, %v6363_v21, %v1717_v52  ;;  %v1316_v24 = vpop.f32.mrf.mxu1 }
 0x2e1   : > { %6361 = vst [vmem:[#allocation30_spill] sm:$0xff] %v4957_v29  ;;  %6364 = vst [vmem:[#allocation31_spill] sm:$0xff] %v4967_v17  ;;  %v1355_v15 = vrot.slane %v3711_v16, 7  ;;  %v1629_v44 = vadd.f32 %v1615_v26, %v1597_v1  ;;  %v1647_v61 = vmul.f32 %v4820_v5, %v1402_v39  ;;  %v1422_v49 = vmul.f32 %v4794_v37, %v1368_v23 }
 0x2e2   : > { %v1505_v38 = vmul.f32 %v4787_v56, %v1368_v23  ;;  %v4972_v50 = vadd.f32 %v1474_v20, %v1456_v32  ;;  %v4974_v19 = vadd.f32 %v1563_v31, %v1543_v28  ;;  %v1472_v10 = vmul.f32 %v4814_v0, %v1400_v57  ;;  %v6365_v23 = vld [vmem:[#allocation32_spill] sm:$0xff] }
 0x2e3   : > { %v1768_v54 = vpack.c.bf16 %v4967_v17, %v4957_v29  ;;  %v4979_v18 = vadd.f32 %v1647_v61, %v1629_v44  ;;  %v1454_v21 = vadd.f32 %v1440_v2, %v1422_v49  ;;  %v1561_v22 = vmul.f32 %v4810_v41, %v1400_v57 }
 0x2e4   : > { %v1371_v39 = vmul.f32 %v4298_v11, %v1355_v15  ;;  %v1541_v26 = vadd.f32 %v1525_v3, %v1505_v38  ;;  %v1387_v52 = vrot.slane %v3711_v16, 1  ;;  %v1443_v32 = vmul.f32 %v3711_v16, %v4800_v30 }
 0x2e5   : > { %3732 = vmatprep.mubr.bf16.mxu0 %v1768_v54  ;;  %v1528_v28 = vmul.f32 %v3711_v16, %v4791_v25  ;;  %v4985_v20 = vadd.f32 %v1472_v10, %v1454_v21  ;;  %v1616_v2 = vmul.f32 %v3711_v16, %v4804_v27  ;;  %v1718_v3 = vmax.f32 %v4881_v43, 0.0  ;;  %v6368_v43 = vld [vmem:[#allocation33_spill] sm:$0xff] }
 0x2e6   : > { %v1425_v34 = vmul.f32 %v4794_v37, %v1371_v39  ;;  %v1508_v44 = vmul.f32 %v4787_v56, %v1371_v39  ;;  %v1403_v31 = vmul.f32 %v4304_v14, %v1387_v52  ;;  %v1598_v1 = vmul.f32 %v4797_v47, %v1371_v39 }
 0x2e7   : > { %v6366_v57 = vmax.f32 %v6365_v23, 0.0  ;;  %v1353_v38 = vrot.slane %v1316_v24, 7  ;;  %v1385_v10 = vrot.slane %v1316_v24, 1  ;;  %v4999_v54 = vadd.f32 %v1561_v22, %v1541_v26 }
 0x2e8   : > { %v1457_v61 = vadd.f32 %v1443_v32, %v1425_v34  ;;  %v1544_v49 = vadd.f32 %v1528_v28, %v1508_v44  ;;  %v1475_v16 = vmul.f32 %v4814_v0, %v1403_v31  ;;  %v1564_v21 = vmul.f32 %v4810_v41, %v1403_v31  ;;  %v3714_v28 = vpop.f32.mrf.mxu1 }
 0x2e9   : > { %v4997_v15 = vsel %vm1732_vm3, %v6366_v57, %v1719_v59  ;;  %v1630_v52 = vadd.f32 %v1616_v2, %v1598_v1  ;;  %v1648_v39 = vmul.f32 %v4820_v5, %v1403_v31  ;;  %v6369_v29 = vmax.f32 %v6368_v43, 0.0 }
 0x2ea   : > { %6367 = vst [vmem:[#allocation32_spill] sm:$0xff] %v4997_v15  ;;  %v1369_v59 = vmul.f32 %v4298_v11, %v1353_v38  ;;  %v1401_v32 = vmul.f32 %v4304_v14, %v1385_v10  ;;  %v5012_v22 = vadd.f32 %v1475_v16, %v1457_v61  ;;  %v5014_v26 = vadd.f32 %v1564_v21, %v1544_v49 }
 0x2eb   : > { %v5008_v23 = vsel %vm1732_vm3, %v6369_v29, %v1718_v3  ;;  %v1441_v44 = vmul.f32 %v4800_v30, %v1316_v24  ;;  %v5019_v2 = vadd.f32 %v1648_v39, %v1630_v52  ;;  %v1526_v1 = vmul.f32 %v4791_v25, %v1316_v24  ;;  %v1329_v52 = vpop.f32.mrf.mxu1 }
 0x2ec   : > { %6370 = vst [vmem:[#allocation33_spill] sm:$0xff] %v5008_v23  ;;  %v1769_v34 = vpack.c.bf16 %v4997_v15, %v5008_v23  ;;  %v1423_v31 = vmul.f32 %v4794_v37, %v1369_v59  ;;  %v1506_v29 = vmul.f32 %v4787_v56, %v1369_v59  ;;  %v1473_v3 = vmul.f32 %v4814_v0, %v1401_v32 }
 0x2ed   : > { %v1562_v57 = vmul.f32 %v4810_v41, %v1401_v32  ;;  %v1596_v61 = vmul.f32 %v4797_v47, %v1369_v59  ;;  %v1614_v49 = vmul.f32 %v4804_v27, %v1316_v24  ;;  %v1358_v16 = vrot.slane %v3714_v28, 7  ;;  %v3715_v63 = vpop.f32.mrf.mxu1 }
 0x2ee   : > { %3733 = vmatmul.mubr.bf16.vlgmr.msra.gmra.mxu0 %v1769_v34  ;;  %v1455_v38 = vadd.f32 %v1441_v44, %v1423_v31  ;;  %v1542_v10 = vadd.f32 %v1526_v1, %v1506_v29  ;;  %v1390_v21 = vrot.slane %v3714_v28, 1  ;;  %v1646_v43 = vmul.f32 %v4820_v5, %v1401_v32 }
 0x2ef   : > { %v1628_v39 = vadd.f32 %v1614_v49, %v1596_v61  ;;  %v1446_v23 = vmul.f32 %v3714_v28, %v4800_v30  ;;  %v1531_v34 = vmul.f32 %v3714_v28, %v4791_v25  ;;  %v1374_v17 = vmul.f32 %v4298_v11, %v1358_v16 }
 0x2f0   : > { %v5031_v15 = vadd.f32 %v1473_v3, %v1455_v38  ;;  %v1406_v59 = vmul.f32 %v4304_v14, %v1390_v21  ;;  %v1619_v24 = vmul.f32 %v3714_v28, %v4804_v27  ;;  %v5036_v44 = vadd.f32 %v1562_v57, %v1542_v10 }
 0x2f1   : > { %v5038_v31 = vadd.f32 %v1646_v43, %v1628_v39  ;;  %v1356_v29 = vrot.slane %v1329_v52, 7  ;;  %v1388_v1 = vrot.slane %v1329_v52, 1  ;;  %v1428_v32 = vmul.f32 %v4794_v37, %v1374_v17 }
 0x2f2   : > { %v1478_v61 = vmul.f32 %v4814_v0, %v1406_v59  ;;  %v1511_v49 = vmul.f32 %v4787_v56, %v1374_v17  ;;  %v1444_v3 = vmul.f32 %v4800_v30, %v1329_v52  ;;  %v1567_v38 = vmul.f32 %v4810_v41, %v1406_v59 }
 0x2f3   : > { %v1601_v16 = vmul.f32 %v4797_v47, %v1374_v17  ;;  %v1372_v28 = vmul.f32 %v4298_v11, %v1356_v29  ;;  %v1404_v57 = vmul.f32 %v4304_v14, %v1388_v1  ;;  %v1460_v10 = vadd.f32 %v1446_v23, %v1428_v32 }
 0x2f4   : > { %v1547_v21 = vadd.f32 %v1531_v34, %v1511_v49  ;;  %v1651_v39 = vmul.f32 %v4820_v5, %v1406_v59  ;;  %v1529_v43 = vmul.f32 %v4791_v25, %v1329_v52  ;;  %v1617_v51 = vmul.f32 %v4804_v27, %v1329_v52 }
 0x2f5   : > { %v1633_v9 = vadd.f32 %v1619_v24, %v1601_v16  ;;  %v1426_v58 = vmul.f32 %v4794_v37, %v1372_v28  ;;  %v1509_v46 = vmul.f32 %v4787_v56, %v1372_v28  ;;  %v1492_v33 = vadd.f32 %v1478_v61, %v1460_v10 }
 0x2f6   : > { %v5053_v17 = vadd.f32 %v1567_v38, %v1547_v21  ;;  %v1476_v29 = vmul.f32 %v4814_v0, %v1404_v57  ;;  %v1599_v23 = vmul.f32 %v4797_v47, %v1372_v28  ;;  %v1565_v24 = vmul.f32 %v4810_v41, %v1404_v57  ;;  %v1332_v21 = vpop.f32.mrf.mxu1 }
 0x2f7   : > { %v5057_v34 = vadd.f32 %v1651_v39, %v1633_v9  ;;  %v1458_v59 = vadd.f32 %v1444_v3, %v1426_v58  ;;  %v1545_v1 = vadd.f32 %v1529_v43, %v1509_v46  ;;  %v1649_v32 = vmul.f32 %v4820_v5, %v1404_v57 }
 0x2f8   : > { %v1672_v49 = vadd.f32 %v4920_v40, %v4861_v4  ;;  %v1673_v52 = vadd.f32 %v4936_v45, %v4904_v12  ;;  %v1359_v61 = vrot.slane %v3715_v63, 7  ;;  %v1631_v28 = vadd.f32 %v1617_v51, %v1599_v23 }
 0x2f9   : > { %v5065_v38 = vadd.f32 %v1476_v29, %v1458_v59  ;;  %v5067_v16 = vadd.f32 %v1565_v24, %v1545_v1  ;;  %v1391_v9 = vrot.slane %v3715_v63, 1  ;;  %v1532_v57 = vmul.f32 %v3715_v63, %v4791_v25 }
 0x2fa   : > { %v1684_v58 = vadd.f32 %v1672_v49, %v4938_v8  ;;  %v1685_v46 = vadd.f32 %v1673_v52, %v4898_v48  ;;  %v1375_v3 = vmul.f32 %v4298_v11, %v1359_v61  ;;  %v1620_v40 = vmul.f32 %v3715_v63, %v4804_v27 }
 0x2fb   : > { %v1407_v4 = vmul.f32 %v4304_v14, %v1391_v9  ;;  %v1674_v12 = vadd.f32 %v4894_v42, %v4934_v55  ;;  %v1707_v45 = vadd.f32 %v4859_v60, %v4932_v35  ;;  %v1663_v39 = vadd.f32 %v1649_v32, %v1631_v28 }
 0x2fc   : > { %v1704_v51 = vadd.f32 %v4859_v60, %v1684_v58  ;;  %v1705_v8 = vadd.f32 %v4859_v60, %v1685_v46  ;;  %v1512_v48 = vmul.f32 %v4787_v56, %v1375_v3  ;;  %v1602_v10 = vmul.f32 %v4797_v47, %v1375_v3 }
 0x2fd   : > { %v1568_v43 = vmul.f32 %v4810_v41, %v1407_v4  ;;  %v1686_v63 = vadd.f32 %v1674_v12, %v4926_v53  ;;  %v1723_v29 = vmax.f32 %v1707_v45, 0.0  ;;  %v1652_v35 = vmul.f32 %v4820_v5, %v1407_v4 }
 0x2fe   : > { %v1720_v23 = vmax.f32 %v1704_v51, 0.0  ;;  %v1721_v42 = vmax.f32 %v1705_v8, 0.0  ;;  %v1548_v55 = vadd.f32 %v1532_v57, %v1512_v48  ;;  %v1634_v59 = vadd.f32 %v1620_v40, %v1602_v10 }
 0x2ff   : > { %v1706_v1 = vadd.f32 %v4859_v60, %v1686_v63  ;;  %v1357_v24 = vrot.slane %v1332_v21, 7  ;;  %v1389_v49 = vrot.slane %v1332_v21, 1  ;;  %v6371_v52 = vmax.f32 %v4624_v6, 0.0 }
 0x300   : > { %v6372_v61 = vmax.f32 %v4627_v13, 0.0  ;;  %v1584_v28 = vadd.f32 %v1568_v43, %v1548_v55  ;;  %v6373_v9 = vmax.f32 %v4638_v36, 0.0  ;;  %v1666_v13 = vadd.f32 %v1652_v35, %v1634_v59 }
 0x301   : > { %v5091_v32 = vsel %vm1732_vm3, %v6371_v52, %v1720_v23  ;;  %v1722_v46 = vmax.f32 %v1706_v1, 0.0  ;;  %v1373_v3 = vmul.f32 %v4298_v11, %v1357_v24  ;;  %v1405_v57 = vmul.f32 %v4304_v14, %v1389_v49  ;;  %v6375_v1 = vld [vmem:[#allocation37_spill] sm:$0xff] }
 0x302   : > { %v5097_v53 = vsel %vm1732_vm3, %v6372_v61, %v1721_v42  ;;  %v5103_v58 = vsel %vm1732_vm3, %v6373_v9, %v1723_v29  ;;  %v1694_v4 = vadd.f32 %v1584_v28, %v1492_v33  ;;  %v1445_v40 = vmul.f32 %v4800_v30, %v1332_v21  ;;  %v6380_v9 = vld [vmem:[#allocation39_spill] sm:$0xff] }
 0x303   : > { %v1770_v6 = vpack.c.bf16 %v5097_v53, %v5091_v32  ;;  %v1530_v12 = vmul.f32 %v4791_v25, %v1332_v21  ;;  %v6374_v36 = vmax.f32 %v4658_v62, 0.0  ;;  %v1427_v51 = vmul.f32 %v4794_v37, %v1373_v3 }
 0x304   : > { %v1510_v8 = vmul.f32 %v4787_v56, %v1373_v3  ;;  %v1618_v48 = vmul.f32 %v4804_v27, %v1332_v21  ;;  %v1477_v30 = vmul.f32 %v4814_v0, %v1405_v57  ;;  %v1566_v25 = vmul.f32 %v4810_v41, %v1405_v57 }
 0x305   : > { %3736 = vmatprep.mubr.bf16.mxu0 %v1770_v6  ;;  %v5115_v45 = vsel %vm1732_vm3, %v6374_v36, %v1722_v46  ;;  %v1600_v10 = vmul.f32 %v4797_v47, %v1373_v3  ;;  %v1459_v62 = vadd.f32 %v1445_v40, %v1427_v51  ;;  %v1668_v63 = vadd.f32 %v5038_v31, %v4999_v54  ;;  %v6383_v3 = vld [vmem:[#allocation40_spill] sm:$0xff] }
 0x306   : > { %v1771_v33 = vpack.c.bf16 %v5103_v58, %v5115_v45  ;;  %v1546_v43 = vadd.f32 %v1530_v12, %v1510_v8  ;;  %v1675_v37 = vadd.f32 %v5036_v44, %v4985_v20  ;;  %v1650_v27 = vmul.f32 %v4820_v5, %v1405_v57  ;;  %v6386_v36 = vld [vmem:[#allocation36_spill] sm:$0xff] }
 0x307   : > { %v1632_v56 = vadd.f32 %v1618_v48, %v1600_v10  ;;  %v1676_v21 = vadd.f32 %v4974_v19, %v5031_v15  ;;  %v1677_v41 = vadd.f32 %v5014_v26, %v4972_v50  ;;  %v1491_v0 = vadd.f32 %v1477_v30, %v1459_v62  ;;  %v6389_v48 = vld [vmem:[#allocation34_spill] sm:$0xff]  ;;  %v6392_v62 = vld [vmem:[#allocation41_spill] sm:$0xff] }
 0x308   : > { %3737 = vmatmul.mubr.bf16.gmra.mxu0 %v1771_v33  ;;  %v1582_v47 = vadd.f32 %v1566_v25, %v1546_v43  ;;  %v1687_v29 = vadd.f32 %v1675_v37, %v4979_v18  ;;  %v1708_v23 = vadd.f32 %v4859_v60, %v1668_v63  ;;  %v1678_v44 = vadd.f32 %v5067_v16, %v5012_v22  ;;  %v6395_v37 = vld [vmem:[#allocation35_spill] sm:$0xff] }
 0x309   : > { %v1664_v54 = vadd.f32 %v1650_v27, %v1632_v56  ;;  %v1688_v31 = vadd.f32 %v1676_v21, %v5019_v2  ;;  %v1689_v20 = vadd.f32 %v1677_v41, %v1663_v39  ;;  %v1680_v50 = vadd.f32 %v5053_v17, %v1491_v0  ;;  %v3926_v41 = vld [vmem:[%s6221_s4 + $0xb0] sm:$0xff]   ;;  %v3927_v0 = vld [vmem:[%s6221_s4 + $0xa8] sm:$0xff]  }
 0x30a   : > { %v1709_v5 = vadd.f32 %v4859_v60, %v1687_v29  ;;  %v1724_v42 = vmax.f32 %v1708_v23, 0.0  ;;  %v1679_v19 = vadd.f32 %v1582_v47, %v5065_v38  ;;  %v1715_v16 = vadd.f32 %v4859_v60, %v1694_v4  ;;  %v6377_v38 = vld [vmem:[#allocation38_spill] sm:$0xff]  ;;  %3750 = vmatprep.subr.bf16.mxu1 %v3926_v41  ;;  %v3928_v47 = vld [vmem:[%s6221_s4 + $0xa0] sm:$0xff]   ;;  %v3929_v29 = vld [vmem:[%s6221_s4 + $0x98] sm:$0xff]  }
 0x30b   : > { %v1710_v15 = vadd.f32 %v4859_v60, %v1688_v31  ;;  %v1711_v18 = vadd.f32 %v4859_v60, %v1689_v20  ;;  %v1690_v26 = vadd.f32 %v1678_v44, %v1664_v54  ;;  %v1692_v2 = vadd.f32 %v1680_v50, %v1666_v13  ;;  %3751 = vmatpush3.bf16.msra.mxu1 %v3926_v41  ;;  %v3930_v23 = vld [vmem:[%s6221_s4 + $0x90] sm:$0xff]   ;;  %v3931_v54 = vld [vmem:[%s6221_s4 + $0x88] sm:$0xff]   ;;  %v3932_v31 = vld [vmem:[%s6221_s4 + $0x80] sm:$0xff]  }
 0x30c   : > { %v1725_v55 = vmax.f32 %v1709_v5, 0.0  ;;  %v1691_v59 = vadd.f32 %v1679_v19, %v5057_v34  ;;  %v6376_v24 = vmax.f32 %v6375_v1, 0.0  ;;  %v6378_v49 = vmax.f32 %v6377_v38, 0.0  ;;  %3752 = vmatprep.subr.bf16.mxu1 %v3927_v0  ;;  %v6399_v19 = vld [vmem:[#allocation24_spill] sm:$0xff] }
 0x30d   : > { %v1726_v39 = vmax.f32 %v1710_v15, 0.0  ;;  %v1727_v35 = vmax.f32 %v1711_v18, 0.0  ;;  %v1712_v22 = vadd.f32 %v4859_v60, %v1690_v26  ;;  %v1714_v61 = vadd.f32 %v4859_v60, %v1692_v2 }
 0x30e   : > { %v5151_v17 = vsel %vm1732_vm3, %v6376_v24, %v1724_v42  ;;  %v5157_v52 = vsel %vm1732_vm3, %v6378_v49, %v1725_v55  ;;  %v1713_v34 = vadd.f32 %v4859_v60, %v1691_v59  ;;  %v6381_v6 = vmax.f32 %v6380_v9, 0.0  ;;  %v3518_v42 = vld [vmem:[%s6222_s5 + $0x20] sm:$0xff]  ;;  %v6400_v55 = vld [vmem:[#allocation23_spill] sm:$0xff]  ;;  %v6403_v49 = vld [vmem:[#allocation6_spill] sm:$0xff] }
 0x30f   : > { %6379 = vst [vmem:[#allocation37_spill] sm:$0xff] %v5157_v52  ;;  %v1772_v28 = vpack.c.bf16 %v5157_v52, %v5151_v17  ;;  %v6384_v57 = vmax.f32 %v6383_v3, 0.0  ;;  %v1728_v4 = vmax.f32 %v1712_v22, 0.0  ;;  %v1730_v12 = vmax.f32 %v1714_v61, 0.0  ;;  %3753 = vmatpush3.bf16.msra.mxu1 %v3927_v0  ;;  %v6404_v61 = vld [vmem:[#allocation26_spill] sm:$0xff] }
 0x310   : > { %v5167_v46 = vsel %vm1732_vm3, %v6381_v6, %v1726_v39  ;;  %v1729_v60 = vmax.f32 %v1713_v34, 0.0  ;;  %v6387_v51 = vmax.f32 %v6386_v36, 0.0  ;;  %v6390_v33 = vmax.f32 %v6389_v48, 0.0  ;;  %3754 = vmatprep.subr.bf16.mxu1 %v3928_v47 }
 0x311   : > { %6382 = vst [vmem:[#allocation38_spill] sm:$0xff] %v5167_v46  ;;  %v5173_v13 = vsel %vm1732_vm3, %v6384_v57, %v1727_v35  ;;  %3740 = vmatprep.mubr.bf16.mxu0 %v1772_v28  ;;  %v1731_v10 = vmax.f32 %v1715_v16, 0.0  ;;  %v6393_v43 = vmax.f32 %v6392_v62, 0.0  ;;  %v6396_v56 = vmax.f32 %v6395_v37, 0.0  ;;  %v6401_v35 = vld [vmem:[#allocation27_spill] sm:$0xff]  ;;  %v6402_v16 = vld [vmem:[#allocation28_spill] sm:$0xff] }
 0x312   : > { %6385 = vst [vmem:[#allocation39_spill] sm:$0xff] %v5173_v13  ;;  %v1773_v40 = vpack.c.bf16 %v5173_v13, %v5167_v46  ;;  %v5181_v8 = vsel %vm1732_vm3, %v6387_v51, %v1728_v4  ;;  %v5187_v30 = vsel %vm1732_vm3, %v6390_v33, %v1729_v60  ;;  %v6398_v20 = vmov 0.0   ;;  %v6405_v57 = vld [vmem:[#allocation29_spill] sm:$0xff] }
 0x313   : > { %6388 = vst [vmem:[#allocation40_spill] sm:$0xff] %v5181_v8  ;;  %6391 = vst [vmem:[#allocation36_spill] sm:$0xff] %v5187_v30  ;;  %v1774_v25 = vpack.c.bf16 %v5187_v30, %v5181_v8  ;;  %v5195_v63 = vsel %vm1732_vm3, %v6393_v43, %v1730_v12  ;;  %v5201_v27 = vsel %vm1732_vm3, %v6396_v56, %v1731_v10  ;;  %3755 = vmatpush3.bf16.msra.mxu1 %v3928_v47  ;;  %v6406_v12 = vld [vmem:[#allocation25_spill] sm:$0xff] }
 0x314   : > { %3741 = vmatmul.mubr.bf16.gmra.mxu0 %v1773_v40  ;;  %6394 = vst [vmem:[#allocation34_spill] sm:$0xff] %v5195_v63  ;;  %6397 = vst [vmem:[#allocation41_spill] sm:$0xff] %v5201_v27  ;;  %v1775_v21 = vpack.c.bf16 %v5201_v27, %v5195_v63  ;;  %3756 = vmatprep.subr.bf16.mxu1 %v3929_v29  ;;  %v5231_v50 = vrot.slane %v3518_v42, %v6399_v19 }
 0x315   : > { %3744 = vmatprep.mubr.bf16.mxu0 %v1774_v25  ;;  %v5235_v59 = vrot.slane %v3518_v42, %v6400_v55  ;;  %v5238_v22 = vrot.slane %v3518_v42, %v6401_v35  ;;  %v5241_v1 = vrot.slane %v3518_v42, %v6402_v16  ;;  %v5245_v34 = vrot.slane %v3518_v42, %v6403_v49 }
 0x316   : > { %v5248_v28 = vrot.slane %v3518_v42, %v6404_v61  ;;  %v5253_v4 = vrot.slane %v3518_v42, %v6405_v57  ;;  %v5258_v36 = vrot.slane %v3518_v42, %v6406_v12 }
 0x317   : > { %3757 = vmatpush3.bf16.msra.mxu1 %v3929_v29 }
 0x318   : > { %3758 = vmatprep.subr.bf16.mxu1 %v3930_v23 }
 0x31b   : > { %3759 = vmatpush3.bf16.msra.mxu1 %v3930_v23 }
 0x31c   : > { %3745 = vmatmul.mubr.bf16.gmra.mxu0 %v1775_v21  ;;  %3760 = vmatprep.subr.bf16.mxu1 %v3931_v54 }
 0x31f   : > { %3761 = vmatpush3.bf16.msra.mxu1 %v3931_v54 }
 0x320   : > { %3762 = vmatprep.subr.bf16.mxu1 %v3932_v31 }
 0x323   : > { %3763 = vmatpush3.bf16.msra.mxu1 %v3932_v31 }
 0x324   : > { %3780 = vmatprep.subr.mxu1 %v6398_v20 }
 0x3ae   : > { %v3734_v44 = vpop.f32.mrf.mxu0 }
 0x3af   : > { %v1923_v5 = vrot.slane %v3734_v44, 7  ;;  %v1955_v26 = vrot.slane %v3734_v44, 1  ;;  %v2096_v3 = vmul.f32 %v3734_v44, %v5235_v59  ;;  %v2012_v10 = vmul.f32 %v3734_v44, %v5245_v34 }
 0x3b0   : > { %v1858_v15 = vpop.f32.mrf.mxu0  ;;  %v2185_v62 = vmul.f32 %v3734_v44, %v5248_v28 }
 0x3b1   : > { %v1939_v18 = vmul.f32 %v4298_v11, %v1923_v5  ;;  %v1921_v2 = vrot.slane %v1858_v15, 7  ;;  %v1953_v38 = vrot.slane %v1858_v15, 1  ;;  %v1971_v6 = vmul.f32 %v4304_v14, %v1955_v26 }
 0x3b2   : > { %v3735_v39 = vpop.f32.mrf.mxu0  ;;  %v2010_v43 = vmul.f32 %v5245_v34, %v1858_v15  ;;  %v2094_v47 = vmul.f32 %v5235_v59, %v1858_v15 }
 0x3b3   : > { %v2076_v24 = vmul.f32 %v5231_v50, %v1939_v18  ;;  %v1924_v9 = vrot.slane %v3735_v39, 7  ;;  %v1937_v40 = vmul.f32 %v4298_v11, %v1921_v2  ;;  %v1994_v60 = vmul.f32 %v5238_v22, %v1939_v18 }
 0x3b4   : > { %v2167_v51 = vmul.f32 %v5241_v1, %v1939_v18  ;;  %v1969_v25 = vmul.f32 %v4304_v14, %v1953_v38  ;;  %v1956_v37 = vrot.slane %v3735_v39, 1  ;;  %v1861_v56 = vpop.f32.mrf.mxu0  ;;  %v2132_v21 = vmul.f32 %v5253_v4, %v1971_v6 }
 0x3b5   : > { %v1940_v48 = vmul.f32 %v4298_v11, %v1924_v9  ;;  %v2112_v33 = vadd.f32 %v2096_v3, %v2076_v24  ;;  %v1992_v41 = vmul.f32 %v5238_v22, %v1937_v40  ;;  %v2074_v0 = vmul.f32 %v5231_v50, %v1937_v40 }
 0x3b6   : > { %v2026_v29 = vadd.f32 %v2012_v10, %v1994_v60  ;;  %v2044_v23 = vmul.f32 %v5258_v36, %v1971_v6  ;;  %v2199_v54 = vadd.f32 %v2185_v62, %v2167_v51  ;;  %v2042_v44 = vmul.f32 %v5258_v36, %v1969_v25 }
 0x3b7   : > { %v2077_v31 = vmul.f32 %v5231_v50, %v1940_v48  ;;  %v2148_v5 = vadd.f32 %v2132_v21, %v2112_v33  ;;  %v1922_v42 = vrot.slane %v1861_v56, 7  ;;  %v1954_v18 = vrot.slane %v1861_v56, 1 }
 0x3b8   : > { %v2130_v26 = vmul.f32 %v5253_v4, %v1969_v25  ;;  %v1972_v2 = vmul.f32 %v4304_v14, %v1956_v37  ;;  %v2097_v24 = vmul.f32 %v3735_v39, %v5235_v59  ;;  %v2168_v38 = vmul.f32 %v5241_v1, %v1940_v48 }
 0x3b9   : > { %v2024_v15 = vadd.f32 %v2010_v43, %v1992_v41  ;;  %v2110_v9 = vadd.f32 %v2094_v47, %v2074_v0  ;;  %v1938_v3 = vmul.f32 %v4298_v11, %v1922_v42  ;;  %v1970_v40 = vmul.f32 %v4304_v14, %v1954_v18  ;;  %v5292_v47 = vld [vmem:[%s6222_s5 + $0x28] ss:$0 sm:$0xff] }
 0x3ba   : > { %v1995_v60 = vmul.f32 %v5238_v22, %v1940_v48  ;;  %v2013_v51 = vmul.f32 %v3735_v39, %v5245_v34  ;;  %v2113_v33 = vadd.f32 %v2097_v24, %v2077_v31  ;;  %v2186_v10 = vmul.f32 %v3735_v39, %v5248_v28 }
 0x3bb   : > { %v1993_v25 = vmul.f32 %v5238_v22, %v1938_v3  ;;  %v2011_v62 = vmul.f32 %v5245_v34, %v1861_v56  ;;  %v2075_v37 = vmul.f32 %v5231_v50, %v1938_v3  ;;  %v2095_v43 = vmul.f32 %v5235_v59, %v1861_v56 }
 0x3bc   : > { %v2133_v21 = vmul.f32 %v5253_v4, %v1972_v2  ;;  %v2200_v41 = vadd.f32 %v2186_v10, %v2168_v38  ;;  %v2166_v0 = vmul.f32 %v5241_v1, %v1938_v3  ;;  %v2184_v48 = vmul.f32 %v5248_v28, %v1861_v56 }
 0x3bd   : > { %v2025_v39 = vadd.f32 %v2011_v62, %v1993_v25  ;;  %v2043_v31 = vmul.f32 %v5258_v36, %v1970_v40  ;;  %v2111_v42 = vadd.f32 %v2095_v43, %v2075_v37  ;;  %v2131_v18 = vmul.f32 %v5253_v4, %v1970_v40 }
 0x3be   : > { %v2056_v24 = vadd.f32 %v2042_v44, %v2024_v15  ;;  %v2027_v12 = vadd.f32 %v2013_v51, %v1995_v60  ;;  %v2198_v57 = vadd.f32 %v2184_v48, %v2166_v0  ;;  %v2216_v38 = vmul.f32 %v5292_v47, %v1970_v40 }
 0x3bf   : > { %v2149_v10 = vadd.f32 %v2133_v21, %v2113_v33  ;;  %v2218_v3 = vmul.f32 %v5292_v47, %v1972_v2  ;;  %v2057_v56 = vadd.f32 %v2043_v31, %v2025_v39  ;;  %v2147_v35 = vadd.f32 %v2131_v18, %v2111_v42 }
 0x3c0   : > { %v2217_v61 = vmul.f32 %v5292_v47, %v1971_v6  ;;  %v2146_v49 = vadd.f32 %v2130_v26, %v2110_v9  ;;  %v2045_v25 = vmul.f32 %v5258_v36, %v1972_v2  ;;  %v2230_v62 = vadd.f32 %v2216_v38, %v2198_v57  ;;  %v5307_v6 = vld [vmem:[%s6223_s6 + $0x2] ss:$0 sm:$0xff] }
 0x3c1   : > { %v2058_v16 = vadd.f32 %v2044_v23, %v2026_v29  ;;  %v2232_v37 = vadd.f32 %v2218_v3, %v2200_v41  ;;  %v2247_v43 = vadd.f32 %v2148_v5, %v2057_v56  ;;  %v2246_v55 = vadd.f32 %v2147_v35, %v2056_v24 }
 0x3c2   : > { %v2231_v44 = vadd.f32 %v2217_v61, %v2199_v54  ;;  %v5300_v15 = vadd.f32 %v2045_v25, %v2027_v12  ;;  %v2244_v40 = vadd.f32 %v2230_v62, %v2146_v49 }
 0x3c3   : > { %v2248_v51 = vadd.f32 %v2149_v10, %v2058_v16  ;;  %v5302_v33 = vadd.f32 %v2247_v43, %v2232_v37 }
 0x3c4   : > { %v2258_v12 = vadd.f32 %v2246_v55, %v2231_v44  ;;  %v5318_v41 = vadd.f32 %v5307_v6, %v2244_v40 }
 0x3c6   : > { %v5324_v31 = vadd.f32 %v5307_v6, %v2258_v12 }
 0x3c8   : > { %v3738_v60 = vpop.f32.mrf.mxu0 }
 0x3c9   : > { %v1927_v21 = vrot.slane %v3738_v60, 7  ;;  %v1959_v0 = vrot.slane %v3738_v60, 1  ;;  %v2016_v57 = vmul.f32 %v3738_v60, %v5245_v34  ;;  %v2100_v29 = vmul.f32 %v3738_v60, %v5235_v59 }
 0x3ca   : > { %v2189_v35 = vmul.f32 %v3738_v60, %v5248_v28  ;;  %v1874_v61 = vpop.f32.mrf.mxu0 }
 0x3cb   : > { %v1943_v49 = vmul.f32 %v4298_v11, %v1927_v21  ;;  %v1975_v16 = vmul.f32 %v4304_v14, %v1959_v0  ;;  %v1925_v23 = vrot.slane %v1874_v61, 7  ;;  %v1957_v54 = vrot.slane %v1874_v61, 1 }
 0x3cc   : > { %v2014_v5 = vmul.f32 %v5245_v34, %v1874_v61  ;;  %v2098_v26 = vmul.f32 %v5235_v59, %v1874_v61  ;;  %v2187_v2 = vmul.f32 %v5248_v28, %v1874_v61  ;;  %v3739_v9 = vpop.f32.mrf.mxu0 }
 0x3cd   : > { %v1998_v48 = vmul.f32 %v5238_v22, %v1943_v49  ;;  %v2048_v55 = vmul.f32 %v5258_v36, %v1975_v16  ;;  %v2080_v39 = vmul.f32 %v5231_v50, %v1943_v49  ;;  %v2136_v42 = vmul.f32 %v5253_v4, %v1975_v16 }
 0x3ce   : > { %v2171_v18 = vmul.f32 %v5241_v1, %v1943_v49  ;;  %v1941_v24 = vmul.f32 %v4298_v11, %v1925_v23  ;;  %v1973_v38 = vmul.f32 %v4304_v14, %v1957_v54  ;;  %v1928_v56 = vrot.slane %v3739_v9, 7  ;;  %v1877_v61 = vpop.f32.mrf.mxu0 }
 0x3cf   : > { %v2030_v10 = vadd.f32 %v2016_v57, %v1998_v48  ;;  %v2116_v3 = vadd.f32 %v2100_v29, %v2080_v39  ;;  %v1960_v25 = vrot.slane %v3739_v9, 1  ;;  %v2221_v37 = vmul.f32 %v5292_v47, %v1975_v16 }
 0x3d0   : > { %v2203_v62 = vadd.f32 %v2189_v35, %v2171_v18  ;;  %v1996_v43 = vmul.f32 %v5238_v22, %v1941_v24  ;;  %v2078_v44 = vmul.f32 %v5231_v50, %v1941_v24  ;;  %v2046_v21 = vmul.f32 %v5258_v36, %v1973_v38 }
 0x3d1   : > { %v2062_v60 = vadd.f32 %v2048_v55, %v2030_v10  ;;  %v5333_v40 = vadd.f32 %v2136_v42, %v2116_v3  ;;  %v2169_v0 = vmul.f32 %v5241_v1, %v1941_v24  ;;  %v2134_v35 = vmul.f32 %v5253_v4, %v1973_v38 }
 0x3d2   : > { %v5337_v12 = vadd.f32 %v2221_v37, %v2203_v62  ;;  %v2028_v57 = vadd.f32 %v2014_v5, %v1996_v43  ;;  %v2114_v29 = vadd.f32 %v2098_v26, %v2078_v44  ;;  %v2219_v16 = vmul.f32 %v5292_v47, %v1973_v38 }
 0x3d3   : > { %v2201_v49 = vadd.f32 %v2187_v2, %v2169_v0  ;;  %v1944_v23 = vmul.f32 %v4298_v11, %v1928_v56  ;;  %v1976_v54 = vmul.f32 %v4304_v14, %v1960_v25  ;;  %v2101_v55 = vmul.f32 %v3739_v9, %v5235_v59 }
 0x3d4   : > { %v5343_v48 = vadd.f32 %v2046_v21, %v2028_v57  ;;  %v2190_v39 = vmul.f32 %v3739_v9, %v5248_v28  ;;  %v1926_v42 = vrot.slane %v1877_v61, 7  ;;  %v1958_v10 = vrot.slane %v1877_v61, 1  ;;  %v3742_v37 = vpop.f32.mrf.mxu0 }
 0x3d5   : > { %v2233_v18 = vadd.f32 %v2219_v16, %v2201_v49  ;;  %v2081_v5 = vmul.f32 %v5231_v50, %v1944_v23  ;;  %v2137_v26 = vmul.f32 %v5253_v4, %v1976_v54  ;;  %v2172_v2 = vmul.f32 %v5241_v1, %v1944_v23 }
 0x3d6   : > { %v2222_v24 = vmul.f32 %v5292_v47, %v1976_v54  ;;  %v1942_v38 = vmul.f32 %v4298_v11, %v1926_v42  ;;  %v2015_v3 = vmul.f32 %v5245_v34, %v1877_v61  ;;  %v2099_v9 = vmul.f32 %v5235_v59, %v1877_v61 }
 0x3d7   : > { %v2260_v56 = vadd.f32 %v2248_v51, %v2233_v18  ;;  %v2117_v25 = vadd.f32 %v2101_v55, %v2081_v5  ;;  %v2204_v62 = vadd.f32 %v2190_v39, %v2172_v2  ;;  %v1974_v43 = vmul.f32 %v4304_v14, %v1958_v10 }
 0x3d8   : > { %v1997_v44 = vmul.f32 %v5238_v22, %v1942_v38  ;;  %v2079_v21 = vmul.f32 %v5231_v50, %v1942_v38  ;;  %v2170_v0 = vmul.f32 %v5241_v1, %v1942_v38  ;;  %v5359_v57 = vadd.f32 %v2134_v35, %v2114_v29  ;;  %v1890_v35 = vpop.f32.mrf.mxu0 }
 0x3d9   : > { %v5362_v49 = vadd.f32 %v5307_v6, %v2260_v56  ;;  %v2153_v51 = vadd.f32 %v2137_v26, %v2117_v25  ;;  %v2188_v16 = vmul.f32 %v5248_v28, %v1877_v61  ;;  %v5365_v23 = vadd.f32 %v2222_v24, %v2204_v62 }
 0x3da   : > { %v2029_v54 = vadd.f32 %v2015_v3, %v1997_v44  ;;  %v2047_v55 = vmul.f32 %v5258_v36, %v1974_v43  ;;  %v2115_v39 = vadd.f32 %v2099_v9, %v2079_v21  ;;  %v2135_v18 = vmul.f32 %v5253_v4, %v1974_v43 }
 0x3db   : > { %v2296_v42 = vmax.f32 %v5362_v49, 0.0  ;;  %v2202_v5 = vadd.f32 %v2188_v16, %v2170_v0  ;;  %v2220_v29 = vmul.f32 %v5292_v47, %v1974_v43  ;;  %v5371_v2 = vadd.f32 %v2153_v51, %v2062_v60 }
 0x3dc   : > { %v5373_v38 = vadd.f32 %v2047_v55, %v2029_v54  ;;  %v1931_v26 = vrot.slane %v3742_v37, 7  ;;  %v1963_v61 = vrot.slane %v3742_v37, 1  ;;  %v5375_v24 = vadd.f32 %v2135_v18, %v2115_v39 }
 0x3dd   : > { %v5377_v10 = vadd.f32 %v2220_v29, %v2202_v5  ;;  %v2019_v3 = vmul.f32 %v3742_v37, %v5245_v34  ;;  %v2104_v56 = vmul.f32 %v3742_v37, %v5235_v59  ;;  %v1929_v9 = vrot.slane %v1890_v35, 7  ;;  %v3743_v5 = vpop.f32.mrf.mxu0 }
 0x3de   : > { %v1947_v25 = vmul.f32 %v4298_v11, %v1931_v26  ;;  %v1979_v62 = vmul.f32 %v4304_v14, %v1963_v61  ;;  %v1961_v43 = vrot.slane %v1890_v35, 1  ;;  %v2192_v60 = vmul.f32 %v3742_v37, %v5248_v28  ;;  %v6407_v26 = vld [vmem:[#allocation31_spill] sm:$0xff] }
 0x3df   : > { %v2017_v44 = vmul.f32 %v5245_v34, %v1890_v35  ;;  %v2293_v21 = vmax.f32 %v5318_v41, 0.0  ;;  %v2294_v0 = vmax.f32 %v5324_v31, 0.0  ;;  %v2102_v54 = vmul.f32 %v5235_v59, %v1890_v35 }
 0x3e0   : > { %v2001_v49 = vmul.f32 %v5238_v22, %v1947_v25  ;;  %v2051_v51 = vmul.f32 %v5258_v36, %v1979_v62  ;;  %v2084_v16 = vmul.f32 %v5231_v50, %v1947_v25  ;;  %v2140_v55 = vmul.f32 %v5253_v4, %v1979_v62 }
 0x3e1   : > { %v2174_v39 = vmul.f32 %v5241_v1, %v1947_v25  ;;  %v1945_v37 = vmul.f32 %v4298_v11, %v1929_v9  ;;  %v1977_v18 = vmul.f32 %v4304_v14, %v1961_v43  ;;  %v2224_v31 = vmul.f32 %v5292_v47, %v1979_v62  ;;  %v6409_v25 = vld [vmem:[#allocation30_spill] sm:$0xff] }
 0x3e2   : > { %v2033_v41 = vadd.f32 %v2019_v3, %v2001_v49  ;;  %v2120_v29 = vadd.f32 %v2104_v56, %v2084_v16  ;;  %v5399_v61 = vsel %vm2309_vm4, %v6407_v26, %v2294_v0  ;;  %v5406_v9 = vsel %vm2309_vm4, %v6409_v25, %v2293_v21 }
 0x3e3   : > { %6408 = vst [vmem:[#allocation35_spill] sm:$0xff] %v5399_v61  ;;  %v2206_v19 = vadd.f32 %v2192_v60, %v2174_v39  ;;  %v1999_v35 = vmul.f32 %v5238_v22, %v1945_v37  ;;  %v2082_v20 = vmul.f32 %v5231_v50, %v1945_v37  ;;  %6410 = vst [vmem:[#allocation31_spill] sm:$0xff] %v5406_v9  ;;  %v1932_v16 = vrot.slane %v3743_v5, 7  ;;  %v1893_v39 = vpop.f32.mrf.mxu0 }
 0x3e4   : > { %v5408_v43 = vadd.f32 %v2051_v51, %v2033_v41  ;;  %v5410_v3 = vadd.f32 %v2140_v55, %v2120_v29  ;;  %v2049_v56 = vmul.f32 %v5258_v36, %v1977_v18  ;;  %v2345_v62 = vpack.c.bf16 %v5399_v61, %v5406_v9  ;;  %v6413_v9 = vld [vmem:[#allocation33_spill] sm:$0xff] }
 0x3e5   : > { %v5415_v0 = vadd.f32 %v2224_v31, %v2206_v19  ;;  %v2031_v60 = vadd.f32 %v2017_v44, %v1999_v35  ;;  %v2138_v49 = vmul.f32 %v5253_v4, %v1977_v18  ;;  %v2118_v37 = vadd.f32 %v2102_v54, %v2082_v20  ;;  %v6411_v18 = vld [vmem:[#allocation32_spill] sm:$0xff]  ;;  %v3746_v27 = vpop.f32.mrf.mxu0 }
 0x3e6   : > { %3764 = vmatprep.mubr.bf16.mxu1 %v2345_v62  ;;  %v1964_v21 = vrot.slane %v3743_v5, 1  ;;  %v2020_v51 = vmul.f32 %v3743_v5, %v5245_v34  ;;  %v2105_v55 = vmul.f32 %v3743_v5, %v5235_v59  ;;  %v1948_v29 = vmul.f32 %v4298_v11, %v1932_v16 }
 0x3e7   : > { %v5420_v41 = vadd.f32 %v2049_v56, %v2031_v60  ;;  %v2193_v26 = vmul.f32 %v3743_v5, %v5248_v28  ;;  %v2279_v19 = vadd.f32 %v5307_v6, %v5302_v33  ;;  %v5430_v20 = vsel %vm2309_vm4, %v6411_v18, %v2296_v42 }
 0x3e8   : > { %v1980_v44 = vmul.f32 %v4304_v14, %v1964_v21  ;;  %6412 = vst [vmem:[#allocation30_spill] sm:$0xff] %v5430_v20  ;;  %v1930_v54 = vrot.slane %v1893_v39, 7  ;;  %v1962_v31 = vrot.slane %v1893_v39, 1  ;;  %v2002_v35 = vmul.f32 %v5238_v22, %v1948_v29 }
 0x3e9   : > { %v2085_v25 = vmul.f32 %v5231_v50, %v1948_v29  ;;  %v2175_v56 = vmul.f32 %v5241_v1, %v1948_v29  ;;  %v2295_v62 = vmax.f32 %v2279_v19, 0.0  ;;  %v5449_v30 = vadd.f32 %v2138_v49, %v2118_v37 }
 0x3ea   : > { %v2052_v5 = vmul.f32 %v5258_v36, %v1980_v44  ;;  %v2141_v33 = vmul.f32 %v5253_v4, %v1980_v44  ;;  %v2225_v60 = vmul.f32 %v5292_v47, %v1980_v44  ;;  %v1946_v16 = vmul.f32 %v4298_v11, %v1930_v54 }
 0x3eb   : > { %v2034_v21 = vadd.f32 %v2020_v51, %v2002_v35  ;;  %v2121_v42 = vadd.f32 %v2105_v55, %v2085_v25  ;;  %v2207_v18 = vadd.f32 %v2193_v26, %v2175_v56  ;;  %v5442_v61 = vsel %vm2309_vm4, %v6413_v9, %v2295_v62  ;;  %v1906_v62 = vpop.f32.mrf.mxu0 }
 0x3ec   : > { %6414 = vst [vmem:[#allocation32_spill] sm:$0xff] %v5442_v61  ;;  %v2346_v29 = vpack.c.bf16 %v5430_v20, %v5442_v61  ;;  %v1978_v19 = vmul.f32 %v4304_v14, %v1962_v31  ;;  %v2000_v63 = vmul.f32 %v5238_v22, %v1946_v16  ;;  %v2018_v44 = vmul.f32 %v5245_v34, %v1893_v39 }
 0x3ed   : > { %v5451_v51 = vadd.f32 %v2052_v5, %v2034_v21  ;;  %v5453_v55 = vadd.f32 %v2141_v33, %v2121_v42  ;;  %v2083_v26 = vmul.f32 %v5231_v50, %v1946_v16  ;;  %v5456_v9 = vadd.f32 %v2225_v60, %v2207_v18 }
 0x3ee   : > { %3765 = vmatmul.mubr.bf16.vlgmr.msra.gmra.mxu1 %v2346_v29  ;;  %v2032_v54 = vadd.f32 %v2018_v44, %v2000_v63  ;;  %v2050_v35 = vmul.f32 %v5258_v36, %v1978_v19  ;;  %v2103_v31 = vmul.f32 %v5235_v59, %v1893_v39  ;;  %v2139_v25 = vmul.f32 %v5253_v4, %v1978_v19 }
 0x3ef   : > { %v2173_v56 = vmul.f32 %v5241_v1, %v1946_v16  ;;  %v2191_v49 = vmul.f32 %v5248_v28, %v1893_v39  ;;  %v1935_v37 = vrot.slane %v3746_v27, 7  ;;  %v2223_v60 = vmul.f32 %v5292_v47, %v1978_v19 }
 0x3f0   : > { %v5463_v5 = vadd.f32 %v2050_v35, %v2032_v54  ;;  %v2119_v33 = vadd.f32 %v2103_v31, %v2083_v26  ;;  %v1967_v21 = vrot.slane %v3746_v27, 1  ;;  %v2023_v18 = vmul.f32 %v3746_v27, %v5245_v34 }
 0x3f1   : > { %v2205_v42 = vadd.f32 %v2191_v49, %v2173_v56  ;;  %v1951_v63 = vmul.f32 %v4298_v11, %v1935_v37  ;;  %v2108_v29 = vmul.f32 %v3746_v27, %v5235_v59  ;;  %v2196_v16 = vmul.f32 %v3746_v27, %v5248_v28 }
 0x3f2   : > { %v1983_v44 = vmul.f32 %v4304_v14, %v1967_v21  ;;  %v1933_v39 = vrot.slane %v1906_v62, 7  ;;  %v1965_v20 = vrot.slane %v1906_v62, 1  ;;  %v5471_v61 = vadd.f32 %v2139_v25, %v2119_v33 }
 0x3f3   : > { %v2005_v26 = vmul.f32 %v5238_v22, %v1951_v63  ;;  %v2088_v19 = vmul.f32 %v5231_v50, %v1951_v63  ;;  %v2178_v54 = vmul.f32 %v5241_v1, %v1951_v63  ;;  %v2021_v8 = vmul.f32 %v5245_v34, %v1906_v62 }
 0x3f4   : > { %v2055_v35 = vmul.f32 %v5258_v36, %v1983_v44  ;;  %v2144_v31 = vmul.f32 %v5253_v4, %v1983_v44  ;;  %v2228_v56 = vmul.f32 %v5292_v47, %v1983_v44  ;;  %v1949_v49 = vmul.f32 %v4298_v11, %v1933_v39 }
 0x3f5   : > { %v2037_v37 = vadd.f32 %v2023_v18, %v2005_v26  ;;  %v2124_v27 = vadd.f32 %v2108_v29, %v2088_v19  ;;  %v2210_v21 = vadd.f32 %v2196_v16, %v2178_v54  ;;  %v1981_v25 = vmul.f32 %v4304_v14, %v1965_v20  ;;  %v3747_v18 = vpop.f32.mrf.mxu0 }
 0x3f6   : > { %v2003_v33 = vmul.f32 %v5238_v22, %v1949_v49  ;;  %v2086_v13 = vmul.f32 %v5231_v50, %v1949_v49  ;;  %v2106_v63 = vmul.f32 %v5235_v59, %v1906_v62  ;;  %v5485_v46 = vadd.f32 %v2223_v60, %v2205_v42 }
 0x3f7   : > { %v5487_v52 = vadd.f32 %v2055_v35, %v2037_v37  ;;  %v5489_v44 = vadd.f32 %v2144_v31, %v2124_v27  ;;  %v5491_v39 = vadd.f32 %v2228_v56, %v2210_v21  ;;  %v2053_v20 = vmul.f32 %v5258_v36, %v1981_v25 }
 0x3f8   : > { %v2035_v29 = vadd.f32 %v2021_v8, %v2003_v33  ;;  %v2122_v16 = vadd.f32 %v2106_v63, %v2086_v13  ;;  %v2176_v26 = vmul.f32 %v5241_v1, %v1949_v49  ;;  %v2142_v19 = vmul.f32 %v5253_v4, %v1981_v25  ;;  %v1909_v33 = vpop.f32.mrf.mxu0 }
 0x3f9   : > { %v2194_v54 = vmul.f32 %v5248_v28, %v1906_v62  ;;  %v2249_v60 = vadd.f32 %v5359_v57, %v5300_v15  ;;  %v2250_v42 = vadd.f32 %v5375_v24, %v5343_v48  ;;  %v2226_v31 = vmul.f32 %v5292_v47, %v1981_v25 }
 0x3fa   : > { %v5501_v35 = vadd.f32 %v2053_v20, %v2035_v29  ;;  %v1936_v8 = vrot.slane %v3747_v18, 7  ;;  %v1968_v56 = vrot.slane %v3747_v18, 1  ;;  %v2158_v37 = vadd.f32 %v2142_v19, %v2122_v16 }
 0x3fb   : > { %v2208_v13 = vadd.f32 %v2194_v54, %v2176_v26  ;;  %v2261_v49 = vadd.f32 %v2249_v60, %v5377_v10  ;;  %v2262_v27 = vadd.f32 %v2250_v42, %v5337_v12  ;;  %v2109_v15 = vmul.f32 %v3747_v18, %v5235_v59 }
 0x3fc   : > { %v1952_v62 = vmul.f32 %v4298_v11, %v1936_v8  ;;  %v1984_v21 = vmul.f32 %v4304_v14, %v1968_v56  ;;  %v2251_v48 = vadd.f32 %v5333_v40, %v5373_v38  ;;  %v2197_v25 = vmul.f32 %v3747_v18, %v5248_v28 }
 0x3fd   : > { %v2281_v57 = vadd.f32 %v5307_v6, %v2261_v49  ;;  %v2282_v24 = vadd.f32 %v5307_v6, %v2262_v27  ;;  %v2284_v10 = vadd.f32 %v5307_v6, %v5371_v2  ;;  %v2240_v12 = vadd.f32 %v2226_v31, %v2208_v13 }
 0x3fe   : > { %v2089_v63 = vmul.f32 %v5231_v50, %v1952_v62  ;;  %v2145_v29 = vmul.f32 %v5253_v4, %v1984_v21  ;;  %v2179_v20 = vmul.f32 %v5241_v1, %v1952_v62  ;;  %v2263_v40 = vadd.f32 %v2251_v48, %v5365_v23 }
 0x3ff   : > { %v2297_v16 = vmax.f32 %v2281_v57, 0.0  ;;  %v2298_v26 = vmax.f32 %v2282_v24, 0.0  ;;  %v2300_v38 = vmax.f32 %v2284_v10, 0.0  ;;  %v1934_v60 = vrot.slane %v1909_v33, 7 }
 0x400   : > { %v2125_v19 = vadd.f32 %v2109_v15, %v2089_v63  ;;  %v2211_v54 = vadd.f32 %v2197_v25, %v2179_v20  ;;  %v1966_v18 = vrot.slane %v1909_v33, 1  ;;  %v2229_v31 = vmul.f32 %v5292_v47, %v1984_v21 }
 0x401   : > { %v5523_v2 = vsel %vm2309_vm4, %v5091_v32, %v2297_v16  ;;  %v5528_v42 = vsel %vm2309_vm4, %v5097_v53, %v2298_v26  ;;  %v2283_v8 = vadd.f32 %v5307_v6, %v2263_v40  ;;  %v5537_v13 = vsel %vm2309_vm4, %v5103_v58, %v2300_v38 }
 0x402   : > { %v2347_v23 = vpack.c.bf16 %v5528_v42, %v5523_v2  ;;  %v2161_v56 = vadd.f32 %v2145_v29, %v2125_v19  ;;  %v1950_v32 = vmul.f32 %v4298_v11, %v1934_v60  ;;  %v2243_v49 = vadd.f32 %v2229_v31, %v2211_v54  ;;  %v6415_v19 = vld [vmem:[#allocation37_spill] sm:$0xff]  ;;  %v6416_v31 = vld [vmem:[#allocation38_spill] sm:$0xff] }
 0x403   : > { %v2299_v27 = vmax.f32 %v2283_v8, 0.0  ;;  %v1982_v53 = vmul.f32 %v4304_v14, %v1966_v18  ;;  %v2022_v62 = vmul.f32 %v5245_v34, %v1909_v33  ;;  %v2107_v48 = vmul.f32 %v5235_v59, %v1909_v33 }
 0x404   : > { %3768 = vmatprep.mubr.bf16.mxu1 %v2347_v23  ;;  %v2004_v21 = vmul.f32 %v5238_v22, %v1950_v32  ;;  %v2087_v15 = vmul.f32 %v5231_v50, %v1950_v32  ;;  %v2177_v57 = vmul.f32 %v5241_v1, %v1950_v32  ;;  %v2195_v34 = vmul.f32 %v5248_v28, %v1909_v33  ;;  %v6417_v23 = vld [vmem:[#allocation39_spill] sm:$0xff] }
 0x405   : > { %v5549_v58 = vsel %vm2309_vm4, %v5115_v45, %v2299_v27  ;;  %v2054_v24 = vmul.f32 %v5258_v36, %v1982_v53  ;;  %v2143_v25 = vmul.f32 %v5253_v4, %v1982_v53  ;;  %v2227_v59 = vmul.f32 %v5292_v47, %v1982_v53  ;;  %v6419_v27 = vld [vmem:[#allocation36_spill] sm:$0xff] }
 0x406   : > { %v2348_v22 = vpack.c.bf16 %v5537_v13, %v5549_v58  ;;  %v2036_v10 = vadd.f32 %v2022_v62, %v2004_v21  ;;  %v2123_v50 = vadd.f32 %v2107_v48, %v2087_v15  ;;  %v2209_v63 = vadd.f32 %v2195_v34, %v2177_v57  ;;  %v6420_v48 = vld [vmem:[#allocation34_spill] sm:$0xff] }
 0x407   : > { %v2245_v1 = vadd.f32 %v5485_v46, %v5449_v30  ;;  %v2252_v45 = vadd.f32 %v5471_v61, %v5420_v41  ;;  %v2253_v36 = vadd.f32 %v5410_v3, %v5463_v5  ;;  %v2254_v33 = vadd.f32 %v5453_v55, %v5408_v43 }
 0x408   : > { %3769 = vmatmul.mubr.bf16.gmra.mxu1 %v2348_v22  ;;  %v2068_v4 = vadd.f32 %v2054_v24, %v2036_v10  ;;  %v2159_v28 = vadd.f32 %v2143_v25, %v2123_v50  ;;  %v2255_v29 = vadd.f32 %v2158_v37, %v5451_v51  ;;  %v2241_v20 = vadd.f32 %v2227_v59, %v2209_v63  ;;  %v6421_v24 = vld [vmem:[#allocation41_spill] sm:$0xff]  ;;  %v2949_v22 = vld [vmem:[%s6224_s7 + $0x78] sm:$0xff]  ;;  %v2948_v50 = vld [vmem:[%s6224_s7 + $0x70] sm:$0xff] }
 0x409   : > { %v2264_v47 = vadd.f32 %v2252_v45, %v5415_v0  ;;  %v2285_v16 = vadd.f32 %v5307_v6, %v2245_v1  ;;  %v2265_v46 = vadd.f32 %v2253_v36, %v5456_v9  ;;  %v2271_v30 = vadd.f32 %v2161_v56, %v5487_v52  ;;  %3781 = vmatpush3.msra.mxu1 %v2949_v22  ;;  %v2947_v59 = vld [vmem:[%s6224_s7 + $0x68] sm:$0xff]  ;;  %v2946_v63 = vld [vmem:[%s6224_s7 + $0x60] sm:$0xff]  ;;  %v2945_v1 = vld [vmem:[%s6224_s7 + $0x58] sm:$0xff] }
 0x40a   : > { %v2266_v61 = vadd.f32 %v2254_v33, %v2240_v12  ;;  %v2256_v3 = vadd.f32 %v2159_v28, %v5501_v35  ;;  %v2257_v41 = vadd.f32 %v5489_v44, %v2068_v4  ;;  %v2267_v51 = vadd.f32 %v2255_v29, %v2241_v20  ;;  %v2944_v45 = vld [vmem:[%s6224_s7 + $0x50] sm:$0xff]  ;;  %v2943_v36 = vld [vmem:[%s6224_s7 + $0x48] sm:$0xff]  ;;  %v2942_v4 = vld [vmem:[%s6224_s7 + $0x40] sm:$0xff] }
 0x40b   : > { %v2286_v5 = vadd.f32 %v5307_v6, %v2264_v47  ;;  %v2301_v26 = vmax.f32 %v2285_v16, 0.0  ;;  %v2287_v43 = vadd.f32 %v5307_v6, %v2265_v46  ;;  %v2292_v60 = vadd.f32 %v5307_v6, %v2271_v30  ;;  %v2941_v28 = vld [vmem:[%s6224_s7 + $0x38] sm:$0xff]  ;;  %v2940_v33 = vld [vmem:[%s6224_s7 + $0x30] sm:$0xff]  ;;  %v2939_v29 = vld [vmem:[%s6224_s7 + $0x28] sm:$0xff] }
 0x40c   : > { %v2288_v55 = vadd.f32 %v5307_v6, %v2266_v61  ;;  %v2268_v0 = vadd.f32 %v2256_v3, %v5491_v39  ;;  %v2269_v37 = vadd.f32 %v2257_v41, %v2243_v49  ;;  %v2289_v52 = vadd.f32 %v5307_v6, %v2267_v51  ;;  %v6418_v49 = vld [vmem:[#allocation40_spill] sm:$0xff]  ;;  %v2938_v20 = vld [vmem:[%s6224_s7 + $0x20] sm:$0xff]  ;;  %v2936_v16 = vld [vmem:[%s6224_s7 + $0x10] sm:$0xff] }
 0x40d   : > { %v2302_v40 = vmax.f32 %v2286_v5, 0.0  ;;  %v2303_v9 = vmax.f32 %v2287_v43, 0.0  ;;  %v5582_v38 = vsel %vm2309_vm4, %v5151_v17, %v2301_v26  ;;  %v2308_v15 = vmax.f32 %v2292_v60, 0.0  ;;  %v2937_v47 = vld [vmem:[%s6224_s7 + $0x18] sm:$0xff]  ;;  %v2935_v46 = vld [vmem:[%s6224_s7 + $0x8] sm:$0xff]  ;;  %v2934_v61 = vld [vmem:[%s6224_s7] sm:$0xff] }
 0x40e   : > { %v2304_v12 = vmax.f32 %v2288_v55, 0.0  ;;  %v2290_v35 = vadd.f32 %v5307_v6, %v2268_v0  ;;  %v2291_v44 = vadd.f32 %v5307_v6, %v2269_v37  ;;  %v2305_v39 = vmax.f32 %v2289_v52, 0.0  ;;  %v3546_v5 = vld [vmem:[%s6222_s5 + $0x30] sm:$0xff]  ;;  %v6424_v43 = vld [vmem:[#allocation24_spill] sm:$0xff] }
 0x40f   : > { %v5587_v54 = vsel %vm2309_vm4, %v6415_v19, %v2302_v40  ;;  %v5595_v8 = vsel %vm2309_vm4, %v6416_v31, %v2303_v9  ;;  %v5624_v25 = vsel %vm2309_vm4, %v6421_v24, %v2308_v15  ;;  %v6423_v10 = vmov 0.0   ;;  %v6425_v40 = vld [vmem:[#allocation23_spill] sm:$0xff]  ;;  %v6426_v52 = vld [vmem:[#allocation28_spill] sm:$0xff]  ;;  %v6427_v19 = vld [vmem:[#allocation6_spill] sm:$0xff] }
 0x410   : > { %v2349_v18 = vpack.c.bf16 %v5587_v54, %v5582_v38  ;;  %v5600_v17 = vsel %vm2309_vm4, %v6417_v23, %v2304_v12  ;;  %v2306_v56 = vmax.f32 %v2290_v35, 0.0  ;;  %v5607_v6 = vsel %vm2309_vm4, %v6418_v49, %v2305_v39  ;;  %6422 = vst [vmem:[#allocation33_spill] sm:$0xff] %v5624_v25  ;;  %3782 = vmatprep.subr.mxu1 %v6423_v10  ;;  %v6431_v15 = vld [vmem:[#allocation25_spill] sm:$0xff] }
 0x411   : > { %v2350_v32 = vpack.c.bf16 %v5600_v17, %v5595_v8  ;;  %v2307_v62 = vmax.f32 %v2291_v44, 0.0  ;;  %3783 = vmatpush3.msra.mxu1 %v2948_v50  ;;  %v5698_v51 = vrot.slane %v3546_v5, %v6424_v43  ;;  %v5704_v9 = vrot.slane %v3546_v5, %v6425_v40 }
 0x412   : > { %3772 = vmatprep.mubr.bf16.mxu1 %v2349_v18  ;;  %v5612_v53 = vsel %vm2309_vm4, %v6419_v27, %v2306_v56  ;;  %3784 = vmatprep.subr.mxu1 %v6423_v10  ;;  %v5707_v12 = vrot.slane %v3546_v5, %v6426_v52  ;;  %v5711_v39 = vrot.slane %v3546_v5, %v6427_v19  ;;  %v6428_v18 = vld [vmem:[#allocation26_spill] sm:$0xff] }
 0x413   : > { %3773 = vmatmul.mubr.bf16.gmra.mxu1 %v2350_v32  ;;  %v2351_v21 = vpack.c.bf16 %v5612_v53, %v5607_v6  ;;  %v5619_v57 = vsel %vm2309_vm4, %v6420_v48, %v2307_v62  ;;  %v5715_v31 = vrot.slane %v3546_v5, %v6428_v18  ;;  %v6429_v32 = vld [vmem:[#allocation27_spill] sm:$0xff]  ;;  %v6430_v62 = vld [vmem:[#allocation29_spill] sm:$0xff]  ;;  %v5729_v48 = vrot.slane %v3546_v5, %v6431_v15 }
 0x414   : > { %v2352_v34 = vpack.c.bf16 %v5624_v25, %v5619_v57  ;;  %3785 = vmatpush3.msra.mxu1 %v2947_v59  ;;  %v5722_v49 = vrot.slane %v3546_v5, %v6429_v32  ;;  %v5737_v59 = vld [vmem:[%s6222_s5 + $0x38] ss:$0 sm:$0xff] }
 0x415   : > { %3776 = vmatprep.mubr.bf16.mxu1 %v2351_v21  ;;  %3786 = vmatprep.subr.mxu1 %v6423_v10  ;;  %v5726_v21 = vrot.slane %v3546_v5, %v6430_v62 }
 0x416   : > { %3787 = vmatpush3.msra.mxu1 %v2946_v63 }
 0x417   : > { %3788 = vmatprep.subr.mxu1 %v6423_v10 }
 0x418   : > { %3789 = vmatpush3.msra.mxu1 %v2945_v1 }
 0x419   : > { %3790 = vmatprep.subr.mxu1 %v6423_v10 }
 0x41a   : > { %3791 = vmatpush3.msra.mxu1 %v2944_v45 }
 0x41b   : > { %3777 = vmatmul.mubr.bf16.gmra.mxu1 %v2352_v34  ;;  %3792 = vmatprep.subr.mxu1 %v6423_v10 }
 0x41c   : > { %3812 = vmatprep.mubr.msk.f32.mxu1 %vm4010_vm5, %v6423_v10  ;;  %3793 = vmatpush3.msra.mxu1 %v2943_v36 }
 0x41d   : > { %3794 = vmatprep.subr.mxu1 %v6423_v10 }
 0x41e   : > { %3795 = vmatpush3.msra.mxu1 %v2942_v4 }
 0x41f   : > { %3796 = vmatprep.subr.mxu1 %v6423_v10 }
 0x420   : > { %3797 = vmatpush3.msra.mxu1 %v2941_v28 }
 0x421   : > { %3798 = vmatprep.subr.mxu1 %v6423_v10 }
 0x422   : > { %3799 = vmatpush3.msra.mxu1 %v2940_v33 }
 0x423   : > { %3800 = vmatprep.subr.mxu1 %v6423_v10 }
 0x424   : > { %3801 = vmatpush3.msra.mxu1 %v2939_v29 }
 0x425   : > { %3802 = vmatprep.subr.mxu1 %v6423_v10 }
 0x426   : > { %3803 = vmatpush3.msra.mxu1 %v2938_v20 }
 0x427   : > { %3804 = vmatprep.subr.mxu1 %v6423_v10 }
 0x428   : > { %3805 = vmatpush3.msra.mxu1 %v2937_v47 }
 0x429   : > { %3806 = vmatprep.subr.mxu1 %v6423_v10 }
 0x42a   : > { %3807 = vmatpush3.msra.mxu1 %v2936_v16 }
 0x42b   : > { %3808 = vmatprep.subr.mxu1 %v6423_v10 }
 0x42c   : > { %3809 = vmatpush3.msra.mxu1 %v2935_v46 }
 0x42d   : > { %3810 = vmatprep.subr.mxu1 %v6423_v10 }
 0x42e   : > { %3811 = vmatpush3.msra.mxu1 %v2934_v61 }
 0x42f   : > { %3815 = vmatprep.subr.mxu1 %v6423_v10 }
 0x4ae   : > { %v3766_v30 = vpop.f32.mrf.mxu1 }
 0x4af   : > { %v2500_v3 = vrot.slane %v3766_v30, 7  ;;  %v2532_v37 = vrot.slane %v3766_v30, 1  ;;  %v2673_v27 = vmul.f32 %v3766_v30, %v5704_v9  ;;  %v2589_v63 = vmul.f32 %v3766_v30, %v5711_v39 }
 0x4b0   : > { %v2435_v41 = vpop.f32.mrf.mxu1  ;;  %v2762_v45 = vmul.f32 %v3766_v30, %v5715_v31 }
 0x4b1   : > { %v2516_v26 = vmul.f32 %v4298_v11, %v2500_v3  ;;  %v2498_v0 = vrot.slane %v2435_v41, 7  ;;  %v2530_v35 = vrot.slane %v2435_v41, 1  ;;  %v5719_v56 = vmul.f32 %v4304_v14, %v2532_v37 }
 0x4b2   : > { %v5700_v55 = vpop.f32.mrf.mxu1  ;;  %v2587_v36 = vmul.f32 %v5711_v39, %v2435_v41  ;;  %v2671_v33 = vmul.f32 %v5704_v9, %v2435_v41 }
 0x4b3   : > { %v2501_v44 = vrot.slane %v5700_v55, 7  ;;  %v2653_v60 = vmul.f32 %v5698_v51, %v2516_v26  ;;  %v2514_v23 = vmul.f32 %v4298_v11, %v2498_v0  ;;  %v2744_v24 = vmul.f32 %v5707_v12, %v2516_v26 }
 0x4b4   : > { %v2546_v34 = vmul.f32 %v4304_v14, %v2530_v35  ;;  %v2438_v50 = vpop.f32.mrf.mxu1  ;;  %v2533_v29 = vrot.slane %v5700_v55, 1  ;;  %v2571_v20 = vmul.f32 %v5722_v49, %v2516_v26  ;;  %v2709_v47 = vmul.f32 %v5726_v21, %v5719_v56 }
 0x4b5   : > { %v2517_v22 = vmul.f32 %v4298_v11, %v2501_v44  ;;  %v2689_v1 = vadd.f32 %v2673_v27, %v2653_v60  ;;  %v2569_v4 = vmul.f32 %v5722_v49, %v2514_v23  ;;  %v2651_v28 = vmul.f32 %v5698_v51, %v2514_v23 }
 0x4b6   : > { %v2499_v16 = vrot.slane %v2438_v50, 7  ;;  %v2531_v46 = vrot.slane %v2438_v50, 1  ;;  %v2776_v61 = vadd.f32 %v2762_v45, %v2744_v24  ;;  %v2794_v30 = vmul.f32 %v5737_v59, %v5719_v56 }
 0x4b7   : > { %v2619_v3 = vmul.f32 %v5729_v48, %v2546_v34  ;;  %v2745_v5 = vmul.f32 %v5707_v12, %v2517_v22  ;;  %v2725_v43 = vadd.f32 %v2709_v47, %v2689_v1  ;;  %v2707_v41 = vmul.f32 %v5726_v21, %v2546_v34 }
 0x4b8   : > { %v2515_v0 = vmul.f32 %v4298_v11, %v2499_v16  ;;  %v2547_v26 = vmul.f32 %v4304_v14, %v2531_v46  ;;  %v2601_v37 = vadd.f32 %v2587_v36, %v2569_v4  ;;  %v2687_v40 = vadd.f32 %v2671_v33, %v2651_v28 }
 0x4b9   : > { %v2549_v52 = vmul.f32 %v4304_v14, %v2533_v29  ;;  %v2763_v35 = vmul.f32 %v5700_v55, %v5715_v31  ;;  %v2588_v19 = vmul.f32 %v5711_v39, %v2438_v50  ;;  %v2672_v18 = vmul.f32 %v5704_v9, %v2438_v50 }
 0x4ba   : > { %v2570_v44 = vmul.f32 %v5722_v49, %v2515_v0  ;;  %v2652_v60 = vmul.f32 %v5698_v51, %v2515_v0  ;;  %v2654_v23 = vmul.f32 %v5698_v51, %v2517_v22  ;;  %v2743_v62 = vmul.f32 %v5707_v12, %v2515_v0 }
 0x4bb   : > { %v2777_v27 = vadd.f32 %v2763_v35, %v2745_v5  ;;  %v2761_v15 = vmul.f32 %v5715_v31, %v2438_v50  ;;  %v2620_v34 = vmul.f32 %v5729_v48, %v2547_v26  ;;  %v2708_v45 = vmul.f32 %v5726_v21, %v2547_v26 }
 0x4bc   : > { %v2602_v24 = vadd.f32 %v2588_v19, %v2570_v44  ;;  %v2688_v1 = vadd.f32 %v2672_v18, %v2652_v60  ;;  %v2572_v36 = vmul.f32 %v5722_v49, %v2517_v22  ;;  %v2674_v4 = vmul.f32 %v5700_v55, %v5704_v9  ;;  %v5778_v18 = vld [vmem:[%s6223_s6 + $0x3] ss:$0 sm:$0xff] }
 0x4bd   : > { %v2775_v28 = vadd.f32 %v2761_v15, %v2743_v62  ;;  %v2793_v33 = vmul.f32 %v5737_v59, %v2547_v26  ;;  %v2633_v29 = vadd.f32 %v2619_v3, %v2601_v37  ;;  %v2795_v47 = vmul.f32 %v5737_v59, %v2549_v52 }
 0x4be   : > { %v2634_v16 = vadd.f32 %v2620_v34, %v2602_v24  ;;  %v2724_v46 = vadd.f32 %v2708_v45, %v2688_v1  ;;  %v2808_v50 = vadd.f32 %v2794_v30, %v2776_v61  ;;  %v2723_v5 = vadd.f32 %v2707_v41, %v2687_v40 }
 0x4bf   : > { %v2590_v0 = vmul.f32 %v5700_v55, %v5711_v39  ;;  %v2807_v35 = vadd.f32 %v2793_v33, %v2775_v28  ;;  %v2690_v44 = vadd.f32 %v2674_v4, %v2654_v23  ;;  %v2809_v19 = vadd.f32 %v2795_v47, %v2777_v27 }
 0x4c0   : > { %v2823_v22 = vadd.f32 %v2724_v46, %v2633_v29  ;;  %v2824_v60 = vadd.f32 %v2725_v43, %v2634_v16  ;;  %v2603_v3 = vadd.f32 %v2589_v63, %v2571_v20  ;;  %v2621_v61 = vmul.f32 %v5729_v48, %v5719_v56 }
 0x4c1   : > { %v2604_v26 = vadd.f32 %v2590_v0, %v2572_v36  ;;  %v2821_v37 = vadd.f32 %v2807_v35, %v2723_v5  ;;  %v2710_v30 = vmul.f32 %v5726_v21, %v2549_v52  ;;  %v2622_v23 = vmul.f32 %v5729_v48, %v2549_v52 }
 0x4c2   : > { %v2835_v41 = vadd.f32 %v2823_v22, %v2808_v50  ;;  %v2836_v55 = vadd.f32 %v2824_v60, %v2809_v19  ;;  %v2635_v56 = vadd.f32 %v2621_v61, %v2603_v3  ;;  %v6432_v50 = vld [vmem:[#allocation35_spill] sm:$0xff] }
 0x4c3   : > { %v2854_v43 = vadd.f32 %v5778_v18, %v2821_v37  ;;  %v2726_v15 = vadd.f32 %v2710_v30, %v2690_v44  ;;  %v5788_v34 = vadd.f32 %v2622_v23, %v2604_v26  ;;  %v6434_v19 = vld [vmem:[#allocation31_spill] sm:$0xff] }
 0x4c4   : > { %v2855_v63 = vadd.f32 %v5778_v18, %v2835_v41  ;;  %v2856_v20 = vadd.f32 %v5778_v18, %v2836_v55  ;;  %v6436_v55 = vld [vmem:[#allocation32_spill] sm:$0xff] }
 0x4c5   : > { %v2870_v1 = vmax.f32 %v2854_v43, 0.0  ;;  %v2825_v46 = vadd.f32 %v2726_v15, %v2635_v56 }
 0x4c6   : > { %v2871_v36 = vmax.f32 %v2855_v63, 0.0  ;;  %v2872_v33 = vmax.f32 %v2856_v20, 0.0 }
 0x4c7   : > { %v5805_v22 = vsel %vm2886_vm6, %v6434_v19, %v2870_v1 }
 0x4c8   : > { %v3770_v40 = vpop.f32.mrf.mxu1  ;;  %v5798_v5 = vsel %vm2886_vm6, %v6432_v50, %v2871_v36  ;;  %6435 = vst [vmem:[#allocation38_spill] sm:$0xff] %v5805_v22  ;;  %v5815_v23 = vsel %vm2886_vm6, %v6436_v55, %v2872_v33 }
 0x4c9   : > { %v2504_v27 = vrot.slane %v3770_v40, 7  ;;  %v2536_v62 = vrot.slane %v3770_v40, 1  ;;  %v2593_v47 = vmul.f32 %v3770_v40, %v5711_v39  ;;  %6433 = vst [vmem:[#allocation37_spill] sm:$0xff] %v5798_v5  ;;  %v2677_v0 = vmul.f32 %v3770_v40, %v5704_v9  ;;  %6437 = vst [vmem:[#allocation39_spill] sm:$0xff] %v5815_v23 }
 0x4ca   : > { %v2451_v24 = vpop.f32.mrf.mxu1  ;;  %v2766_v3 = vmul.f32 %v3770_v40, %v5715_v31  ;;  %v2905_v43 = vadd.f32 %v5798_v5, %v5805_v22 }
 0x4cb   : > { %v2520_v45 = vmul.f32 %v4298_v11, %v2504_v27  ;;  %v2552_v52 = vmul.f32 %v4304_v14, %v2536_v62  ;;  %v2502_v4 = vrot.slane %v2451_v24, 7  ;;  %v2534_v28 = vrot.slane %v2451_v24, 1 }
 0x4cc   : > { %v3771_v44 = vpop.f32.mrf.mxu1  ;;  %v2591_v26 = vmul.f32 %v5711_v39, %v2451_v24  ;;  %v2675_v20 = vmul.f32 %v5704_v9, %v2451_v24  ;;  %v2764_v36 = vmul.f32 %v5715_v31, %v2451_v24  ;;  %v2906_v10 = vadd.f32 %v2905_v43, %v5815_v23  ;;  %v6438_v43 = vld [vmem:[#allocation30_spill] sm:$0xff] }
 0x4cd   : > { %v2575_v29 = vmul.f32 %v5722_v49, %v2520_v45  ;;  %v2657_v16 = vmul.f32 %v5698_v51, %v2520_v45  ;;  %v2748_v35 = vmul.f32 %v5707_v12, %v2520_v45  ;;  %v2625_v37 = vmul.f32 %v5729_v48, %v2552_v52 }
 0x4ce   : > { %v2518_v30 = vmul.f32 %v4298_v11, %v2502_v4  ;;  %v2550_v41 = vmul.f32 %v4304_v14, %v2534_v28  ;;  %v2713_v27 = vmul.f32 %v5726_v21, %v2552_v52  ;;  %v5821_v40 = vmul.f32 %v5737_v59, %v2552_v52  ;;  %v2454_v56 = vpop.f32.mrf.mxu1 }
 0x4cf   : > { %v2607_v60 = vadd.f32 %v2593_v47, %v2575_v29  ;;  %v2693_v61 = vadd.f32 %v2677_v0, %v2657_v16  ;;  %v2780_v62 = vadd.f32 %v2766_v3, %v2748_v35  ;;  %v2505_v4 = vrot.slane %v3771_v44, 7 }
 0x4d0   : > { %v2573_v15 = vmul.f32 %v5722_v49, %v2518_v30  ;;  %v2655_v63 = vmul.f32 %v5698_v51, %v2518_v30  ;;  %v2746_v45 = vmul.f32 %v5707_v12, %v2518_v30  ;;  %v2623_v29 = vmul.f32 %v5729_v48, %v2550_v41 }
 0x4d1   : > { %v2639_v1 = vadd.f32 %v2625_v37, %v2607_v60  ;;  %v2729_v28 = vadd.f32 %v2713_v27, %v2693_v61  ;;  %v2537_v52 = vrot.slane %v3771_v44, 1  ;;  %v2796_v16 = vmul.f32 %v5737_v59, %v2550_v41 }
 0x4d2   : > { %v2605_v33 = vadd.f32 %v2591_v26, %v2573_v15  ;;  %v2778_v47 = vadd.f32 %v2764_v36, %v2746_v45  ;;  %v2521_v50 = vmul.f32 %v4298_v11, %v2505_v4  ;;  %v2503_v0 = vrot.slane %v2454_v56, 7 }
 0x4d3   : > { %v2691_v35 = vadd.f32 %v2675_v20, %v2655_v63  ;;  %v2711_v19 = vmul.f32 %v5726_v21, %v2550_v41  ;;  %v2553_v60 = vmul.f32 %v4304_v14, %v2537_v52  ;;  %v2535_v3 = vrot.slane %v2454_v56, 1 }
 0x4d4   : > { %v2810_v37 = vadd.f32 %v2796_v16, %v2778_v47  ;;  %v2658_v24 = vmul.f32 %v5698_v51, %v2521_v50  ;;  %v2678_v26 = vmul.f32 %v3771_v44, %v5704_v9  ;;  %v2519_v61 = vmul.f32 %v4298_v11, %v2503_v0 }
 0x4d5   : > { %v2637_v30 = vadd.f32 %v2623_v29, %v2605_v33  ;;  %v2749_v55 = vmul.f32 %v5707_v12, %v2521_v50  ;;  %v2767_v27 = vmul.f32 %v3771_v44, %v5715_v31  ;;  %v2551_v15 = vmul.f32 %v4304_v14, %v2535_v3  ;;  %v3774_v33 = vpop.f32.mrf.mxu1 }
 0x4d6   : > { %v2837_v63 = vadd.f32 %v2825_v46, %v2810_v37  ;;  %v2694_v20 = vadd.f32 %v2678_v26, %v2658_v24  ;;  %v2714_v41 = vmul.f32 %v5726_v21, %v2553_v60  ;;  %v2574_v45 = vmul.f32 %v5722_v49, %v2519_v61 }
 0x4d7   : > { %v2727_v36 = vadd.f32 %v2711_v19, %v2691_v35  ;;  %v2592_v4 = vmul.f32 %v5711_v39, %v2454_v56  ;;  %v2656_v52 = vmul.f32 %v5698_v51, %v2519_v61  ;;  %v2676_v47 = vmul.f32 %v5704_v9, %v2454_v56 }
 0x4d8   : > { %v2857_v29 = vadd.f32 %v5778_v18, %v2837_v63  ;;  %v2730_v16 = vadd.f32 %v2714_v41, %v2694_v20  ;;  %v2624_v44 = vmul.f32 %v5729_v48, %v2551_v15  ;;  %v2712_v46 = vmul.f32 %v5726_v21, %v2551_v15 }
 0x4d9   : > { %v2606_v50 = vadd.f32 %v2592_v4, %v2574_v45  ;;  %v2692_v0 = vadd.f32 %v2676_v47, %v2656_v52  ;;  %v2747_v3 = vmul.f32 %v5707_v12, %v2519_v61  ;;  %v2765_v35 = vmul.f32 %v5715_v31, %v2454_v56 }
 0x4da   : > { %v2781_v19 = vadd.f32 %v2767_v27, %v2749_v55  ;;  %v2847_v37 = vadd.f32 %v2730_v16, %v2639_v1  ;;  %v2797_v24 = vmul.f32 %v5737_v59, %v2551_v15  ;;  %v2508_v26 = vrot.slane %v3774_v33, 7  ;;  %v2467_v15 = vpop.f32.mrf.mxu1 }
 0x4db   : > { %v2638_v5 = vadd.f32 %v2624_v44, %v2606_v50  ;;  %v2728_v22 = vadd.f32 %v2712_v46, %v2692_v0  ;;  %v2779_v32 = vadd.f32 %v2765_v35, %v2747_v3  ;;  %v2540_v63 = vrot.slane %v3774_v33, 1 }
 0x4dc   : > { %v2826_v20 = vadd.f32 %v2727_v36, %v5788_v34  ;;  %v2873_v41 = vmax.f32 %v2857_v29, 0.0  ;;  %v2524_v45 = vmul.f32 %v4298_v11, %v2508_v26  ;;  %v2799_v61 = vmul.f32 %v5737_v59, %v2553_v60  ;;  %v3775_v46 = vpop.f32.mrf.mxu1 }
 0x4dd   : > { %v2811_v4 = vadd.f32 %v2797_v24, %v2779_v32  ;;  %v2827_v56 = vadd.f32 %v2728_v22, %v2637_v30  ;;  %v2828_v55 = vadd.f32 %v2729_v28, %v2638_v5  ;;  %v2812_v1 = vadd.f32 %v5821_v40, %v2780_v62 }
 0x4de   : > { %v5856_v27 = vadd.f32 %v5778_v18, %v2847_v37  ;;  %v2813_v52 = vadd.f32 %v2799_v61, %v2781_v19  ;;  %v2556_v34 = vmul.f32 %v4304_v14, %v2540_v63  ;;  %v2578_v36 = vmul.f32 %v5722_v49, %v2524_v45 }
 0x4df   : > { %v2838_v47 = vadd.f32 %v2826_v20, %v2811_v4  ;;  %v5863_v29 = vsel %vm2886_vm6, %v6438_v43, %v2873_v41  ;;  %v2839_v32 = vadd.f32 %v2827_v56, %v2812_v1  ;;  %v2596_v5 = vmul.f32 %v3774_v33, %v5711_v39 }
 0x4e0   : > { %6439 = vst [vmem:[#allocation40_spill] sm:$0xff] %v5863_v29  ;;  %v2907_v22 = vadd.f32 %v2906_v10, %v5863_v29  ;;  %v2840_v40 = vadd.f32 %v2828_v55, %v2813_v52  ;;  %v2661_v28 = vmul.f32 %v5698_v51, %v2524_v45  ;;  %v2681_v30 = vmul.f32 %v3774_v33, %v5704_v9 }
 0x4e1   : > { %v2858_v62 = vadd.f32 %v5778_v18, %v2838_v47  ;;  %v2751_v16 = vmul.f32 %v5707_v12, %v2524_v45  ;;  %v2506_v44 = vrot.slane %v2467_v15, 7  ;;  %v2610_v0 = vadd.f32 %v2596_v5, %v2578_v36  ;;  %v2470_v47 = vpop.f32.mrf.mxu1 }
 0x4e2   : > { %v2628_v3 = vmul.f32 %v5729_v48, %v2556_v34  ;;  %v2717_v35 = vmul.f32 %v5726_v21, %v2556_v34  ;;  %v5875_v10 = vadd.f32 %v5778_v18, %v2839_v32  ;;  %v2769_v19 = vmul.f32 %v3774_v33, %v5715_v31 }
 0x4e3   : > { %v2874_v50 = vmax.f32 %v2858_v62, 0.0  ;;  %v2522_v37 = vmul.f32 %v4298_v11, %v2506_v44  ;;  %v2538_v24 = vrot.slane %v2467_v15, 1  ;;  %v5880_v26 = vadd.f32 %v5778_v18, %v2840_v40 }
 0x4e4   : > { %v2697_v63 = vadd.f32 %v2681_v30, %v2661_v28  ;;  %v2509_v20 = vrot.slane %v3775_v46, 7  ;;  %v2541_v41 = vrot.slane %v3775_v46, 1  ;;  %v2783_v61 = vadd.f32 %v2769_v19, %v2751_v16  ;;  %v3778_v19 = vpop.f32.mrf.mxu1 }
 0x4e5   : > { %v5885_v45 = vsel %vm2886_vm6, %v5523_v2, %v2874_v50  ;;  %v2576_v4 = vmul.f32 %v5722_v49, %v2522_v37  ;;  %v2594_v56 = vmul.f32 %v5711_v39, %v2467_v15  ;;  %v2554_v33 = vmul.f32 %v4304_v14, %v2538_v24 }
 0x4e6   : > { %6440 = vst [vmem:[#allocation36_spill] sm:$0xff] %v5885_v45  ;;  %v2659_v55 = vmul.f32 %v5698_v51, %v2522_v37  ;;  %v2679_v1 = vmul.f32 %v5704_v9, %v2467_v15  ;;  %v2525_v52 = vmul.f32 %v4298_v11, %v2509_v20  ;;  %v5894_v43 = vadd.f32 %v2628_v3, %v2610_v0  ;;  %v2483_v5 = vpop.f32.mrf.mxu1 }
 0x4e7   : > { %v2801_v2 = vmul.f32 %v5737_v59, %v2556_v34  ;;  %v2557_v32 = vmul.f32 %v4304_v14, %v2541_v41  ;;  %v2733_v40 = vadd.f32 %v2717_v35, %v2697_v63  ;;  %v2608_v62 = vadd.f32 %v2594_v56, %v2576_v4 }
 0x4e8   : > { %v2695_v28 = vadd.f32 %v2679_v1, %v2659_v55  ;;  %v5900_v30 = vadd.f32 %v2907_v22, %v5885_v45  ;;  %v2579_v16 = vmul.f32 %v5722_v49, %v2525_v52  ;;  %v2597_v44 = vmul.f32 %v3775_v46, %v5711_v39 }
 0x4e9   : > { %v2815_v15 = vadd.f32 %v2801_v2, %v2783_v61  ;;  %v2626_v50 = vmul.f32 %v5729_v48, %v2554_v33  ;;  %v2715_v0 = vmul.f32 %v5726_v21, %v2554_v33  ;;  %v2662_v34 = vmul.f32 %v5698_v51, %v2525_v52 }
 0x4ea   : > { %v2752_v3 = vmul.f32 %v5707_v12, %v2525_v52  ;;  %v2629_v35 = vmul.f32 %v5729_v48, %v2557_v32  ;;  %v2682_v37 = vmul.f32 %v3775_v46, %v5704_v9  ;;  %v2507_v22 = vrot.slane %v2470_v47, 7 }
 0x4eb   : > { %v2539_v24 = vrot.slane %v2470_v47, 1  ;;  %v2640_v63 = vadd.f32 %v2626_v50, %v2608_v62  ;;  %v2731_v20 = vadd.f32 %v2715_v0, %v2695_v28  ;;  %v2718_v41 = vmul.f32 %v5726_v21, %v2557_v32 }
 0x4ec   : > { %v2770_v61 = vmul.f32 %v3775_v46, %v5715_v31  ;;  %v2611_v4 = vadd.f32 %v2597_v44, %v2579_v16  ;;  %v2523_v56 = vmul.f32 %v4298_v11, %v2507_v22  ;;  %v2512_v55 = vrot.slane %v3778_v19, 7 }
 0x4ed   : > { %v2555_v33 = vmul.f32 %v4304_v14, %v2539_v24  ;;  %v2698_v1 = vadd.f32 %v2682_v37, %v2662_v34  ;;  %v2802_v2 = vmul.f32 %v5737_v59, %v2557_v32  ;;  %v2595_v60 = vmul.f32 %v5711_v39, %v2470_v47 }
 0x4ee   : > { %v2784_v52 = vadd.f32 %v2770_v61, %v2752_v3  ;;  %v2577_v62 = vmul.f32 %v5722_v49, %v2523_v56  ;;  %v2660_v28 = vmul.f32 %v5698_v51, %v2523_v56  ;;  %v2680_v50 = vmul.f32 %v5704_v9, %v2470_v47 }
 0x4ef   : > { %v2768_v46 = vmul.f32 %v5715_v31, %v2470_v47  ;;  %v2627_v16 = vmul.f32 %v5729_v48, %v2555_v33  ;;  %v2750_v44 = vmul.f32 %v5707_v12, %v2523_v56  ;;  %v2528_v0 = vmul.f32 %v4298_v11, %v2512_v55 }
 0x4f0   : > { %v2544_v34 = vrot.slane %v3778_v19, 1  ;;  %v2609_v3 = vadd.f32 %v2595_v60, %v2577_v62  ;;  %v2696_v32 = vadd.f32 %v2680_v50, %v2660_v28  ;;  %v2716_v37 = vmul.f32 %v5726_v21, %v2555_v33 }
 0x4f1   : > { %v2510_v22 = vrot.slane %v2483_v5, 7  ;;  %v5924_v24 = vadd.f32 %v2629_v35, %v2611_v4  ;;  %v2816_v61 = vadd.f32 %v2802_v2, %v2784_v52  ;;  %v2782_v36 = vadd.f32 %v2768_v46, %v2750_v44 }
 0x4f2   : > { %v2800_v45 = vmul.f32 %v5737_v59, %v2555_v33  ;;  %v2641_v29 = vadd.f32 %v2627_v16, %v2609_v3  ;;  %v2732_v47 = vadd.f32 %v2716_v37, %v2696_v32  ;;  %v2582_v23 = vmul.f32 %v5722_v49, %v2528_v0 }
 0x4f3   : > { %v2665_v56 = vmul.f32 %v5698_v51, %v2528_v0  ;;  %v2560_v55 = vmul.f32 %v4304_v14, %v2544_v34  ;;  %v2600_v60 = vmul.f32 %v3778_v19, %v5711_v39  ;;  %v2685_v62 = vmul.f32 %v3778_v19, %v5704_v9 }
 0x4f4   : > { %v2814_v25 = vadd.f32 %v2800_v45, %v2782_v36  ;;  %v2829_v28 = vadd.f32 %v2732_v47, %v2640_v63  ;;  %v2830_v35 = vadd.f32 %v2733_v40, %v2641_v29  ;;  %v2755_v4 = vmul.f32 %v5707_v12, %v2528_v0  ;;  %v3779_v40 = vpop.f32.mrf.mxu1 }
 0x4f5   : > { %v2526_v52 = vmul.f32 %v4298_v11, %v2510_v22  ;;  %v2734_v33 = vadd.f32 %v2718_v41, %v2698_v1  ;;  %v2773_v50 = vmul.f32 %v3778_v19, %v5715_v31  ;;  %v2542_v46 = vrot.slane %v2483_v5, 1 }
 0x4f6   : > { %v2822_v2 = vadd.f32 %v2814_v25, %v2731_v20  ;;  %v2841_v16 = vadd.f32 %v2829_v28, %v2815_v15  ;;  %v2842_v44 = vadd.f32 %v2830_v35, %v2816_v61  ;;  %v2614_v45 = vadd.f32 %v2600_v60, %v2582_v23  ;;  %v2486_v28 = vpop.f32.mrf.mxu1 }
 0x4f7   : > { %v2701_v36 = vadd.f32 %v2685_v62, %v2665_v56  ;;  %v2632_v3 = vmul.f32 %v5729_v48, %v2560_v55  ;;  %v2721_v63 = vmul.f32 %v5726_v21, %v2560_v55  ;;  %v2580_v29 = vmul.f32 %v5722_v49, %v2526_v52 }
 0x4f8   : > { %v2862_v34 = vadd.f32 %v5778_v18, %v2822_v2  ;;  %v2863_v0 = vadd.f32 %v5778_v18, %v2841_v16  ;;  %v2787_v41 = vadd.f32 %v2773_v50, %v2755_v4  ;;  %v2558_v25 = vmul.f32 %v4304_v14, %v2542_v46 }
 0x4f9   : > { %v2753_v19 = vmul.f32 %v5707_v12, %v2526_v52  ;;  %v2831_v15 = vadd.f32 %v2734_v33, %v5894_v43  ;;  %v2864_v23 = vadd.f32 %v5778_v18, %v2842_v44  ;;  %v2805_v20 = vmul.f32 %v5737_v59, %v2560_v55 }
 0x4fa   : > { %v2598_v1 = vmul.f32 %v5711_v39, %v2483_v5  ;;  %v5946_v32 = vadd.f32 %v2632_v3, %v2614_v45  ;;  %v2737_v37 = vadd.f32 %v2721_v63, %v2701_v36  ;;  %v2663_v22 = vmul.f32 %v5698_v51, %v2526_v52 }
 0x4fb   : > { %v2771_v61 = vmul.f32 %v5715_v31, %v2483_v5  ;;  %v2878_v47 = vmax.f32 %v2862_v34, 0.0  ;;  %v2879_v56 = vmax.f32 %v2863_v0, 0.0  ;;  %v2513_v62 = vrot.slane %v3779_v40, 7 }
 0x4fc   : > { %v2612_v60 = vadd.f32 %v2598_v1, %v2580_v29  ;;  %v2819_v35 = vadd.f32 %v2805_v20, %v2787_v41  ;;  %v2683_v43 = vmul.f32 %v5704_v9, %v2483_v5  ;;  %v2803_v55 = vmul.f32 %v5737_v59, %v2558_v25 }
 0x4fd   : > { %v2785_v4 = vadd.f32 %v2771_v61, %v2753_v19  ;;  %v2880_v33 = vmax.f32 %v2864_v23, 0.0  ;;  %v2630_v2 = vmul.f32 %v5729_v48, %v2558_v25  ;;  %v2529_v50 = vmul.f32 %v4298_v11, %v2513_v62 }
 0x4fe   : > { %v2545_v46 = vrot.slane %v3779_v40, 1  ;;  %v2699_v52 = vadd.f32 %v2683_v43, %v2663_v22  ;;  %v2719_v16 = vmul.f32 %v5726_v21, %v2558_v25  ;;  %v2511_v45 = vrot.slane %v2486_v28, 7 }
 0x4ff   : > { %v2817_v44 = vadd.f32 %v2803_v55, %v2785_v4  ;;  %v5958_v36 = vsel %vm2886_vm6, %v5582_v38, %v2878_v47  ;;  %v5963_v5 = vsel %vm2886_vm6, %v5587_v54, %v2879_v56  ;;  %v2644_v34 = vadd.f32 %v2630_v2, %v2612_v60 }
 0x500   : > { %v2666_v3 = vmul.f32 %v5698_v51, %v2529_v50  ;;  %v2561_v63 = vmul.f32 %v4304_v14, %v2545_v46  ;;  %v2756_v29 = vmul.f32 %v5707_v12, %v2529_v50  ;;  %v2527_v0 = vmul.f32 %v4298_v11, %v2511_v45 }
 0x501   : > { %v2543_v41 = vrot.slane %v2486_v28, 1  ;;  %v5972_v38 = vsel %vm2886_vm6, %v5595_v8, %v2880_v33  ;;  %v2843_v25 = vadd.f32 %v2831_v15, %v2817_v44  ;;  %v2686_v19 = vmul.f32 %v3779_v40, %v5704_v9 }
 0x502   : > { %v2774_v54 = vmul.f32 %v3779_v40, %v5715_v31  ;;  %v2581_v20 = vmul.f32 %v5722_v49, %v2527_v0  ;;  %v2599_v1 = vmul.f32 %v5711_v39, %v2486_v28  ;;  %v2664_v22 = vmul.f32 %v5698_v51, %v2527_v0 }
 0x503   : > { %v2559_v23 = vmul.f32 %v4304_v14, %v2543_v41  ;;  %v2735_v11 = vadd.f32 %v2719_v16, %v2699_v52  ;;  %v2702_v61 = vadd.f32 %v2686_v19, %v2666_v3  ;;  %v2684_v47 = vmul.f32 %v5704_v9, %v2486_v28 }
 0x504   : > { %v2754_v8 = vmul.f32 %v5707_v12, %v2527_v0  ;;  %v2722_v15 = vmul.f32 %v5726_v21, %v2561_v63  ;;  %v2788_v56 = vadd.f32 %v2774_v54, %v2756_v29  ;;  %v2613_v60 = vadd.f32 %v2599_v1, %v2581_v20 }
 0x505   : > { %v2631_v40 = vmul.f32 %v5729_v48, %v2559_v23  ;;  %v2865_v14 = vadd.f32 %v5778_v18, %v2843_v25  ;;  %v2700_v62 = vadd.f32 %v2684_v47, %v2664_v22  ;;  %v2720_v49 = vmul.f32 %v5726_v21, %v2559_v23 }
 0x506   : > { %v2772_v39 = vmul.f32 %v5715_v31, %v2486_v28  ;;  %v2918_v51 = vadd.f32 %v5963_v5, %v5958_v36  ;;  %v2806_v9 = vmul.f32 %v5737_v59, %v2561_v63  ;;  %v6441_v12 = vmax.f32 %v5875_v10, 0.0 }
 0x507   : > { %v2645_v43 = vadd.f32 %v2631_v40, %v2613_v60  ;;  %v2738_v48 = vadd.f32 %v2722_v15, %v2702_v61  ;;  %v2736_v55 = vadd.f32 %v2720_v49, %v2700_v62  ;;  %v2804_v21 = vmul.f32 %v5737_v59, %v2559_v23 }
 0x508   : > { %v5995_v4 = vsel %vm2886_vm6, %v5528_v42, %v6441_v12  ;;  %v2786_v33 = vadd.f32 %v2772_v39, %v2754_v8  ;;  %v2832_v31 = vadd.f32 %v2735_v11, %v5924_v24  ;;  %v2820_v28 = vadd.f32 %v2806_v9, %v2788_v56  ;;  %v6444_v11 = vld [vmem:[#allocation33_spill] sm:$0xff] }
 0x509   : > { %v2834_v2 = vadd.f32 %v2737_v37, %v2645_v43  ;;  %v2909_v50 = vadd.f32 %v5900_v30, %v5995_v4  ;;  %v2881_v46 = vmax.f32 %v2865_v14, 0.0  ;;  %v2833_v10 = vadd.f32 %v2736_v55, %v2644_v34  ;;  %v3550_v43 = vld [vmem:[%s6225_s8] ss:$0 sm:$0xff] }
 0x50a   : > { %v2818_v52 = vadd.f32 %v2804_v21, %v2786_v33  ;;  %v6442_v16 = vmax.f32 %v5880_v26, 0.0  ;;  %v2919_v44 = vadd.f32 %v2918_v51, %v5972_v38  ;;  %v2848_v37 = vadd.f32 %v2738_v48, %v5946_v32  ;;  %v3933_v21 = vld [vmem:[%s6228_s11 + $0x38] sm:$0xff]  }
 0x50b   : > { %v2846_v59 = vadd.f32 %v2834_v2, %v2820_v28  ;;  %v2845_v3 = vadd.f32 %v2833_v10, %v2819_v35  ;;  %v6443_v30 = vmax.f32 %v5856_v27, 0.0  ;;  %v6445_v9 = vmov 0.0   ;;  %3820 = vmatprep.subr.bf16.mxu0 %v3933_v21  ;;  %v3935_v28 = vld [vmem:[%s6228_s11 + $0x28] sm:$0xff]   ;;  %v3936_v2 = vld [vmem:[%s6228_s11 + $0x20] sm:$0xff]  }
 0x50c   : > { %v6006_v42 = vsel %vm2886_vm6, %v5549_v58, %v6442_v16  ;;  %v2844_v45 = vadd.f32 %v2832_v31, %v2818_v52  ;;  %v6022_v58 = vsel %vm2886_vm6, %v5600_v17, %v2881_v46  ;;  %v2869_v0 = vadd.f32 %v5778_v18, %v2848_v37  ;;  %3821 = vmatpush3.bf16.msra.mxu0 %v3933_v21  ;;  %v3934_v31 = vld [vmem:[%s6228_s11 + $0x30] sm:$0xff]   ;;  %v3939_v52 = vld [vmem:[%s6228_s11 + $0x8] sm:$0xff]   ;;  %v3940_v10 = vld [vmem:[%s6228_s11] sm:$0xff]  }
 0x50d   : > { %v2910_v24 = vadd.f32 %v2909_v50, %v6006_v42  ;;  %v6016_v26 = vsel %vm2886_vm6, %v5537_v13, %v6443_v30  ;;  %v2867_v32 = vadd.f32 %v5778_v18, %v2845_v3  ;;  %v2868_v35 = vadd.f32 %v5778_v18, %v2846_v59  ;;  %3822 = vmatprep.subr.bf16.mxu0 %v3934_v31  ;;  %v3937_v50 = vld [vmem:[%s6228_s11 + $0x18] sm:$0xff]   ;;  %v3938_v46 = vld [vmem:[%s6228_s11 + $0x10] sm:$0xff]   ;;  %v3551_v16 = vld [vmem:[%s6227_s10] ss:$0 sm:$0xff] }
 0x50e   : > { %v2866_v63 = vadd.f32 %v5778_v18, %v2844_v45  ;;  %v2920_v27 = vadd.f32 %v2919_v44, %v6022_v58  ;;  %v2885_v20 = vmax.f32 %v2869_v0, 0.0  ;;  %v4011_v30 = vmov 1966171168  }
 0x50f   : > { %v2911_v34 = vadd.f32 %v2910_v24, %v6016_v26  ;;  %v2883_v41 = vmax.f32 %v2867_v32, 0.0  ;;  %v2884_v25 = vmax.f32 %v2868_v35, 0.0  ;;  %v6446_v32 = vld [vmem:[#allocation5_spill] sm:$0xff] }
 0x510   : > { %v2882_v13 = vmax.f32 %v2866_v63, 0.0  ;;  %v6050_v61 = vsel %vm2886_vm6, %v6444_v11, %v2885_v20  ;;  %3823 = vmatpush3.bf16.msra.mxu0 %v3934_v31 }
 0x511   : > { %v2912_v29 = vrot.slane %v2911_v34, 4  ;;  %v6037_v17 = vsel %vm2886_vm6, %v5612_v53, %v2883_v41  ;;  %v6044_v18 = vsel %vm2886_vm6, %v5619_v57, %v2884_v25  ;;  %3824 = vmatprep.subr.bf16.mxu0 %v3935_v28  ;;  %v6447_v41 = vld [vmem:[#allocation27_spill] sm:$0xff] }
 0x512   : > { %v6032_v19 = vsel %vm2886_vm6, %v5607_v6, %v2882_v13 }
 0x513   : > { %v2921_v54 = vadd.f32 %v2920_v27, %v6032_v19  ;;  %v2913_v23 = vadd.f32 %v2912_v29, %v2911_v34  ;;  %v3123_v34 = vunpack.c.l.s4 %v4011_v30 }
 0x514   : > { %3825 = vmatpush3.bf16.msra.mxu0 %v3935_v28  ;;  %v6455_v28 = vld [vmem:[#allocation10_spill] sm:$0xff] }
 0x515   : > { %v2922_v1 = vadd.f32 %v2921_v54, %v6037_v17  ;;  %v2914_v22 = vrot.slane %v2913_v23, 2  ;;  %3826 = vmatprep.subr.bf16.mxu0 %v3936_v2  ;;  %v3124_v63 = vunpack.c.0.s8 %v3123_v34 }
 0x517   : > { %v2923_v6 = vadd.f32 %v2922_v1, %v6044_v18  ;;  %v2915_v47 = vadd.f32 %v2914_v22, %v2913_v23  ;;  %v3127_v35 = vsub.s32 %v3124_v63, %v6446_v32  ;;  %v6448_v23 = vld [vmem:[#allocation38_spill] sm:$0xff]  ;;  %v6449_v1 = vld [vmem:[#allocation37_spill] sm:$0xff]  ;;  %v6458_v63 = vld [vmem:[#allocation11_spill] sm:$0xff] }
 0x518   : > { %3827 = vmatpush3.bf16.msra.mxu0 %v3936_v2 }
 0x519   : > { %v2924_v53 = vadd.f32 %v2923_v6, %v6050_v61  ;;  %v2916_v56 = vrot.slane %v2915_v47, 1  ;;  %3828 = vmatprep.subr.bf16.mxu0 %v3937_v50  ;;  %v6450_v6 = vld [vmem:[#allocation39_spill] sm:$0xff] }
 0x51b   : > { %v2925_v8 = vrot.slane %v2924_v53, 4  ;;  %v2917_v14 = vadd.f32 %v2916_v56, %v2915_v47 }
 0x51c   : > { %3829 = vmatpush3.bf16.msra.mxu0 %v3937_v50 }
 0x51d   : > { %v2926_v15 = vadd.f32 %v2925_v8, %v2924_v53  ;;  %v2932_v49 = vmul.f32 0.015625, %v2917_v14  ;;  %3830 = vmatprep.subr.bf16.mxu0 %v3938_v46  ;;  %v6451_v53 = vld [vmem:[#allocation40_spill] sm:$0xff] }
 0x51e   : > { %v6452_v8 = vld [vmem:[#allocation36_spill] sm:$0xff] }
 0x51f   : > { %v2927_v60 = vrot.slane %v2926_v15, 2 }
 0x520   : > { %3831 = vmatpush3.bf16.msra.mxu0 %v3938_v46 }
 0x521   : > { %v2928_v40 = vadd.f32 %v2927_v60, %v2926_v15  ;;  %3832 = vmatprep.subr.bf16.mxu0 %v3939_v52 }
 0x523   : > { %v2929_v62 = vrot.slane %v2928_v40, 1 }
 0x524   : > { %3833 = vmatpush3.bf16.msra.mxu0 %v3939_v52 }
 0x525   : > { %v2930_v57 = vadd.f32 %v2929_v62, %v2928_v40  ;;  %3834 = vmatprep.subr.bf16.mxu0 %v3940_v10 }
 0x527   : > { %v2933_v39 = vmul.f32 0.015625, %v2930_v57 }
 0x528   : > { %3835 = vmatpush3.bf16.msra.mxu0 %v3940_v10  ;;  %v6456_v10 = vld [vmem:[#allocation8_spill] sm:$0xff] }
 0x529   : > { %v2960_v51 = vsel %vm2959_vm7, %v2933_v39, %v2932_v49 }
 0x52a   : > { %3813 = vmatmul.mubr.f32.vlgmr.msra.gmra.mxu1 %v2960_v51 }
 0x52b   : > { %3817 = vmatprep.mubr.msk.f32.mxu1 %vm4010_vm5, %v6445_v9  ;;  %3816 = vmatpush3.msra.mxu1 %v3033_v7 }
 0x5ea   : > { %v3028_v12 = vpop.f32.mrf.mxu1 }
 0x5eb   : > { %v3029_v48 = vadd.f32 %v3550_v43, %v3028_v12 }
 0x5ec   : > { %v3814_v55 = vpop.f32.mrf.mxu1 }
 0x5ed   : > { %v3032_v33 = vmax.f32 %v3029_v48, 0.0 }
 0x5ef   : > { %3818 = vmatmul.mubr.msk.f32.vlgmr.msra.gmra.mxu1 %vm3041_vm8, %v3032_v33 }
 0x6af   : > { %v3111_v44 = vpop.f32.mrf.mxu1 }
 0x6b0   : > { %v3112_v59 = vadd.f32 %v3551_v16, %v3111_v44 }
 0x6b1   : > { %v3819_v24 = vpop.f32.mrf.mxu1 }
 0x6b2   : > { %v3553_v37 = vmul.f32 -1.442695, %v3112_v59 }
 0x6b4   : > { %3941 = vpow2.f32 %v3553_v37  ;;  %v6457_v37 = vld [vmem:[#allocation13_spill] sm:$0xff] }
 0x6c1   : > { %v3942_v45 = vpop.eup %3941 }
 0x6c2   : > { %v3118_v3 = vadd.f32 1.0, %v3942_v45 }
 0x6c4   : > { %3943 = vrcp.f32 %v3118_v3 }
 0x6d1   : > { %v3944_v27 = vpop.eup %3943 }
 0x6d2   : > { %v3128_v29 = vrot.slane %v3944_v27, %v3127_v35 }
 0x6d4   : > { %v3129_v0 = vcombine.high %v3128_v29, %v3128_v29  ;;  %v3136_v13 = vrot.slane %v3128_v29, %v3127_v35 }
 0x6d6   : > { %v3147_v25 = vrot.slane %v3136_v13, %v6447_v41  ;;  %v3143_v54 = vrot.slane %v3129_v0, %v3127_v35  ;;  %v6459_v0 = vld [vmem:[#allocation14_spill] sm:$0xff] }
 0x6d8   : > { %v3154_v20 = vmul.f32 %v3147_v25, %v6448_v23  ;;  %v3155_v22 = vmul.f32 %v3147_v25, %v6449_v1  ;;  %v3156_v11 = vmul.f32 %v3147_v25, %v6450_v6  ;;  %v3157_v47 = vmul.f32 %v3147_v25, %v6451_v53  ;;  %v6460_v23 = vld [vmem:[#allocation12_spill] sm:$0xff] }
 0x6d9   : > { %v3158_v15 = vmul.f32 %v3147_v25, %v6452_v8  ;;  %v3159_v56 = vmul.f32 %v3147_v25, %v5995_v4  ;;  %v3151_v14 = vrot.slane %v3143_v54, %v6447_v41  ;;  %v3160_v57 = vmul.f32 %v3147_v25, %v6006_v42 }
 0x6da   : > { %v3186_v60 = vpack.c.bf16 %v3155_v22, %v3154_v20  ;;  %v3187_v40 = vpack.c.bf16 %v3157_v47, %v3156_v11  ;;  %v3161_v49 = vmul.f32 %v3147_v25, %v6016_v26  ;;  %v6461_v11 = vld [vmem:[#allocation18_spill] sm:$0xff] }
 0x6db   : > { %v3188_v62 = vpack.c.bf16 %v3159_v56, %v3158_v15  ;;  %v3162_v39 = vmul.f32 %v3151_v14, %v5958_v36  ;;  %v3163_v51 = vmul.f32 %v3151_v14, %v5963_v5  ;;  %v3164_v4 = vmul.f32 %v3151_v14, %v5972_v38  ;;  %v3945_v38 = vld [vmem:[%s6219_s2] sm:$0x3]  ;;  %v6462_v56 = vld [vmem:[#allocation15_spill] sm:$0xff] }
 0x6dc   : > { %3836 = vmatprep.mubr.bf16.mxu0 %v3186_v60  ;;  %v3189_v9 = vpack.c.bf16 %v3161_v49, %v3160_v57  ;;  %v3165_v43 = vmul.f32 %v3151_v14, %v6022_v58  ;;  %v3166_v12 = vmul.f32 %v3151_v14, %v6032_v19  ;;  %v3167_v42 = vmul.f32 %v3151_v14, %v6037_v17  ;;  %v6453_v19 = vld [vmem:[#allocation9_spill] sm:$0xff]  ;;  %v6463_v57 = vld [vmem:[#allocation19_spill] sm:$0xff] }
 0x6dd   : > { %3837 = vmatmul.mubr.bf16.vlgmr.msra.gmra.mxu0 %v3187_v40  ;;  %v3190_v7 = vpack.c.bf16 %v3163_v51, %v3162_v39  ;;  %v3168_v36 = vmul.f32 %v3151_v14, %v6044_v18  ;;  %v3169_v5 = vmul.f32 %v3151_v14, %v6050_v61  ;;  %v6112_v58 = vrot.slane %v3945_v38, %v6447_v41  ;;  %v6454_v18 = vld [vmem:[#allocation7_spill] sm:$0xff]  ;;  %v6466_v38 = vld [vmem:[#allocation21_spill] sm:$0xff] }
 0x6de   : > { %3840 = vmatprep.mubr.bf16.mxu0 %v3188_v62  ;;  %v3191_v48 = vpack.c.bf16 %v3165_v43, %v3164_v4  ;;  %v3192_v26 = vpack.c.bf16 %v3167_v42, %v3166_v12 }
 0x6df   : > { %v3193_v55 = vpack.c.bf16 %v3169_v5, %v3168_v36  ;;  %v549_v17 = vadd.f32 %v6453_v19, %v6112_v58  ;;  %v539_v21 = vadd.f32 %v6454_v18, %v6112_v58  ;;  %v553_v2 = vadd.f32 %v6455_v28, %v6112_v58 }
 0x6e0   : > { %v543_v16 = vadd.f32 %v6456_v10, %v6112_v58  ;;  %v569_v45 = vadd.f32 %v6457_v37, %v6112_v58  ;;  %v559_v32 = vadd.f32 %v6458_v63, %v6112_v58  ;;  %v573_v13 = vadd.f32 %v6459_v0, %v6112_v58 }
 0x6e1   : > { %v563_v20 = vadd.f32 %v6460_v23, %v6112_v58  ;;  %v589_v53 = vadd.f32 %v6461_v11, %v6112_v58  ;;  %v579_v60 = vadd.f32 %v6462_v56, %v6112_v58  ;;  %v593_v49 = vadd.f32 %v6463_v57, %v6112_v58 }
 0x6e2   : > { %v599_v19 = vadd.f32 %v6466_v38, %v6112_v58 }
 0x6e5   : > { %3841 = vmatmul.mubr.bf16.gmra.mxu0 %v3189_v9 }
 0x6e6   : > { %3844 = vmatprep.mubr.bf16.mxu0 %v3190_v7  ;;  %v6464_v7 = vld [vmem:[#allocation16_spill] sm:$0xff] }
 0x6e7   : > { %v583_v4 = vadd.f32 %v6464_v7, %v6112_v58 }
 0x6ed   : > { %3845 = vmatmul.mubr.bf16.gmra.mxu0 %v3191_v48  ;;  %v6465_v48 = vld [vmem:[#allocation17_spill] sm:$0xff] }
 0x6ee   : > { %3848 = vmatprep.mubr.bf16.mxu0 %v3192_v26  ;;  %v609_v26 = vadd.f32 %v6465_v48, %v6112_v58 }
 0x6f5   : > { %3849 = vmatmul.mubr.bf16.gmra.mxu0 %v3193_v55 }
 0x79d   : > { %v3838_v33 = vpop.f32.mrf.mxu0 }
 0x79e   : > { %v3285_v61 = vadd.f32 %v3838_v33, %v549_v17 }
 0x79f   : > { %v3276_v31 = vpop.f32.mrf.mxu0 }
 0x7a0   : > { %v3341_v50 = vmax.f32 %v3285_v61, 0.0  ;;  %v3277_v46 = vadd.f32 %v3276_v31, %v539_v21  ;;  %v6467_v21 = vld [vmem:[#allocation20_spill] sm:$0xff] }
 0x7a1   : > { %v3839_v52 = vpop.f32.mrf.mxu0  ;;  %v613_v61 = vadd.f32 %v6467_v21, %v6112_v58 }
 0x7a2   : > { %3357 = vst [vmem:[%s6124_s20 + $0x10] sm:$0xff] %v3341_v50  ;;  %v3339_v44 = vmax.f32 %v3277_v46, 0.0  ;;  %v3288_v59 = vadd.f32 %v3839_v52, %v553_v2  ;;  %v6468_v50 = vld [vmem:[#allocation22_spill] sm:$0xff] }
 0x7a3   : > { %v3279_v24 = vpop.f32.mrf.mxu0  ;;  %v603_v46 = vadd.f32 %v6468_v50, %v6112_v58 }
 0x7a4   : > { %3355 = vst [vmem:[%s6124_s20] sm:$0xff] %v3339_v44  ;;  %v3342_v3 = vmax.f32 %v3288_v59, 0.0  ;;  %v3280_v30 = vadd.f32 %v3279_v24, %v543_v16 }
 0x7a5   : > { %v3842_v34 = vpop.f32.mrf.mxu0 }
 0x7a6   : > { %3358 = vst [vmem:[%s6124_s20 + $0x18] sm:$0xff] %v3342_v3  ;;  %v3340_v35 = vmax.f32 %v3280_v30, 0.0  ;;  %v3301_v27 = vadd.f32 %v3842_v34, %v569_v45 }
 0x7a7   : > { %v3292_v29 = vpop.f32.mrf.mxu0 }
 0x7a8   : > { %3356 = vst [vmem:[%s6124_s20 + $0x8] sm:$0xff] %v3340_v35  ;;  %v3345_v41 = vmax.f32 %v3301_v27, 0.0  ;;  %v3293_v25 = vadd.f32 %v3292_v29, %v559_v32 }
 0x7a9   : > { %v3843_v54 = vpop.f32.mrf.mxu0 }
 0x7aa   : > { %3361 = vst [vmem:[%s6124_s20 + $0x30] sm:$0xff] %v3345_v41  ;;  %v3343_v1 = vmax.f32 %v3293_v25, 0.0  ;;  %v3304_v22 = vadd.f32 %v3843_v54, %v573_v13 }
 0x7ab   : > { %v3295_v6 = vpop.f32.mrf.mxu0 }
 0x7ac   : > { %3359 = vst [vmem:[%s6124_s20 + $0x20] sm:$0xff] %v3343_v1  ;;  %v3346_v47 = vmax.f32 %v3304_v22, 0.0  ;;  %v3296_v8 = vadd.f32 %v3295_v6, %v563_v20 }
 0x7ad   : > { %v3846_v15 = vpop.f32.mrf.mxu0 }
 0x7ae   : > { %3362 = vst [vmem:[%s6124_s20 + $0x38] sm:$0xff] %v3346_v47  ;;  %v3344_v40 = vmax.f32 %v3296_v8, 0.0  ;;  %v3317_v14 = vadd.f32 %v3846_v15, %v589_v53 }
 0x7af   : > { %v3308_v62 = vpop.f32.mrf.mxu0 }
 0x7b0   : > { %3360 = vst [vmem:[%s6124_s20 + $0x28] sm:$0xff] %v3344_v40  ;;  %v3349_v39 = vmax.f32 %v3317_v14, 0.0  ;;  %v3309_v51 = vadd.f32 %v3308_v62, %v579_v60 }
 0x7b1   : > { %v3847_v9 = vpop.f32.mrf.mxu0 }
 0x7b2   : > { %3365 = vst [vmem:[%s6124_s20 + $0x50] sm:$0xff] %v3349_v39  ;;  %v3347_v43 = vmax.f32 %v3309_v51, 0.0  ;;  %v3320_v12 = vadd.f32 %v3847_v9, %v593_v49 }
 0x7b3   : > { %v3311_v42 = vpop.f32.mrf.mxu0 }
 0x7b4   : > { %3363 = vst [vmem:[%s6124_s20 + $0x40] sm:$0xff] %v3347_v43  ;;  %v3350_v36 = vmax.f32 %v3320_v12, 0.0  ;;  %v3312_v5 = vadd.f32 %v3311_v42, %v583_v4 }
 0x7b5   : > { %v3850_v55 = vpop.f32.mrf.mxu0 }
 0x7b6   : > { %3366 = vst [vmem:[%s6124_s20 + $0x58] sm:$0xff] %v3350_v36  ;;  %v3348_v17 = vmax.f32 %v3312_v5, 0.0  ;;  %v3333_v33 = vadd.f32 %v3850_v55, %v609_v26 }
 0x7b7   : > { %v3324_v18 = vpop.f32.mrf.mxu0 }
 0x7b8   : > { %3364 = vst [vmem:[%s6124_s20 + $0x48] sm:$0xff] %v3348_v17  ;;  %v3353_v31 = vmax.f32 %v3333_v33, 0.0  ;;  %v3325_v28 = vadd.f32 %v3324_v18, %v599_v19 }
 0x7b9   : > { %v3851_v2 = vpop.f32.mrf.mxu0 }
 0x7ba   : > { %3369 = vst [vmem:[%s6124_s20 + $0x70] sm:$0xff] %v3353_v31  ;;  %v3351_v52 = vmax.f32 %v3325_v28, 0.0  ;;  %v3336_v10 = vadd.f32 %v3851_v2, %v613_v61 }
 0x7bb   : > { %v3327_v16 = vpop.f32.mrf.mxu0 }
 0x7bc   : > { %3367 = vst [vmem:[%s6124_s20 + $0x60] sm:$0xff] %v3351_v52  ;;  %v3354_v44 = vmax.f32 %v3336_v10, 0.0  ;;  %v3328_v59 = vadd.f32 %v3327_v16, %v603_v46 }
 0x7be   : > { %3370 = vst [vmem:[%s6124_s20 + $0x78] sm:$0xff] %v3354_v44  ;;  %v3352_v58 = vmax.f32 %v3328_v59, 0.0 }
 0x7c0   : > { %3368 = vst [vmem:[%s6124_s20 + $0x68] sm:$0xff] %v3352_v58 }
 0x7c1   : > { %3959 = shalt.err (!%p3956_p3)
}
 0x7c2   : > { %s3960_s16 = scalar_lea.hbm %s6169_s18, 2048  ;;  %s3964_s17 = scalar_lea.hbm %s6229_s12, 4096 }
 0x7c3   : > { %p3961_p4 = scmp.ne.s32.totalorder %s6169_s18, %s3960_s16  ;;  %p3965_p9 = scmp.lt.s32.totalorder %s6169_s18, %s6229_s12 }
 0x7c4   : > { %p3966_p10 = scmp.lt.s32.totalorder %s3964_s17, %s3960_s16 }
 0x7c5   : > { %p3962_p7 = pnand %p3961_p4, %p4118_p5 }
 0x7c6   : > { %p3967_p11 = por %p3966_p10, %p3965_p9 }
 0x7c7   : > { %p3963_p8 = pneg %p3962_p7 }
 0x7c9   : > { %p3968_p12 = pnand %p3967_p11, %p3963_p8 }
 0x7cb   : > { %3971 = shalt.err (!%p3968_p12)
}
 0x7cc   : > { %s4013_s19 = smov 128   ;;  %s4014_s29 = smov 8  }
 0x7cd   : > { %3856 = dma.vmem_to_hbm [thread:$0]  (%p4118_p5), %s6171_s28, 2048, %s6169_s18, %s6177_s25, %s4013_s19, %s4013_s19, %s4014_s29  }
 0x7ce PF: > { %p3862_p13 = scmp.ge.s32.totalorder %s4006_s24, 2  ;;  %s3401_s26 = sand.u32 1, %s3994_s21  }
 0x7cf   : > { %s3402_s0 = scalar_lea.sflag [#allocation3], %s3401_s26 }
 0x7d0   : > { %p3859_p0 = pnand %p3862_p13, %p4122_p6 }
 0x7d2   : > { %p3860_p1 = pneg %p3859_p0 }
 0x7d4   : > { %3989 = dma.done.wait (%p3860_p1), %s3402_s0, 2048  }
 0x7d5   : > { %3991 = vsyncadd (%p3860_p1), %s3402_s0, 4294965248  ;;  %p22_p2 = scmp.ge.s32.totalorder %s4105_s27, 4   ;;  %s6469_s21 = smov %s3998_s22 }
 0x7d6   : > { %s6470_s22 = smov %s4002_s23  ;;  %s6471_s23 = smov %s4116_s30 }
 0x7d7   : > { %s6472_s24 = smov %s4105_s27  ;;  %24 = sbr.rel (!%p22_p2) target bundleno = 6 (0x6), region = 108 }
 0x7dc   :  { %3407 = vsyncpa [#allocation3], 1 }
 0x7dd   :  { %3409 = vsyncpa [#allocation3 + $0x1], 1 }

</bundles_post_ra>
